<compile_context>
chip_gen: v5e
topology: v5e:2x2
jax: 0.10.0
libtpu: 0.0.40
codegen_flags: <defaults>
</compile_context>

<pallas_src>
import math

import jax
import jax.numpy as jnp
from jax import lax
from jax.experimental import pallas as pl
from jax.experimental.pallas import tpu as pltpu


def _round_up(x, m):
    return ((x + m - 1) // m) * m


def _make_melstm_kernel(num_layers: int, b_pad: int, h_pad: int, t_chunk: int):
    """Kernel over grid=(time chunks,): layer-major LSTM stack per chunk."""

    unroll = max(1, min(8, t_chunk))   # partial unroll of the timestep loop

    def kernel(*refs):
        # refs = [x_ref,
        #         (w_ih_t, w_hh_t, bias) * num_layers,
        #         h_out_ref, c_out_ref,
        #         h_state, c_state, act, z]
        x_ref = refs[0]
        w_refs = refs[1:1 + 3 * num_layers]
        h_out_ref = refs[1 + 3 * num_layers]
        c_out_ref = refs[2 + 3 * num_layers]
        h_state = refs[3 + 3 * num_layers]
        c_state = refs[4 + 3 * num_layers]
        act = refs[5 + 3 * num_layers]      # (Tc*Bp, Hp) next layer's input seq
        z = refs[6 + 3 * num_layers]        # (Tc*Bp, 4*Hp) input projection

        chunk = pl.program_id(0)

        # initial_states is None in the PyTorch forward -> zeros.
        @pl.when(chunk == 0)
        def _init():
            h_state[...] = jnp.zeros_like(h_state)
            c_state[...] = jnp.zeros_like(c_state)

        for l in range(num_layers):
            w_ih = w_refs[3 * l][...]       # (in_l, 4*Hp)  compute dtype
            w_hh = w_refs[3 * l + 1][...]   # (Hp, 4*Hp)    compute dtype
            bias = w_refs[3 * l + 2][...]   # (1, 4*Hp)     f32
            compute_dtype = w_hh.dtype

            # Input projection for ALL timesteps of the chunk: one big MXU
            # matmul with M = Tc*Bp rows, bias folded in once per layer.
            inp = x_ref[...] if l == 0 else act[...]
            z[...] = (jnp.dot(inp, w_ih, preferred_element_type=jnp.float32)
                      + bias)

            is_last = (l == num_layers - 1)

            def step(t, carry, w_hh=w_hh, is_last=is_last,
                     compute_dtype=compute_dtype):
                h, c = carry                              # (Bp, Hp) f32
                row0 = pl.multiple_of(t * b_pad, b_pad)   # sublane-aligned
                rows = pl.ds(row0, b_pad)
                # Only the recurrent matmul remains per timestep.
                pre = z[rows, :] + jnp.dot(
                    h.astype(compute_dtype), w_hh,
                    preferred_element_type=jnp.float32)   # (Bp, 4*Hp)
                # Gate slices are lane-aligned (Hp is a multiple of 128).
                i = jax.nn.sigmoid(pre[:, :h_pad])
                f = jax.nn.sigmoid(pre[:, h_pad:2 * h_pad])
                g = jnp.tanh(pre[:, 2 * h_pad:3 * h_pad])
                o = jax.nn.sigmoid(pre[:, 3 * h_pad:])
                c_new = f * c + i * g
                h_new = o * jnp.tanh(c_new)
                if not is_last:
                    # Feed the next layer's batched input projection.  The last
                    # layer's activations are never read -> skip the store
                    # (frees a vst slot per step on v5e's hottest loop).
                    act[rows, :] = h_new.astype(act.dtype)
                else:
                    # Only the last layer's (h, c) is returned.
                    h_out_ref[rows, :] = h_new
                    c_out_ref[rows, :] = c_new
                return (h_new, c_new)

            h_fin, c_fin = lax.fori_loop(0, t_chunk, step,
                                         (h_state[l], c_state[l]),
                                         unroll=unroll)
            h_state[l] = h_fin
            c_state[l] = c_fin

    return kernel


def pack_melstm_params(params, hidden_size, compute_dtype=jnp.float32):
    """Pack PyTorch-layout weights once, outside the per-call path.

    params: list of (weight_ih (4H,in), weight_hh (4H,H), bias (4H,)).
    Gate dim is padded to Hp=round_up(H,128) with gate stride Hp; for layers
    >= 1 the input columns are padded to Hp too (the previous layer's h is
    zero-padded).  Weights are transposed so the kernel does row-major x @ W.

    compute_dtype=jnp.bfloat16 halves weight VMEM/DMA and improves MXU rate on
    ALL generations (v5e's MXU is natively bf16 as well); accumulation and the
    gate math stay f32.
    """
    H = hidden_size
    Hp = _round_up(H, 128)
    packed = []
    for l, (w_ih, w_hh, b) in enumerate(params):
        in_sz = w_ih.shape[1]
        w_ih4 = jnp.pad(w_ih.reshape(4, H, in_sz),
                        ((0, 0), (0, Hp - H), (0, 0)))
        if l > 0:
            # previous layer's h carries Hp (zero-padded) units
            w_ih4 = jnp.pad(w_ih4, ((0, 0), (0, 0), (0, Hp - in_sz)))
        w_ih_t = jnp.transpose(w_ih4.reshape(4 * Hp, -1)).astype(compute_dtype)

        w_hh4 = jnp.pad(w_hh.reshape(4, H, H),
                        ((0, 0), (0, Hp - H), (0, Hp - H)))
        w_hh_t = jnp.transpose(w_hh4.reshape(4 * Hp, Hp)).astype(compute_dtype)

        b2d = jnp.pad(b.reshape(4, H), ((0, 0), (0, Hp - H))
                      ).reshape(1, 4 * Hp).astype(jnp.float32)
        packed.append((w_ih_t, w_hh_t, b2d))
    return packed


def _estimate_vmem_bytes(packed_params, in_size, h_pad, b_pad, t_chunk,
                         num_layers, compute_dtype):
    """Rough upper bound on the kernel's VMEM footprint (bytes)."""
    cbytes = jnp.dtype(compute_dtype).itemsize
    w_bytes = 0
    for (w_ih_t, w_hh_t, b2d) in packed_params:
        w_bytes += (int(w_ih_t.size) * w_ih_t.dtype.itemsize
                    + int(w_hh_t.size) * w_hh_t.dtype.itemsize
                    + int(b2d.size) * b2d.dtype.itemsize)
    w_bytes *= 2                                   # pipeline double-buffering
    x_bytes = 2 * t_chunk * b_pad * in_size * cbytes
    out_bytes = 2 * 2 * t_chunk * b_pad * h_pad * 4
    scratch = (2 * num_layers * b_pad * h_pad * 4        # h/c state
               + t_chunk * b_pad * h_pad * cbytes        # act
               + t_chunk * b_pad * 4 * h_pad * 4)        # z
    return w_bytes + x_bytes + out_bytes + scratch


def _pick_vmem_limit(need_bytes):
    """Request only what is needed (plus headroom), below physical VMEM."""
    try:
        info = pltpu.get_tpu_info()
        cap = int(getattr(info, "vmem_capacity_bytes", 0)) or (64 << 20)
    except Exception:  # pragma: no cover - info query unavailable
        cap = 64 << 20                      # conservative: v7x per-TC VMEM
    limit = int(need_bytes * 1.25) + (2 << 20)
    limit = max(limit, 16 << 20)
    limit = min(limit, cap * 7 // 8)        # leave headroom for internal scratch
    return limit


def melstm_forward(x_btf, packed_params, hidden_size, *, t_chunk=64):
    """x_btf: (B, T, input_size) batch-major (PyTorch convention).

    packed_params: output of pack_melstm_params (pre-transposed / padded).
    Returns (h, c), each (B, T, H), matching return_sequences=True.
    """
    B, T, I = x_btf.shape
    H = hidden_size
    Hp = _round_up(H, 128)          # lane-aligned hidden
    Bp = _round_up(B, 8)            # sublane-aligned batch
    L = len(packed_params)
    compute_dtype = packed_params[0][0].dtype

    # Pick Tc to minimize time padding waste (padded timesteps are computed
    # then discarded): split T into the fewest <=t_chunk chunks, balanced.
    n_chunks = max(1, pl.cdiv(T, max(1, min(t_chunk, T))))
    Tc = pl.cdiv(T, n_chunks)
    T_pad = Tc * n_chunks

    # Time-major, batch/time padded, flattened to a lane/sublane-dense 2D slab
    # (row = t * Bp + b).  Cast to compute dtype FIRST so the transpose/pad
    # HBM pass is done at the narrow width on the bf16 path.
    x_tb = jnp.transpose(x_btf.astype(compute_dtype), (1, 0, 2))
    x_tb = jnp.pad(x_tb, ((0, T_pad - T), (0, Bp - B), (0, 0)))
    x2d = x_tb.reshape(T_pad * Bp, I)

    flat_args = [x2d]
    in_specs = [pl.BlockSpec((Tc * Bp, I), lambda c: (c, 0))]
    for (w_ih_t, w_hh_t, b2d) in packed_params:
        flat_args += [w_ih_t, w_hh_t, b2d]
        # Constant block index -> each weight is DMA'd into VMEM only once.
        in_specs += [
            pl.BlockSpec(w_ih_t.shape, lambda c: (0, 0)),
            pl.BlockSpec(w_hh_t.shape, lambda c: (0, 0)),
            pl.BlockSpec(b2d.shape, lambda c: (0, 0)),
        ]

    kernel = _make_melstm_kernel(L, Bp, Hp, Tc)

    vmem_limit = _pick_vmem_limit(
        _estimate_vmem_bytes(packed_params, I, Hp, Bp, Tc, L, compute_dtype))

    h2d, c2d = pl.pallas_call(
        kernel,
        out_shape=(
            jax.ShapeDtypeStruct((T_pad * Bp, Hp), jnp.float32),
            jax.ShapeDtypeStruct((T_pad * Bp, Hp), jnp.float32),
        ),
        grid_spec=pltpu.PrefetchScalarGridSpec(
            num_scalar_prefetch=0,
            grid=(n_chunks,),
            in_specs=in_specs,
            out_specs=[
                pl.BlockSpec((Tc * Bp, Hp), lambda c: (c, 0)),
                pl.BlockSpec((Tc * Bp, Hp), lambda c: (c, 0)),
            ],
            scratch_shapes=[
                pltpu.VMEM((L, Bp, Hp), jnp.float32),        # h state per layer
                pltpu.VMEM((L, Bp, Hp), jnp.float32),        # c state per layer
                pltpu.VMEM((Tc * Bp, Hp), compute_dtype),    # layer activations
                pltpu.VMEM((Tc * Bp, 4 * Hp), jnp.float32),  # input projection
            ],
        ),
        compiler_params=pltpu.CompilerParams(
            dimension_semantics=("arbitrary",),   # recurrence across chunks
            vmem_limit_bytes=vmem_limit,
        ),
    )(*flat_args)

    # Strip padding and return batch-major (B, T, H).
    h = h2d.reshape(T_pad, Bp, Hp)[:T, :B, :H]
    c = c2d.reshape(T_pad, Bp, Hp)[:T, :B, :H]
    return jnp.transpose(h, (1, 0, 2)), jnp.transpose(c, (1, 0, 2))


def _init_params(key, input_size, hidden_size, num_layers):
    """Deterministic uniform(-stdv, stdv) init mirroring reset_parameters()."""
    stdv = 1.0 / math.sqrt(hidden_size)
    params = []
    in_sz = input_size
    for _ in range(num_layers):
        key, k1, k2, k3 = jax.random.split(key, 4)
        w_ih = jax.random.uniform(k1, (4 * hidden_size, in_sz),
                                  minval=-stdv, maxval=stdv, dtype=jnp.float32)
        w_hh = jax.random.uniform(k2, (4 * hidden_size, hidden_size),
                                  minval=-stdv, maxval=stdv, dtype=jnp.float32)
        b = jax.random.uniform(k3, (4 * hidden_size,),
                               minval=-stdv, maxval=stdv, dtype=jnp.float32)
        params.append((w_ih, w_hh, b))
        in_sz = hidden_size
    return params


def _reference_forward(x_btf, params, hidden_size):
    """Pure-JAX reference of the PyTorch forward (for correctness check)."""
    B, T, _ = x_btf.shape
    L = len(params)
    H = hidden_size
    h = [jnp.zeros((B, H), jnp.float32) for _ in range(L)]
    c = [jnp.zeros((B, H), jnp.float32) for _ in range(L)]
    hs, cs = [], []
    for t in range(T):
        x = x_btf[:, t, :]
        for l in range(L):
            w_ih, w_hh, b = params[l]
            pre = x @ w_ih.T + b + h[l] @ w_hh.T
            i = jax.nn.sigmoid(pre[:, :H])
            f = jax.nn.sigmoid(pre[:, H:2 * H])
            g = jnp.tanh(pre[:, 2 * H:3 * H])
            o = jax.nn.sigmoid(pre[:, 3 * H:])
            c[l] = f * c[l] + i * g
            h[l] = o * jnp.tanh(c[l])
            x = h[l]
        hs.append(h[L - 1])
        cs.append(c[L - 1])
    return jnp.stack(hs, axis=1), jnp.stack(cs, axis=1)


if __name__ == "__main__":
    # Small shapes consistent with the module's forward: (batch, seq, input_size)
    B, T, I, H, L = 2, 8, 16, 32, 2

    key = jax.random.PRNGKey(0)
    key, kx = jax.random.split(key)
    x = jax.random.normal(kx, (B, T, I), dtype=jnp.float32)
    params = _init_params(key, I, H, L)

    h_ref, c_ref = _reference_forward(x, params, H)

    # f32 weight path: tight check against the pure-JAX reference.
    packed_f32 = pack_melstm_params(params, H, compute_dtype=jnp.float32)
    h_out, c_out = melstm_forward(x, packed_f32, H)
    h_out, c_out = jax.block_until_ready((h_out, c_out))
    assert h_out.shape == (B, T, H) and c_out.shape == (B, T, H)
    assert jnp.allclose(h_out, h_ref, atol=1e-4, rtol=1e-4)
    assert jnp.allclose(c_out, c_ref, atol=1e-4, rtol=1e-4)

    # bf16 weight/activation path (halves weight VMEM/DMA, better MXU rate on
    # every generation incl. v5e); accumulation and gate math stay f32.
    # Note: h is re-quantized to bf16 each step for the recurrent matmul, so
    # long sequences accumulate rounding; keep f32 weights if that matters.
    packed_bf16 = pack_melstm_params(params, H, compute_dtype=jnp.bfloat16)
    h16, c16 = melstm_forward(x, packed_bf16, H)
    h16, c16 = jax.block_until_ready((h16, c16))
    assert jnp.allclose(h16, h_ref, atol=5e-2, rtol=5e-2)
    assert jnp.allclose(c16, c_ref, atol=5e-2, rtol=5e-2)

    print("KERNEL_OK")
</pallas_src>

<mosaic_0001>
module attributes {stable_mosaic.version = 11 : i64} {
  func.func @kernel(%arg0: i32, %arg1: memref<64x16xf32, #tpu.memory_space<vmem>>, %arg2: memref<16x512xf32, #tpu.memory_space<vmem>>, %arg3: memref<128x512xf32, #tpu.memory_space<vmem>>, %arg4: memref<1x512xf32, #tpu.memory_space<vmem>>, %arg5: memref<128x512xf32, #tpu.memory_space<vmem>>, %arg6: memref<128x512xf32, #tpu.memory_space<vmem>>, %arg7: memref<1x512xf32, #tpu.memory_space<vmem>>, %arg8: memref<64x128xf32, #tpu.memory_space<vmem>>, %arg9: memref<64x128xf32, #tpu.memory_space<vmem>>, %arg10: memref<2x8x128xf32, #tpu.memory_space<vmem>>, %arg11: memref<2x8x128xf32, #tpu.memory_space<vmem>>, %arg12: memref<64x128xf32, #tpu.memory_space<vmem>>, %arg13: memref<64x512xf32, #tpu.memory_space<vmem>>) attributes {dimension_semantics = [#tpu.dimension_semantics<arbitrary>], iteration_bounds = array<i64: 1>, scalar_prefetch = 0 : i64, scratch_operands = 4 : i64, tpu.core_type = #tpu.core_type<tc>, window_params = [{transform_indices = @transform_0, window_bounds = array<i64: 64, 16>}, {pipeline_mode = #tpu.pipeline_mode<synchronous>, transform_indices = @transform_1, window_bounds = array<i64: 16, 512>}, {pipeline_mode = #tpu.pipeline_mode<synchronous>, transform_indices = @transform_2, window_bounds = array<i64: 128, 512>}, {pipeline_mode = #tpu.pipeline_mode<synchronous>, transform_indices = @transform_3, window_bounds = array<i64: 1, 512>}, {pipeline_mode = #tpu.pipeline_mode<synchronous>, transform_indices = @transform_4, window_bounds = array<i64: 128, 512>}, {pipeline_mode = #tpu.pipeline_mode<synchronous>, transform_indices = @transform_5, window_bounds = array<i64: 128, 512>}, {pipeline_mode = #tpu.pipeline_mode<synchronous>, transform_indices = @transform_6, window_bounds = array<i64: 1, 512>}, {transform_indices = @transform_7, window_bounds = array<i64: 64, 128>}, {transform_indices = @transform_8, window_bounds = array<i64: 64, 128>}]} {
    %c0_i32 = arith.constant 0 : i32
    %0 = arith.cmpi eq, %arg0, %c0_i32 : i32
    %1 = arith.extui %0 : i1 to i32
    %c0_i32_0 = arith.constant 0 : i32
    %2 = arith.cmpi ne, %1, %c0_i32_0 : i32
    scf.if %2 {
      %cst_174 = arith.constant 0.000000e+00 : f32
      %583 = vector.broadcast %cst_174 : f32 to vector<2x8x128xf32>
      %c0_175 = arith.constant 0 : index
      %c0_176 = arith.constant 0 : index
      %c0_177 = arith.constant 0 : index
      %584 = vector.load %arg10[%c0_175, %c0_176, %c0_177] : memref<2x8x128xf32, #tpu.memory_space<vmem>>, vector<2x8x128xf32>
      tpu.vector_store %arg10[%c0_175, %c0_176, %c0_177], %583 {strides = array<i32>} : memref<2x8x128xf32, #tpu.memory_space<vmem>>, vector<2x8x128xf32>,
      %cst_178 = arith.constant 0.000000e+00 : f32
      %585 = vector.broadcast %cst_178 : f32 to vector<2x8x128xf32>
      %c0_179 = arith.constant 0 : index
      %c0_180 = arith.constant 0 : index
      %c0_181 = arith.constant 0 : index
      %586 = vector.load %arg11[%c0_179, %c0_180, %c0_181] : memref<2x8x128xf32, #tpu.memory_space<vmem>>, vector<2x8x128xf32>
      tpu.vector_store %arg11[%c0_179, %c0_180, %c0_181], %585 {strides = array<i32>} : memref<2x8x128xf32, #tpu.memory_space<vmem>>, vector<2x8x128xf32>,
    } else {
    }
    %c0 = arith.constant 0 : index
    %c0_1 = arith.constant 0 : index
    %3 = vector.load %arg2[%c0, %c0_1] : memref<16x512xf32, #tpu.memory_space<vmem>>, vector<16x512xf32>
    %c0_2 = arith.constant 0 : index
    %c0_3 = arith.constant 0 : index
    %4 = vector.load %arg3[%c0_2, %c0_3] : memref<128x512xf32, #tpu.memory_space<vmem>>, vector<128x512xf32>
    %c0_4 = arith.constant 0 : index
    %c0_5 = arith.constant 0 : index
    %5 = vector.load %arg4[%c0_4, %c0_5] : memref<1x512xf32, #tpu.memory_space<vmem>>, vector<1x512xf32>
    %c0_6 = arith.constant 0 : index
    %c0_7 = arith.constant 0 : index
    %6 = vector.load %arg1[%c0_6, %c0_7] : memref<64x16xf32, #tpu.memory_space<vmem>>, vector<64x16xf32>
    %cst = arith.constant dense<0.000000e+00> : vector<64x512xf32>
    %7 = tpu.matmul %6, %3, %cst {dimension_numbers = #tpu.dot_dimension_numbers<[1], [0], [0], [1], [0, 0, 1, 1], [], []>} : vector<64x16xf32>, vector<16x512xf32>, vector<64x512xf32> -> vector<64x512xf32>
    %8 = vector.broadcast %5 : vector<1x512xf32> to vector<64x512xf32>
    %9 = arith.addf %7, %8 : vector<64x512xf32>
    %c0_8 = arith.constant 0 : index
    %c0_9 = arith.constant 0 : index
    %10 = vector.load %arg13[%c0_8, %c0_9] : memref<64x512xf32, #tpu.memory_space<vmem>>, vector<64x512xf32>
    tpu.vector_store %arg13[%c0_8, %c0_9], %9 {strides = array<i32>} : memref<64x512xf32, #tpu.memory_space<vmem>>, vector<64x512xf32>,
    %c0_10 = arith.constant 0 : index
    %c0_11 = arith.constant 0 : index
    %c0_12 = arith.constant 0 : index
    %11 = vector.load %arg10[%c0_10, %c0_11, %c0_12] : memref<2x8x128xf32, #tpu.memory_space<vmem>>, vector<1x8x128xf32>
    %12 = vector.shape_cast %11 : vector<1x8x128xf32> to vector<8x128xf32>
    %c0_13 = arith.constant 0 : index
    %c0_14 = arith.constant 0 : index
    %c0_15 = arith.constant 0 : index
    %13 = vector.load %arg11[%c0_13, %c0_14, %c0_15] : memref<2x8x128xf32, #tpu.memory_space<vmem>>, vector<1x8x128xf32>
    %14 = vector.shape_cast %13 : vector<1x8x128xf32> to vector<8x128xf32>
    %c0_i32_16 = arith.constant 0 : i32
    %c8_i32 = arith.constant 8 : i32
    %15 = arith.muli %c0_i32_16, %c8_i32 : i32
    %16 = tpu.assume_multiple %15, 8 : i32
    %17 = arith.index_cast %16 : i32 to index
    %c0_17 = arith.constant 0 : index
    %18 = vector.load %arg13[%17, %c0_17] : memref<64x512xf32, #tpu.memory_space<vmem>>, vector<8x512xf32>
    %cst_18 = arith.constant dense<0.000000e+00> : vector<8x512xf32>
    %19 = tpu.matmul %12, %4, %cst_18 {dimension_numbers = #tpu.dot_dimension_numbers<[1], [0], [0], [1], [0, 0, 1, 1], [], []>} : vector<8x128xf32>, vector<128x512xf32>, vector<8x512xf32> -> vector<8x512xf32>
    %20 = arith.addf %18, %19 : vector<8x512xf32>
    %21 = vector.extract_strided_slice %20 {offsets = [0, 0], sizes = [8, 128], strides = [1, 1]} : vector<8x512xf32> to vector<8x128xf32>
    %22 = arith.negf %21 : vector<8x128xf32>
    %23 = math.exp %22 : vector<8x128xf32>
    %cst_19 = arith.constant 1.000000e+00 : f32
    %24 = vector.broadcast %cst_19 : f32 to vector<8x128xf32>
    %25 = arith.addf %24, %23 : vector<8x128xf32>
    %26 = arith.divf %24, %25 : vector<8x128xf32>
    %27 = vector.extract_strided_slice %20 {offsets = [0, 128], sizes = [8, 128], strides = [1, 1]} : vector<8x512xf32> to vector<8x128xf32>
    %28 = arith.negf %27 : vector<8x128xf32>
    %29 = math.exp %28 : vector<8x128xf32>
    %cst_20 = arith.constant 1.000000e+00 : f32
    %30 = vector.broadcast %cst_20 : f32 to vector<8x128xf32>
    %31 = arith.addf %30, %29 : vector<8x128xf32>
    %32 = arith.divf %30, %31 : vector<8x128xf32>
    %33 = vector.extract_strided_slice %20 {offsets = [0, 256], sizes = [8, 128], strides = [1, 1]} : vector<8x512xf32> to vector<8x128xf32>
    %34 = math.tanh %33 : vector<8x128xf32>
    %35 = vector.extract_strided_slice %20 {offsets = [0, 384], sizes = [8, 128], strides = [1, 1]} : vector<8x512xf32> to vector<8x128xf32>
    %36 = arith.negf %35 : vector<8x128xf32>
    %37 = math.exp %36 : vector<8x128xf32>
    %cst_21 = arith.constant 1.000000e+00 : f32
    %38 = vector.broadcast %cst_21 : f32 to vector<8x128xf32>
    %39 = arith.addf %38, %37 : vector<8x128xf32>
    %40 = arith.divf %38, %39 : vector<8x128xf32>
    %41 = arith.mulf %32, %14 : vector<8x128xf32>
    %42 = arith.mulf %26, %34 : vector<8x128xf32>
    %43 = arith.addf %41, %42 : vector<8x128xf32>
    %44 = math.tanh %43 : vector<8x128xf32>
    %45 = arith.mulf %40, %44 : vector<8x128xf32>
    %46 = arith.index_cast %16 : i32 to index
    %c0_22 = arith.constant 0 : index
    %47 = vector.load %arg12[%46, %c0_22] : memref<64x128xf32, #tpu.memory_space<vmem>>, vector<8x128xf32>
    tpu.vector_store %arg12[%46, %c0_22], %45 {strides = array<i32>} : memref<64x128xf32, #tpu.memory_space<vmem>>, vector<8x128xf32>,
    %c1_i32 = arith.constant 1 : i32
    %c8_i32_23 = arith.constant 8 : i32
    %48 = arith.muli %c1_i32, %c8_i32_23 : i32
    %49 = tpu.assume_multiple %48, 8 : i32
    %50 = arith.index_cast %49 : i32 to index
    %c0_24 = arith.constant 0 : index
    %51 = vector.load %arg13[%50, %c0_24] : memref<64x512xf32, #tpu.memory_space<vmem>>, vector<8x512xf32>
    %cst_25 = arith.constant dense<0.000000e+00> : vector<8x512xf32>
    %52 = tpu.matmul %45, %4, %cst_25 {dimension_numbers = #tpu.dot_dimension_numbers<[1], [0], [0], [1], [0, 0, 1, 1], [], []>} : vector<8x128xf32>, vector<128x512xf32>, vector<8x512xf32> -> vector<8x512xf32>
    %53 = arith.addf %51, %52 : vector<8x512xf32>
    %54 = vector.extract_strided_slice %53 {offsets = [0, 0], sizes = [8, 128], strides = [1, 1]} : vector<8x512xf32> to vector<8x128xf32>
    %55 = arith.negf %54 : vector<8x128xf32>
    %56 = math.exp %55 : vector<8x128xf32>
    %cst_26 = arith.constant 1.000000e+00 : f32
    %57 = vector.broadcast %cst_26 : f32 to vector<8x128xf32>
    %58 = arith.addf %57, %56 : vector<8x128xf32>
    %59 = arith.divf %57, %58 : vector<8x128xf32>
    %60 = vector.extract_strided_slice %53 {offsets = [0, 128], sizes = [8, 128], strides = [1, 1]} : vector<8x512xf32> to vector<8x128xf32>
    %61 = arith.negf %60 : vector<8x128xf32>
    %62 = math.exp %61 : vector<8x128xf32>
    %cst_27 = arith.constant 1.000000e+00 : f32
    %63 = vector.broadcast %cst_27 : f32 to vector<8x128xf32>
    %64 = arith.addf %63, %62 : vector<8x128xf32>
    %65 = arith.divf %63, %64 : vector<8x128xf32>
    %66 = vector.extract_strided_slice %53 {offsets = [0, 256], sizes = [8, 128], strides = [1, 1]} : vector<8x512xf32> to vector<8x128xf32>
    %67 = math.tanh %66 : vector<8x128xf32>
    %68 = vector.extract_strided_slice %53 {offsets = [0, 384], sizes = [8, 128], strides = [1, 1]} : vector<8x512xf32> to vector<8x128xf32>
    %69 = arith.negf %68 : vector<8x128xf32>
    %70 = math.exp %69 : vector<8x128xf32>
    %cst_28 = arith.constant 1.000000e+00 : f32
    %71 = vector.broadcast %cst_28 : f32 to vector<8x128xf32>
    %72 = arith.addf %71, %70 : vector<8x128xf32>
    %73 = arith.divf %71, %72 : vector<8x128xf32>
    %74 = arith.mulf %65, %43 : vector<8x128xf32>
    %75 = arith.mulf %59, %67 : vector<8x128xf32>
    %76 = arith.addf %74, %75 : vector<8x128xf32>
    %77 = math.tanh %76 : vector<8x128xf32>
    %78 = arith.mulf %73, %77 : vector<8x128xf32>
    %79 = arith.index_cast %49 : i32 to index
    %c0_29 = arith.constant 0 : index
    %80 = vector.load %arg12[%79, %c0_29] : memref<64x128xf32, #tpu.memory_space<vmem>>, vector<8x128xf32>
    tpu.vector_store %arg12[%79, %c0_29], %78 {strides = array<i32>} : memref<64x128xf32, #tpu.memory_space<vmem>>, vector<8x128xf32>,
    %c2_i32 = arith.constant 2 : i32
    %c8_i32_30 = arith.constant 8 : i32
    %81 = arith.muli %c2_i32, %c8_i32_30 : i32
    %82 = tpu.assume_multiple %81, 8 : i32
    %83 = arith.index_cast %82 : i32 to index
    %c0_31 = arith.constant 0 : index
    %84 = vector.load %arg13[%83, %c0_31] : memref<64x512xf32, #tpu.memory_space<vmem>>, vector<8x512xf32>
    %cst_32 = arith.constant dense<0.000000e+00> : vector<8x512xf32>
    %85 = tpu.matmul %78, %4, %cst_32 {dimension_numbers = #tpu.dot_dimension_numbers<[1], [0], [0], [1], [0, 0, 1, 1], [], []>} : vector<8x128xf32>, vector<128x512xf32>, vector<8x512xf32> -> vector<8x512xf32>
    %86 = arith.addf %84, %85 : vector<8x512xf32>
    %87 = vector.extract_strided_slice %86 {offsets = [0, 0], sizes = [8, 128], strides = [1, 1]} : vector<8x512xf32> to vector<8x128xf32>
    %88 = arith.negf %87 : vector<8x128xf32>
    %89 = math.exp %88 : vector<8x128xf32>
    %cst_33 = arith.constant 1.000000e+00 : f32
    %90 = vector.broadcast %cst_33 : f32 to vector<8x128xf32>
    %91 = arith.addf %90, %89 : vector<8x128xf32>
    %92 = arith.divf %90, %91 : vector<8x128xf32>
    %93 = vector.extract_strided_slice %86 {offsets = [0, 128], sizes = [8, 128], strides = [1, 1]} : vector<8x512xf32> to vector<8x128xf32>
    %94 = arith.negf %93 : vector<8x128xf32>
    %95 = math.exp %94 : vector<8x128xf32>
    %cst_34 = arith.constant 1.000000e+00 : f32
    %96 = vector.broadcast %cst_34 : f32 to vector<8x128xf32>
    %97 = arith.addf %96, %95 : vector<8x128xf32>
    %98 = arith.divf %96, %97 : vector<8x128xf32>
    %99 = vector.extract_strided_slice %86 {offsets = [0, 256], sizes = [8, 128], strides = [1, 1]} : vector<8x512xf32> to vector<8x128xf32>
    %100 = math.tanh %99 : vector<8x128xf32>
    %101 = vector.extract_strided_slice %86 {offsets = [0, 384], sizes = [8, 128], strides = [1, 1]} : vector<8x512xf32> to vector<8x128xf32>
    %102 = arith.negf %101 : vector<8x128xf32>
    %103 = math.exp %102 : vector<8x128xf32>
    %cst_35 = arith.constant 1.000000e+00 : f32
    %104 = vector.broadcast %cst_35 : f32 to vector<8x128xf32>
    %105 = arith.addf %104, %103 : vector<8x128xf32>
    %106 = arith.divf %104, %105 : vector<8x128xf32>
    %107 = arith.mulf %98, %76 : vector<8x128xf32>
    %108 = arith.mulf %92, %100 : vector<8x128xf32>
    %109 = arith.addf %107, %108 : vector<8x128xf32>
    %110 = math.tanh %109 : vector<8x128xf32>
    %111 = arith.mulf %106, %110 : vector<8x128xf32>
    %112 = arith.index_cast %82 : i32 to index
    %c0_36 = arith.constant 0 : index
    %113 = vector.load %arg12[%112, %c0_36] : memref<64x128xf32, #tpu.memory_space<vmem>>, vector<8x128xf32>
    tpu.vector_store %arg12[%112, %c0_36], %111 {strides = array<i32>} : memref<64x128xf32, #tpu.memory_space<vmem>>, vector<8x128xf32>,
    %c3_i32 = arith.constant 3 : i32
    %c8_i32_37 = arith.constant 8 : i32
    %114 = arith.muli %c3_i32, %c8_i32_37 : i32
    %115 = tpu.assume_multiple %114, 8 : i32
    %116 = arith.index_cast %115 : i32 to index
    %c0_38 = arith.constant 0 : index
    %117 = vector.load %arg13[%116, %c0_38] : memref<64x512xf32, #tpu.memory_space<vmem>>, vector<8x512xf32>
    %cst_39 = arith.constant dense<0.000000e+00> : vector<8x512xf32>
    %118 = tpu.matmul %111, %4, %cst_39 {dimension_numbers = #tpu.dot_dimension_numbers<[1], [0], [0], [1], [0, 0, 1, 1], [], []>} : vector<8x128xf32>, vector<128x512xf32>, vector<8x512xf32> -> vector<8x512xf32>
    %119 = arith.addf %117, %118 : vector<8x512xf32>
    %120 = vector.extract_strided_slice %119 {offsets = [0, 0], sizes = [8, 128], strides = [1, 1]} : vector<8x512xf32> to vector<8x128xf32>
    %121 = arith.negf %120 : vector<8x128xf32>
    %122 = math.exp %121 : vector<8x128xf32>
    %cst_40 = arith.constant 1.000000e+00 : f32
    %123 = vector.broadcast %cst_40 : f32 to vector<8x128xf32>
    %124 = arith.addf %123, %122 : vector<8x128xf32>
    %125 = arith.divf %123, %124 : vector<8x128xf32>
    %126 = vector.extract_strided_slice %119 {offsets = [0, 128], sizes = [8, 128], strides = [1, 1]} : vector<8x512xf32> to vector<8x128xf32>
    %127 = arith.negf %126 : vector<8x128xf32>
    %128 = math.exp %127 : vector<8x128xf32>
    %cst_41 = arith.constant 1.000000e+00 : f32
    %129 = vector.broadcast %cst_41 : f32 to vector<8x128xf32>
    %130 = arith.addf %129, %128 : vector<8x128xf32>
    %131 = arith.divf %129, %130 : vector<8x128xf32>
    %132 = vector.extract_strided_slice %119 {offsets = [0, 256], sizes = [8, 128], strides = [1, 1]} : vector<8x512xf32> to vector<8x128xf32>
    %133 = math.tanh %132 : vector<8x128xf32>
    %134 = vector.extract_strided_slice %119 {offsets = [0, 384], sizes = [8, 128], strides = [1, 1]} : vector<8x512xf32> to vector<8x128xf32>
    %135 = arith.negf %134 : vector<8x128xf32>
    %136 = math.exp %135 : vector<8x128xf32>
    %cst_42 = arith.constant 1.000000e+00 : f32
    %137 = vector.broadcast %cst_42 : f32 to vector<8x128xf32>
    %138 = arith.addf %137, %136 : vector<8x128xf32>
    %139 = arith.divf %137, %138 : vector<8x128xf32>
    %140 = arith.mulf %131, %109 : vector<8x128xf32>
    %141 = arith.mulf %125, %133 : vector<8x128xf32>
    %142 = arith.addf %140, %141 : vector<8x128xf32>
    %143 = math.tanh %142 : vector<8x128xf32>
    %144 = arith.mulf %139, %143 : vector<8x128xf32>
    %145 = arith.index_cast %115 : i32 to index
    %c0_43 = arith.constant 0 : index
    %146 = vector.load %arg12[%145, %c0_43] : memref<64x128xf32, #tpu.memory_space<vmem>>, vector<8x128xf32>
    tpu.vector_store %arg12[%145, %c0_43], %144 {strides = array<i32>} : memref<64x128xf32, #tpu.memory_space<vmem>>, vector<8x128xf32>,
    %c4_i32 = arith.constant 4 : i32
    %c8_i32_44 = arith.constant 8 : i32
    %147 = arith.muli %c4_i32, %c8_i32_44 : i32
    %148 = tpu.assume_multiple %147, 8 : i32
    %149 = arith.index_cast %148 : i32 to index
    %c0_45 = arith.constant 0 : index
    %150 = vector.load %arg13[%149, %c0_45] : memref<64x512xf32, #tpu.memory_space<vmem>>, vector<8x512xf32>
    %cst_46 = arith.constant dense<0.000000e+00> : vector<8x512xf32>
    %151 = tpu.matmul %144, %4, %cst_46 {dimension_numbers = #tpu.dot_dimension_numbers<[1], [0], [0], [1], [0, 0, 1, 1], [], []>} : vector<8x128xf32>, vector<128x512xf32>, vector<8x512xf32> -> vector<8x512xf32>
    %152 = arith.addf %150, %151 : vector<8x512xf32>
    %153 = vector.extract_strided_slice %152 {offsets = [0, 0], sizes = [8, 128], strides = [1, 1]} : vector<8x512xf32> to vector<8x128xf32>
    %154 = arith.negf %153 : vector<8x128xf32>
    %155 = math.exp %154 : vector<8x128xf32>
    %cst_47 = arith.constant 1.000000e+00 : f32
    %156 = vector.broadcast %cst_47 : f32 to vector<8x128xf32>
    %157 = arith.addf %156, %155 : vector<8x128xf32>
    %158 = arith.divf %156, %157 : vector<8x128xf32>
    %159 = vector.extract_strided_slice %152 {offsets = [0, 128], sizes = [8, 128], strides = [1, 1]} : vector<8x512xf32> to vector<8x128xf32>
    %160 = arith.negf %159 : vector<8x128xf32>
    %161 = math.exp %160 : vector<8x128xf32>
    %cst_48 = arith.constant 1.000000e+00 : f32
    %162 = vector.broadcast %cst_48 : f32 to vector<8x128xf32>
    %163 = arith.addf %162, %161 : vector<8x128xf32>
    %164 = arith.divf %162, %163 : vector<8x128xf32>
    %165 = vector.extract_strided_slice %152 {offsets = [0, 256], sizes = [8, 128], strides = [1, 1]} : vector<8x512xf32> to vector<8x128xf32>
    %166 = math.tanh %165 : vector<8x128xf32>
    %167 = vector.extract_strided_slice %152 {offsets = [0, 384], sizes = [8, 128], strides = [1, 1]} : vector<8x512xf32> to vector<8x128xf32>
    %168 = arith.negf %167 : vector<8x128xf32>
    %169 = math.exp %168 : vector<8x128xf32>
    %cst_49 = arith.constant 1.000000e+00 : f32
    %170 = vector.broadcast %cst_49 : f32 to vector<8x128xf32>
    %171 = arith.addf %170, %169 : vector<8x128xf32>
    %172 = arith.divf %170, %171 : vector<8x128xf32>
    %173 = arith.mulf %164, %142 : vector<8x128xf32>
    %174 = arith.mulf %158, %166 : vector<8x128xf32>
    %175 = arith.addf %173, %174 : vector<8x128xf32>
    %176 = math.tanh %175 : vector<8x128xf32>
    %177 = arith.mulf %172, %176 : vector<8x128xf32>
    %178 = arith.index_cast %148 : i32 to index
    %c0_50 = arith.constant 0 : index
    %179 = vector.load %arg12[%178, %c0_50] : memref<64x128xf32, #tpu.memory_space<vmem>>, vector<8x128xf32>
    tpu.vector_store %arg12[%178, %c0_50], %177 {strides = array<i32>} : memref<64x128xf32, #tpu.memory_space<vmem>>, vector<8x128xf32>,
    %c5_i32 = arith.constant 5 : i32
    %c8_i32_51 = arith.constant 8 : i32
    %180 = arith.muli %c5_i32, %c8_i32_51 : i32
    %181 = tpu.assume_multiple %180, 8 : i32
    %182 = arith.index_cast %181 : i32 to index
    %c0_52 = arith.constant 0 : index
    %183 = vector.load %arg13[%182, %c0_52] : memref<64x512xf32, #tpu.memory_space<vmem>>, vector<8x512xf32>
    %cst_53 = arith.constant dense<0.000000e+00> : vector<8x512xf32>
    %184 = tpu.matmul %177, %4, %cst_53 {dimension_numbers = #tpu.dot_dimension_numbers<[1], [0], [0], [1], [0, 0, 1, 1], [], []>} : vector<8x128xf32>, vector<128x512xf32>, vector<8x512xf32> -> vector<8x512xf32>
    %185 = arith.addf %183, %184 : vector<8x512xf32>
    %186 = vector.extract_strided_slice %185 {offsets = [0, 0], sizes = [8, 128], strides = [1, 1]} : vector<8x512xf32> to vector<8x128xf32>
    %187 = arith.negf %186 : vector<8x128xf32>
    %188 = math.exp %187 : vector<8x128xf32>
    %cst_54 = arith.constant 1.000000e+00 : f32
    %189 = vector.broadcast %cst_54 : f32 to vector<8x128xf32>
    %190 = arith.addf %189, %188 : vector<8x128xf32>
    %191 = arith.divf %189, %190 : vector<8x128xf32>
    %192 = vector.extract_strided_slice %185 {offsets = [0, 128], sizes = [8, 128], strides = [1, 1]} : vector<8x512xf32> to vector<8x128xf32>
    %193 = arith.negf %192 : vector<8x128xf32>
    %194 = math.exp %193 : vector<8x128xf32>
    %cst_55 = arith.constant 1.000000e+00 : f32
    %195 = vector.broadcast %cst_55 : f32 to vector<8x128xf32>
    %196 = arith.addf %195, %194 : vector<8x128xf32>
    %197 = arith.divf %195, %196 : vector<8x128xf32>
    %198 = vector.extract_strided_slice %185 {offsets = [0, 256], sizes = [8, 128], strides = [1, 1]} : vector<8x512xf32> to vector<8x128xf32>
    %199 = math.tanh %198 : vector<8x128xf32>
    %200 = vector.extract_strided_slice %185 {offsets = [0, 384], sizes = [8, 128], strides = [1, 1]} : vector<8x512xf32> to vector<8x128xf32>
    %201 = arith.negf %200 : vector<8x128xf32>
    %202 = math.exp %201 : vector<8x128xf32>
    %cst_56 = arith.constant 1.000000e+00 : f32
    %203 = vector.broadcast %cst_56 : f32 to vector<8x128xf32>
    %204 = arith.addf %203, %202 : vector<8x128xf32>
    %205 = arith.divf %203, %204 : vector<8x128xf32>
    %206 = arith.mulf %197, %175 : vector<8x128xf32>
    %207 = arith.mulf %191, %199 : vector<8x128xf32>
    %208 = arith.addf %206, %207 : vector<8x128xf32>
    %209 = math.tanh %208 : vector<8x128xf32>
    %210 = arith.mulf %205, %209 : vector<8x128xf32>
    %211 = arith.index_cast %181 : i32 to index
    %c0_57 = arith.constant 0 : index
    %212 = vector.load %arg12[%211, %c0_57] : memref<64x128xf32, #tpu.memory_space<vmem>>, vector<8x128xf32>
    tpu.vector_store %arg12[%211, %c0_57], %210 {strides = array<i32>} : memref<64x128xf32, #tpu.memory_space<vmem>>, vector<8x128xf32>,
    %c6_i32 = arith.constant 6 : i32
    %c8_i32_58 = arith.constant 8 : i32
    %213 = arith.muli %c6_i32, %c8_i32_58 : i32
    %214 = tpu.assume_multiple %213, 8 : i32
    %215 = arith.index_cast %214 : i32 to index
    %c0_59 = arith.constant 0 : index
    %216 = vector.load %arg13[%215, %c0_59] : memref<64x512xf32, #tpu.memory_space<vmem>>, vector<8x512xf32>
    %cst_60 = arith.constant dense<0.000000e+00> : vector<8x512xf32>
    %217 = tpu.matmul %210, %4, %cst_60 {dimension_numbers = #tpu.dot_dimension_numbers<[1], [0], [0], [1], [0, 0, 1, 1], [], []>} : vector<8x128xf32>, vector<128x512xf32>, vector<8x512xf32> -> vector<8x512xf32>
    %218 = arith.addf %216, %217 : vector<8x512xf32>
    %219 = vector.extract_strided_slice %218 {offsets = [0, 0], sizes = [8, 128], strides = [1, 1]} : vector<8x512xf32> to vector<8x128xf32>
    %220 = arith.negf %219 : vector<8x128xf32>
    %221 = math.exp %220 : vector<8x128xf32>
    %cst_61 = arith.constant 1.000000e+00 : f32
    %222 = vector.broadcast %cst_61 : f32 to vector<8x128xf32>
    %223 = arith.addf %222, %221 : vector<8x128xf32>
    %224 = arith.divf %222, %223 : vector<8x128xf32>
    %225 = vector.extract_strided_slice %218 {offsets = [0, 128], sizes = [8, 128], strides = [1, 1]} : vector<8x512xf32> to vector<8x128xf32>
    %226 = arith.negf %225 : vector<8x128xf32>
    %227 = math.exp %226 : vector<8x128xf32>
    %cst_62 = arith.constant 1.000000e+00 : f32
    %228 = vector.broadcast %cst_62 : f32 to vector<8x128xf32>
    %229 = arith.addf %228, %227 : vector<8x128xf32>
    %230 = arith.divf %228, %229 : vector<8x128xf32>
    %231 = vector.extract_strided_slice %218 {offsets = [0, 256], sizes = [8, 128], strides = [1, 1]} : vector<8x512xf32> to vector<8x128xf32>
    %232 = math.tanh %231 : vector<8x128xf32>
    %233 = vector.extract_strided_slice %218 {offsets = [0, 384], sizes = [8, 128], strides = [1, 1]} : vector<8x512xf32> to vector<8x128xf32>
    %234 = arith.negf %233 : vector<8x128xf32>
    %235 = math.exp %234 : vector<8x128xf32>
    %cst_63 = arith.constant 1.000000e+00 : f32
    %236 = vector.broadcast %cst_63 : f32 to vector<8x128xf32>
    %237 = arith.addf %236, %235 : vector<8x128xf32>
    %238 = arith.divf %236, %237 : vector<8x128xf32>
    %239 = arith.mulf %230, %208 : vector<8x128xf32>
    %240 = arith.mulf %224, %232 : vector<8x128xf32>
    %241 = arith.addf %239, %240 : vector<8x128xf32>
    %242 = math.tanh %241 : vector<8x128xf32>
    %243 = arith.mulf %238, %242 : vector<8x128xf32>
    %244 = arith.index_cast %214 : i32 to index
    %c0_64 = arith.constant 0 : index
    %245 = vector.load %arg12[%244, %c0_64] : memref<64x128xf32, #tpu.memory_space<vmem>>, vector<8x128xf32>
    tpu.vector_store %arg12[%244, %c0_64], %243 {strides = array<i32>} : memref<64x128xf32, #tpu.memory_space<vmem>>, vector<8x128xf32>,
    %c7_i32 = arith.constant 7 : i32
    %c8_i32_65 = arith.constant 8 : i32
    %246 = arith.muli %c7_i32, %c8_i32_65 : i32
    %247 = tpu.assume_multiple %246, 8 : i32
    %248 = arith.index_cast %247 : i32 to index
    %c0_66 = arith.constant 0 : index
    %249 = vector.load %arg13[%248, %c0_66] : memref<64x512xf32, #tpu.memory_space<vmem>>, vector<8x512xf32>
    %cst_67 = arith.constant dense<0.000000e+00> : vector<8x512xf32>
    %250 = tpu.matmul %243, %4, %cst_67 {dimension_numbers = #tpu.dot_dimension_numbers<[1], [0], [0], [1], [0, 0, 1, 1], [], []>} : vector<8x128xf32>, vector<128x512xf32>, vector<8x512xf32> -> vector<8x512xf32>
    %251 = arith.addf %249, %250 : vector<8x512xf32>
    %252 = vector.extract_strided_slice %251 {offsets = [0, 0], sizes = [8, 128], strides = [1, 1]} : vector<8x512xf32> to vector<8x128xf32>
    %253 = arith.negf %252 : vector<8x128xf32>
    %254 = math.exp %253 : vector<8x128xf32>
    %cst_68 = arith.constant 1.000000e+00 : f32
    %255 = vector.broadcast %cst_68 : f32 to vector<8x128xf32>
    %256 = arith.addf %255, %254 : vector<8x128xf32>
    %257 = arith.divf %255, %256 : vector<8x128xf32>
    %258 = vector.extract_strided_slice %251 {offsets = [0, 128], sizes = [8, 128], strides = [1, 1]} : vector<8x512xf32> to vector<8x128xf32>
    %259 = arith.negf %258 : vector<8x128xf32>
    %260 = math.exp %259 : vector<8x128xf32>
    %cst_69 = arith.constant 1.000000e+00 : f32
    %261 = vector.broadcast %cst_69 : f32 to vector<8x128xf32>
    %262 = arith.addf %261, %260 : vector<8x128xf32>
    %263 = arith.divf %261, %262 : vector<8x128xf32>
    %264 = vector.extract_strided_slice %251 {offsets = [0, 256], sizes = [8, 128], strides = [1, 1]} : vector<8x512xf32> to vector<8x128xf32>
    %265 = math.tanh %264 : vector<8x128xf32>
    %266 = vector.extract_strided_slice %251 {offsets = [0, 384], sizes = [8, 128], strides = [1, 1]} : vector<8x512xf32> to vector<8x128xf32>
    %267 = arith.negf %266 : vector<8x128xf32>
    %268 = math.exp %267 : vector<8x128xf32>
    %cst_70 = arith.constant 1.000000e+00 : f32
    %269 = vector.broadcast %cst_70 : f32 to vector<8x128xf32>
    %270 = arith.addf %269, %268 : vector<8x128xf32>
    %271 = arith.divf %269, %270 : vector<8x128xf32>
    %272 = arith.mulf %263, %241 : vector<8x128xf32>
    %273 = arith.mulf %257, %265 : vector<8x128xf32>
    %274 = arith.addf %272, %273 : vector<8x128xf32>
    %275 = math.tanh %274 : vector<8x128xf32>
    %276 = arith.mulf %271, %275 : vector<8x128xf32>
    %277 = arith.index_cast %247 : i32 to index
    %c0_71 = arith.constant 0 : index
    %278 = vector.load %arg12[%277, %c0_71] : memref<64x128xf32, #tpu.memory_space<vmem>>, vector<8x128xf32>
    tpu.vector_store %arg12[%277, %c0_71], %276 {strides = array<i32>} : memref<64x128xf32, #tpu.memory_space<vmem>>, vector<8x128xf32>,
    %c8_i32_72 = arith.constant 8 : i32
    %c0_73 = arith.constant 0 : index
    %c0_74 = arith.constant 0 : index
    %c0_75 = arith.constant 0 : index
    %279 = vector.load %arg10[%c0_73, %c0_74, %c0_75] : memref<2x8x128xf32, #tpu.memory_space<vmem>>, vector<1x8x128xf32>
    %280 = vector.shape_cast %279 : vector<1x8x128xf32> to vector<8x128xf32>
    %281 = vector.shape_cast %276 : vector<8x128xf32> to vector<1x8x128xf32>
    tpu.vector_store %arg10[%c0_73, %c0_74, %c0_75], %281 {strides = array<i32>} : memref<2x8x128xf32, #tpu.memory_space<vmem>>, vector<1x8x128xf32>,
    %c0_76 = arith.constant 0 : index
    %c0_77 = arith.constant 0 : index
    %c0_78 = arith.constant 0 : index
    %282 = vector.load %arg11[%c0_76, %c0_77, %c0_78] : memref<2x8x128xf32, #tpu.memory_space<vmem>>, vector<1x8x128xf32>
    %283 = vector.shape_cast %282 : vector<1x8x128xf32> to vector<8x128xf32>
    %284 = vector.shape_cast %274 : vector<8x128xf32> to vector<1x8x128xf32>
    tpu.vector_store %arg11[%c0_76, %c0_77, %c0_78], %284 {strides = array<i32>} : memref<2x8x128xf32, #tpu.memory_space<vmem>>, vector<1x8x128xf32>,
    %c0_79 = arith.constant 0 : index
    %c0_80 = arith.constant 0 : index
    %285 = vector.load %arg5[%c0_79, %c0_80] : memref<128x512xf32, #tpu.memory_space<vmem>>, vector<128x512xf32>
    %c0_81 = arith.constant 0 : index
    %c0_82 = arith.constant 0 : index
    %286 = vector.load %arg6[%c0_81, %c0_82] : memref<128x512xf32, #tpu.memory_space<vmem>>, vector<128x512xf32>
    %c0_83 = arith.constant 0 : index
    %c0_84 = arith.constant 0 : index
    %287 = vector.load %arg7[%c0_83, %c0_84] : memref<1x512xf32, #tpu.memory_space<vmem>>, vector<1x512xf32>
    %c0_85 = arith.constant 0 : index
    %c0_86 = arith.constant 0 : index
    %288 = vector.load %arg12[%c0_85, %c0_86] : memref<64x128xf32, #tpu.memory_space<vmem>>, vector<64x128xf32>
    %cst_87 = arith.constant dense<0.000000e+00> : vector<64x512xf32>
    %289 = tpu.matmul %288, %285, %cst_87 {dimension_numbers = #tpu.dot_dimension_numbers<[1], [0], [0], [1], [0, 0, 1, 1], [], []>} : vector<64x128xf32>, vector<128x512xf32>, vector<64x512xf32> -> vector<64x512xf32>
    %290 = vector.broadcast %287 : vector<1x512xf32> to vector<64x512xf32>
    %291 = arith.addf %289, %290 : vector<64x512xf32>
    %c0_88 = arith.constant 0 : index
    %c0_89 = arith.constant 0 : index
    %292 = vector.load %arg13[%c0_88, %c0_89] : memref<64x512xf32, #tpu.memory_space<vmem>>, vector<64x512xf32>
    tpu.vector_store %arg13[%c0_88, %c0_89], %291 {strides = array<i32>} : memref<64x512xf32, #tpu.memory_space<vmem>>, vector<64x512xf32>,
    %c1 = arith.constant 1 : index
    %c0_90 = arith.constant 0 : index
    %c0_91 = arith.constant 0 : index
    %293 = vector.load %arg10[%c1, %c0_90, %c0_91] : memref<2x8x128xf32, #tpu.memory_space<vmem>>, vector<1x8x128xf32>
    %294 = vector.shape_cast %293 : vector<1x8x128xf32> to vector<8x128xf32>
    %c1_92 = arith.constant 1 : index
    %c0_93 = arith.constant 0 : index
    %c0_94 = arith.constant 0 : index
    %295 = vector.load %arg11[%c1_92, %c0_93, %c0_94] : memref<2x8x128xf32, #tpu.memory_space<vmem>>, vector<1x8x128xf32>
    %296 = vector.shape_cast %295 : vector<1x8x128xf32> to vector<8x128xf32>
    %c0_i32_95 = arith.constant 0 : i32
    %c8_i32_96 = arith.constant 8 : i32
    %297 = arith.muli %c0_i32_95, %c8_i32_96 : i32
    %298 = tpu.assume_multiple %297, 8 : i32
    %299 = arith.index_cast %298 : i32 to index
    %c0_97 = arith.constant 0 : index
    %300 = vector.load %arg13[%299, %c0_97] : memref<64x512xf32, #tpu.memory_space<vmem>>, vector<8x512xf32>
    %cst_98 = arith.constant dense<0.000000e+00> : vector<8x512xf32>
    %301 = tpu.matmul %294, %286, %cst_98 {dimension_numbers = #tpu.dot_dimension_numbers<[1], [0], [0], [1], [0, 0, 1, 1], [], []>} : vector<8x128xf32>, vector<128x512xf32>, vector<8x512xf32> -> vector<8x512xf32>
    %302 = arith.addf %300, %301 : vector<8x512xf32>
    %303 = vector.extract_strided_slice %302 {offsets = [0, 0], sizes = [8, 128], strides = [1, 1]} : vector<8x512xf32> to vector<8x128xf32>
    %304 = arith.negf %303 : vector<8x128xf32>
    %305 = math.exp %304 : vector<8x128xf32>
    %cst_99 = arith.constant 1.000000e+00 : f32
    %306 = vector.broadcast %cst_99 : f32 to vector<8x128xf32>
    %307 = arith.addf %306, %305 : vector<8x128xf32>
    %308 = arith.divf %306, %307 : vector<8x128xf32>
    %309 = vector.extract_strided_slice %302 {offsets = [0, 128], sizes = [8, 128], strides = [1, 1]} : vector<8x512xf32> to vector<8x128xf32>
    %310 = arith.negf %309 : vector<8x128xf32>
    %311 = math.exp %310 : vector<8x128xf32>
    %cst_100 = arith.constant 1.000000e+00 : f32
    %312 = vector.broadcast %cst_100 : f32 to vector<8x128xf32>
    %313 = arith.addf %312, %311 : vector<8x128xf32>
    %314 = arith.divf %312, %313 : vector<8x128xf32>
    %315 = vector.extract_strided_slice %302 {offsets = [0, 256], sizes = [8, 128], strides = [1, 1]} : vector<8x512xf32> to vector<8x128xf32>
    %316 = math.tanh %315 : vector<8x128xf32>
    %317 = vector.extract_strided_slice %302 {offsets = [0, 384], sizes = [8, 128], strides = [1, 1]} : vector<8x512xf32> to vector<8x128xf32>
    %318 = arith.negf %317 : vector<8x128xf32>
    %319 = math.exp %318 : vector<8x128xf32>
    %cst_101 = arith.constant 1.000000e+00 : f32
    %320 = vector.broadcast %cst_101 : f32 to vector<8x128xf32>
    %321 = arith.addf %320, %319 : vector<8x128xf32>
    %322 = arith.divf %320, %321 : vector<8x128xf32>
    %323 = arith.mulf %314, %296 : vector<8x128xf32>
    %324 = arith.mulf %308, %316 : vector<8x128xf32>
    %325 = arith.addf %323, %324 : vector<8x128xf32>
    %326 = math.tanh %325 : vector<8x128xf32>
    %327 = arith.mulf %322, %326 : vector<8x128xf32>
    %328 = arith.index_cast %298 : i32 to index
    %c0_102 = arith.constant 0 : index
    %329 = vector.load %arg8[%328, %c0_102] : memref<64x128xf32, #tpu.memory_space<vmem>>, vector<8x128xf32>
    tpu.vector_store %arg8[%328, %c0_102], %327 {strides = array<i32>} : memref<64x128xf32, #tpu.memory_space<vmem>>, vector<8x128xf32>,
    %330 = arith.index_cast %298 : i32 to index
    %c0_103 = arith.constant 0 : index
    %331 = vector.load %arg9[%330, %c0_103] : memref<64x128xf32, #tpu.memory_space<vmem>>, vector<8x128xf32>
    tpu.vector_store %arg9[%330, %c0_103], %325 {strides = array<i32>} : memref<64x128xf32, #tpu.memory_space<vmem>>, vector<8x128xf32>,
    %c1_i32_104 = arith.constant 1 : i32
    %c8_i32_105 = arith.constant 8 : i32
    %332 = arith.muli %c1_i32_104, %c8_i32_105 : i32
    %333 = tpu.assume_multiple %332, 8 : i32
    %334 = arith.index_cast %333 : i32 to index
    %c0_106 = arith.constant 0 : index
    %335 = vector.load %arg13[%334, %c0_106] : memref<64x512xf32, #tpu.memory_space<vmem>>, vector<8x512xf32>
    %cst_107 = arith.constant dense<0.000000e+00> : vector<8x512xf32>
    %336 = tpu.matmul %327, %286, %cst_107 {dimension_numbers = #tpu.dot_dimension_numbers<[1], [0], [0], [1], [0, 0, 1, 1], [], []>} : vector<8x128xf32>, vector<128x512xf32>, vector<8x512xf32> -> vector<8x512xf32>
    %337 = arith.addf %335, %336 : vector<8x512xf32>
    %338 = vector.extract_strided_slice %337 {offsets = [0, 0], sizes = [8, 128], strides = [1, 1]} : vector<8x512xf32> to vector<8x128xf32>
    %339 = arith.negf %338 : vector<8x128xf32>
    %340 = math.exp %339 : vector<8x128xf32>
    %cst_108 = arith.constant 1.000000e+00 : f32
    %341 = vector.broadcast %cst_108 : f32 to vector<8x128xf32>
    %342 = arith.addf %341, %340 : vector<8x128xf32>
    %343 = arith.divf %341, %342 : vector<8x128xf32>
    %344 = vector.extract_strided_slice %337 {offsets = [0, 128], sizes = [8, 128], strides = [1, 1]} : vector<8x512xf32> to vector<8x128xf32>
    %345 = arith.negf %344 : vector<8x128xf32>
    %346 = math.exp %345 : vector<8x128xf32>
    %cst_109 = arith.constant 1.000000e+00 : f32
    %347 = vector.broadcast %cst_109 : f32 to vector<8x128xf32>
    %348 = arith.addf %347, %346 : vector<8x128xf32>
    %349 = arith.divf %347, %348 : vector<8x128xf32>
    %350 = vector.extract_strided_slice %337 {offsets = [0, 256], sizes = [8, 128], strides = [1, 1]} : vector<8x512xf32> to vector<8x128xf32>
    %351 = math.tanh %350 : vector<8x128xf32>
    %352 = vector.extract_strided_slice %337 {offsets = [0, 384], sizes = [8, 128], strides = [1, 1]} : vector<8x512xf32> to vector<8x128xf32>
    %353 = arith.negf %352 : vector<8x128xf32>
    %354 = math.exp %353 : vector<8x128xf32>
    %cst_110 = arith.constant 1.000000e+00 : f32
    %355 = vector.broadcast %cst_110 : f32 to vector<8x128xf32>
    %356 = arith.addf %355, %354 : vector<8x128xf32>
    %357 = arith.divf %355, %356 : vector<8x128xf32>
    %358 = arith.mulf %349, %325 : vector<8x128xf32>
    %359 = arith.mulf %343, %351 : vector<8x128xf32>
    %360 = arith.addf %358, %359 : vector<8x128xf32>
    %361 = math.tanh %360 : vector<8x128xf32>
    %362 = arith.mulf %357, %361 : vector<8x128xf32>
    %363 = arith.index_cast %333 : i32 to index
    %c0_111 = arith.constant 0 : index
    %364 = vector.load %arg8[%363, %c0_111] : memref<64x128xf32, #tpu.memory_space<vmem>>, vector<8x128xf32>
    tpu.vector_store %arg8[%363, %c0_111], %362 {strides = array<i32>} : memref<64x128xf32, #tpu.memory_space<vmem>>, vector<8x128xf32>,
    %365 = arith.index_cast %333 : i32 to index
    %c0_112 = arith.constant 0 : index
    %366 = vector.load %arg9[%365, %c0_112] : memref<64x128xf32, #tpu.memory_space<vmem>>, vector<8x128xf32>
    tpu.vector_store %arg9[%365, %c0_112], %360 {strides = array<i32>} : memref<64x128xf32, #tpu.memory_space<vmem>>, vector<8x128xf32>,
    %c2_i32_113 = arith.constant 2 : i32
    %c8_i32_114 = arith.constant 8 : i32
    %367 = arith.muli %c2_i32_113, %c8_i32_114 : i32
    %368 = tpu.assume_multiple %367, 8 : i32
    %369 = arith.index_cast %368 : i32 to index
    %c0_115 = arith.constant 0 : index
    %370 = vector.load %arg13[%369, %c0_115] : memref<64x512xf32, #tpu.memory_space<vmem>>, vector<8x512xf32>
    %cst_116 = arith.constant dense<0.000000e+00> : vector<8x512xf32>
    %371 = tpu.matmul %362, %286, %cst_116 {dimension_numbers = #tpu.dot_dimension_numbers<[1], [0], [0], [1], [0, 0, 1, 1], [], []>} : vector<8x128xf32>, vector<128x512xf32>, vector<8x512xf32> -> vector<8x512xf32>
    %372 = arith.addf %370, %371 : vector<8x512xf32>
    %373 = vector.extract_strided_slice %372 {offsets = [0, 0], sizes = [8, 128], strides = [1, 1]} : vector<8x512xf32> to vector<8x128xf32>
    %374 = arith.negf %373 : vector<8x128xf32>
    %375 = math.exp %374 : vector<8x128xf32>
    %cst_117 = arith.constant 1.000000e+00 : f32
    %376 = vector.broadcast %cst_117 : f32 to vector<8x128xf32>
    %377 = arith.addf %376, %375 : vector<8x128xf32>
    %378 = arith.divf %376, %377 : vector<8x128xf32>
    %379 = vector.extract_strided_slice %372 {offsets = [0, 128], sizes = [8, 128], strides = [1, 1]} : vector<8x512xf32> to vector<8x128xf32>
    %380 = arith.negf %379 : vector<8x128xf32>
    %381 = math.exp %380 : vector<8x128xf32>
    %cst_118 = arith.constant 1.000000e+00 : f32
    %382 = vector.broadcast %cst_118 : f32 to vector<8x128xf32>
    %383 = arith.addf %382, %381 : vector<8x128xf32>
    %384 = arith.divf %382, %383 : vector<8x128xf32>
    %385 = vector.extract_strided_slice %372 {offsets = [0, 256], sizes = [8, 128], strides = [1, 1]} : vector<8x512xf32> to vector<8x128xf32>
    %386 = math.tanh %385 : vector<8x128xf32>
    %387 = vector.extract_strided_slice %372 {offsets = [0, 384], sizes = [8, 128], strides = [1, 1]} : vector<8x512xf32> to vector<8x128xf32>
    %388 = arith.negf %387 : vector<8x128xf32>
    %389 = math.exp %388 : vector<8x128xf32>
    %cst_119 = arith.constant 1.000000e+00 : f32
    %390 = vector.broadcast %cst_119 : f32 to vector<8x128xf32>
    %391 = arith.addf %390, %389 : vector<8x128xf32>
    %392 = arith.divf %390, %391 : vector<8x128xf32>
    %393 = arith.mulf %384, %360 : vector<8x128xf32>
    %394 = arith.mulf %378, %386 : vector<8x128xf32>
    %395 = arith.addf %393, %394 : vector<8x128xf32>
    %396 = math.tanh %395 : vector<8x128xf32>
    %397 = arith.mulf %392, %396 : vector<8x128xf32>
    %398 = arith.index_cast %368 : i32 to index
    %c0_120 = arith.constant 0 : index
    %399 = vector.load %arg8[%398, %c0_120] : memref<64x128xf32, #tpu.memory_space<vmem>>, vector<8x128xf32>
    tpu.vector_store %arg8[%398, %c0_120], %397 {strides = array<i32>} : memref<64x128xf32, #tpu.memory_space<vmem>>, vector<8x128xf32>,
    %400 = arith.index_cast %368 : i32 to index
    %c0_121 = arith.constant 0 : index
    %401 = vector.load %arg9[%400, %c0_121] : memref<64x128xf32, #tpu.memory_space<vmem>>, vector<8x128xf32>
    tpu.vector_store %arg9[%400, %c0_121], %395 {strides = array<i32>} : memref<64x128xf32, #tpu.memory_space<vmem>>, vector<8x128xf32>,
    %c3_i32_122 = arith.constant 3 : i32
    %c8_i32_123 = arith.constant 8 : i32
    %402 = arith.muli %c3_i32_122, %c8_i32_123 : i32
    %403 = tpu.assume_multiple %402, 8 : i32
    %404 = arith.index_cast %403 : i32 to index
    %c0_124 = arith.constant 0 : index
    %405 = vector.load %arg13[%404, %c0_124] : memref<64x512xf32, #tpu.memory_space<vmem>>, vector<8x512xf32>
    %cst_125 = arith.constant dense<0.000000e+00> : vector<8x512xf32>
    %406 = tpu.matmul %397, %286, %cst_125 {dimension_numbers = #tpu.dot_dimension_numbers<[1], [0], [0], [1], [0, 0, 1, 1], [], []>} : vector<8x128xf32>, vector<128x512xf32>, vector<8x512xf32> -> vector<8x512xf32>
    %407 = arith.addf %405, %406 : vector<8x512xf32>
    %408 = vector.extract_strided_slice %407 {offsets = [0, 0], sizes = [8, 128], strides = [1, 1]} : vector<8x512xf32> to vector<8x128xf32>
    %409 = arith.negf %408 : vector<8x128xf32>
    %410 = math.exp %409 : vector<8x128xf32>
    %cst_126 = arith.constant 1.000000e+00 : f32
    %411 = vector.broadcast %cst_126 : f32 to vector<8x128xf32>
    %412 = arith.addf %411, %410 : vector<8x128xf32>
    %413 = arith.divf %411, %412 : vector<8x128xf32>
    %414 = vector.extract_strided_slice %407 {offsets = [0, 128], sizes = [8, 128], strides = [1, 1]} : vector<8x512xf32> to vector<8x128xf32>
    %415 = arith.negf %414 : vector<8x128xf32>
    %416 = math.exp %415 : vector<8x128xf32>
    %cst_127 = arith.constant 1.000000e+00 : f32
    %417 = vector.broadcast %cst_127 : f32 to vector<8x128xf32>
    %418 = arith.addf %417, %416 : vector<8x128xf32>
    %419 = arith.divf %417, %418 : vector<8x128xf32>
    %420 = vector.extract_strided_slice %407 {offsets = [0, 256], sizes = [8, 128], strides = [1, 1]} : vector<8x512xf32> to vector<8x128xf32>
    %421 = math.tanh %420 : vector<8x128xf32>
    %422 = vector.extract_strided_slice %407 {offsets = [0, 384], sizes = [8, 128], strides = [1, 1]} : vector<8x512xf32> to vector<8x128xf32>
    %423 = arith.negf %422 : vector<8x128xf32>
    %424 = math.exp %423 : vector<8x128xf32>
    %cst_128 = arith.constant 1.000000e+00 : f32
    %425 = vector.broadcast %cst_128 : f32 to vector<8x128xf32>
    %426 = arith.addf %425, %424 : vector<8x128xf32>
    %427 = arith.divf %425, %426 : vector<8x128xf32>
    %428 = arith.mulf %419, %395 : vector<8x128xf32>
    %429 = arith.mulf %413, %421 : vector<8x128xf32>
    %430 = arith.addf %428, %429 : vector<8x128xf32>
    %431 = math.tanh %430 : vector<8x128xf32>
    %432 = arith.mulf %427, %431 : vector<8x128xf32>
    %433 = arith.index_cast %403 : i32 to index
    %c0_129 = arith.constant 0 : index
    %434 = vector.load %arg8[%433, %c0_129] : memref<64x128xf32, #tpu.memory_space<vmem>>, vector<8x128xf32>
    tpu.vector_store %arg8[%433, %c0_129], %432 {strides = array<i32>} : memref<64x128xf32, #tpu.memory_space<vmem>>, vector<8x128xf32>,
    %435 = arith.index_cast %403 : i32 to index
    %c0_130 = arith.constant 0 : index
    %436 = vector.load %arg9[%435, %c0_130] : memref<64x128xf32, #tpu.memory_space<vmem>>, vector<8x128xf32>
    tpu.vector_store %arg9[%435, %c0_130], %430 {strides = array<i32>} : memref<64x128xf32, #tpu.memory_space<vmem>>, vector<8x128xf32>,
    %c4_i32_131 = arith.constant 4 : i32
    %c8_i32_132 = arith.constant 8 : i32
    %437 = arith.muli %c4_i32_131, %c8_i32_132 : i32
    %438 = tpu.assume_multiple %437, 8 : i32
    %439 = arith.index_cast %438 : i32 to index
    %c0_133 = arith.constant 0 : index
    %440 = vector.load %arg13[%439, %c0_133] : memref<64x512xf32, #tpu.memory_space<vmem>>, vector<8x512xf32>
    %cst_134 = arith.constant dense<0.000000e+00> : vector<8x512xf32>
    %441 = tpu.matmul %432, %286, %cst_134 {dimension_numbers = #tpu.dot_dimension_numbers<[1], [0], [0], [1], [0, 0, 1, 1], [], []>} : vector<8x128xf32>, vector<128x512xf32>, vector<8x512xf32> -> vector<8x512xf32>
    %442 = arith.addf %440, %441 : vector<8x512xf32>
    %443 = vector.extract_strided_slice %442 {offsets = [0, 0], sizes = [8, 128], strides = [1, 1]} : vector<8x512xf32> to vector<8x128xf32>
    %444 = arith.negf %443 : vector<8x128xf32>
    %445 = math.exp %444 : vector<8x128xf32>
    %cst_135 = arith.constant 1.000000e+00 : f32
    %446 = vector.broadcast %cst_135 : f32 to vector<8x128xf32>
    %447 = arith.addf %446, %445 : vector<8x128xf32>
    %448 = arith.divf %446, %447 : vector<8x128xf32>
    %449 = vector.extract_strided_slice %442 {offsets = [0, 128], sizes = [8, 128], strides = [1, 1]} : vector<8x512xf32> to vector<8x128xf32>
    %450 = arith.negf %449 : vector<8x128xf32>
    %451 = math.exp %450 : vector<8x128xf32>
    %cst_136 = arith.constant 1.000000e+00 : f32
    %452 = vector.broadcast %cst_136 : f32 to vector<8x128xf32>
    %453 = arith.addf %452, %451 : vector<8x128xf32>
    %454 = arith.divf %452, %453 : vector<8x128xf32>
    %455 = vector.extract_strided_slice %442 {offsets = [0, 256], sizes = [8, 128], strides = [1, 1]} : vector<8x512xf32> to vector<8x128xf32>
    %456 = math.tanh %455 : vector<8x128xf32>
    %457 = vector.extract_strided_slice %442 {offsets = [0, 384], sizes = [8, 128], strides = [1, 1]} : vector<8x512xf32> to vector<8x128xf32>
    %458 = arith.negf %457 : vector<8x128xf32>
    %459 = math.exp %458 : vector<8x128xf32>
    %cst_137 = arith.constant 1.000000e+00 : f32
    %460 = vector.broadcast %cst_137 : f32 to vector<8x128xf32>
    %461 = arith.addf %460, %459 : vector<8x128xf32>
    %462 = arith.divf %460, %461 : vector<8x128xf32>
    %463 = arith.mulf %454, %430 : vector<8x128xf32>
    %464 = arith.mulf %448, %456 : vector<8x128xf32>
    %465 = arith.addf %463, %464 : vector<8x128xf32>
    %466 = math.tanh %465 : vector<8x128xf32>
    %467 = arith.mulf %462, %466 : vector<8x128xf32>
    %468 = arith.index_cast %438 : i32 to index
    %c0_138 = arith.constant 0 : index
    %469 = vector.load %arg8[%468, %c0_138] : memref<64x128xf32, #tpu.memory_space<vmem>>, vector<8x128xf32>
    tpu.vector_store %arg8[%468, %c0_138], %467 {strides = array<i32>} : memref<64x128xf32, #tpu.memory_space<vmem>>, vector<8x128xf32>,
    %470 = arith.index_cast %438 : i32 to index
    %c0_139 = arith.constant 0 : index
    %471 = vector.load %arg9[%470, %c0_139] : memref<64x128xf32, #tpu.memory_space<vmem>>, vector<8x128xf32>
    tpu.vector_store %arg9[%470, %c0_139], %465 {strides = array<i32>} : memref<64x128xf32, #tpu.memory_space<vmem>>, vector<8x128xf32>,
    %c5_i32_140 = arith.constant 5 : i32
    %c8_i32_141 = arith.constant 8 : i32
    %472 = arith.muli %c5_i32_140, %c8_i32_141 : i32
    %473 = tpu.assume_multiple %472, 8 : i32
    %474 = arith.index_cast %473 : i32 to index
    %c0_142 = arith.constant 0 : index
    %475 = vector.load %arg13[%474, %c0_142] : memref<64x512xf32, #tpu.memory_space<vmem>>, vector<8x512xf32>
    %cst_143 = arith.constant dense<0.000000e+00> : vector<8x512xf32>
    %476 = tpu.matmul %467, %286, %cst_143 {dimension_numbers = #tpu.dot_dimension_numbers<[1], [0], [0], [1], [0, 0, 1, 1], [], []>} : vector<8x128xf32>, vector<128x512xf32>, vector<8x512xf32> -> vector<8x512xf32>
    %477 = arith.addf %475, %476 : vector<8x512xf32>
    %478 = vector.extract_strided_slice %477 {offsets = [0, 0], sizes = [8, 128], strides = [1, 1]} : vector<8x512xf32> to vector<8x128xf32>
    %479 = arith.negf %478 : vector<8x128xf32>
    %480 = math.exp %479 : vector<8x128xf32>
    %cst_144 = arith.constant 1.000000e+00 : f32
    %481 = vector.broadcast %cst_144 : f32 to vector<8x128xf32>
    %482 = arith.addf %481, %480 : vector<8x128xf32>
    %483 = arith.divf %481, %482 : vector<8x128xf32>
    %484 = vector.extract_strided_slice %477 {offsets = [0, 128], sizes = [8, 128], strides = [1, 1]} : vector<8x512xf32> to vector<8x128xf32>
    %485 = arith.negf %484 : vector<8x128xf32>
    %486 = math.exp %485 : vector<8x128xf32>
    %cst_145 = arith.constant 1.000000e+00 : f32
    %487 = vector.broadcast %cst_145 : f32 to vector<8x128xf32>
    %488 = arith.addf %487, %486 : vector<8x128xf32>
    %489 = arith.divf %487, %488 : vector<8x128xf32>
    %490 = vector.extract_strided_slice %477 {offsets = [0, 256], sizes = [8, 128], strides = [1, 1]} : vector<8x512xf32> to vector<8x128xf32>
    %491 = math.tanh %490 : vector<8x128xf32>
    %492 = vector.extract_strided_slice %477 {offsets = [0, 384], sizes = [8, 128], strides = [1, 1]} : vector<8x512xf32> to vector<8x128xf32>
    %493 = arith.negf %492 : vector<8x128xf32>
    %494 = math.exp %493 : vector<8x128xf32>
    %cst_146 = arith.constant 1.000000e+00 : f32
    %495 = vector.broadcast %cst_146 : f32 to vector<8x128xf32>
    %496 = arith.addf %495, %494 : vector<8x128xf32>
    %497 = arith.divf %495, %496 : vector<8x128xf32>
    %498 = arith.mulf %489, %465 : vector<8x128xf32>
    %499 = arith.mulf %483, %491 : vector<8x128xf32>
    %500 = arith.addf %498, %499 : vector<8x128xf32>
    %501 = math.tanh %500 : vector<8x128xf32>
    %502 = arith.mulf %497, %501 : vector<8x128xf32>
    %503 = arith.index_cast %473 : i32 to index
    %c0_147 = arith.constant 0 : index
    %504 = vector.load %arg8[%503, %c0_147] : memref<64x128xf32, #tpu.memory_space<vmem>>, vector<8x128xf32>
    tpu.vector_store %arg8[%503, %c0_147], %502 {strides = array<i32>} : memref<64x128xf32, #tpu.memory_space<vmem>>, vector<8x128xf32>,
    %505 = arith.index_cast %473 : i32 to index
    %c0_148 = arith.constant 0 : index
    %506 = vector.load %arg9[%505, %c0_148] : memref<64x128xf32, #tpu.memory_space<vmem>>, vector<8x128xf32>
    tpu.vector_store %arg9[%505, %c0_148], %500 {strides = array<i32>} : memref<64x128xf32, #tpu.memory_space<vmem>>, vector<8x128xf32>,
    %c6_i32_149 = arith.constant 6 : i32
    %c8_i32_150 = arith.constant 8 : i32
    %507 = arith.muli %c6_i32_149, %c8_i32_150 : i32
    %508 = tpu.assume_multiple %507, 8 : i32
    %509 = arith.index_cast %508 : i32 to index
    %c0_151 = arith.constant 0 : index
    %510 = vector.load %arg13[%509, %c0_151] : memref<64x512xf32, #tpu.memory_space<vmem>>, vector<8x512xf32>
    %cst_152 = arith.constant dense<0.000000e+00> : vector<8x512xf32>
    %511 = tpu.matmul %502, %286, %cst_152 {dimension_numbers = #tpu.dot_dimension_numbers<[1], [0], [0], [1], [0, 0, 1, 1], [], []>} : vector<8x128xf32>, vector<128x512xf32>, vector<8x512xf32> -> vector<8x512xf32>
    %512 = arith.addf %510, %511 : vector<8x512xf32>
    %513 = vector.extract_strided_slice %512 {offsets = [0, 0], sizes = [8, 128], strides = [1, 1]} : vector<8x512xf32> to vector<8x128xf32>
    %514 = arith.negf %513 : vector<8x128xf32>
    %515 = math.exp %514 : vector<8x128xf32>
    %cst_153 = arith.constant 1.000000e+00 : f32
    %516 = vector.broadcast %cst_153 : f32 to vector<8x128xf32>
    %517 = arith.addf %516, %515 : vector<8x128xf32>
    %518 = arith.divf %516, %517 : vector<8x128xf32>
    %519 = vector.extract_strided_slice %512 {offsets = [0, 128], sizes = [8, 128], strides = [1, 1]} : vector<8x512xf32> to vector<8x128xf32>
    %520 = arith.negf %519 : vector<8x128xf32>
    %521 = math.exp %520 : vector<8x128xf32>
    %cst_154 = arith.constant 1.000000e+00 : f32
    %522 = vector.broadcast %cst_154 : f32 to vector<8x128xf32>
    %523 = arith.addf %522, %521 : vector<8x128xf32>
    %524 = arith.divf %522, %523 : vector<8x128xf32>
    %525 = vector.extract_strided_slice %512 {offsets = [0, 256], sizes = [8, 128], strides = [1, 1]} : vector<8x512xf32> to vector<8x128xf32>
    %526 = math.tanh %525 : vector<8x128xf32>
    %527 = vector.extract_strided_slice %512 {offsets = [0, 384], sizes = [8, 128], strides = [1, 1]} : vector<8x512xf32> to vector<8x128xf32>
    %528 = arith.negf %527 : vector<8x128xf32>
    %529 = math.exp %528 : vector<8x128xf32>
    %cst_155 = arith.constant 1.000000e+00 : f32
    %530 = vector.broadcast %cst_155 : f32 to vector<8x128xf32>
    %531 = arith.addf %530, %529 : vector<8x128xf32>
    %532 = arith.divf %530, %531 : vector<8x128xf32>
    %533 = arith.mulf %524, %500 : vector<8x128xf32>
    %534 = arith.mulf %518, %526 : vector<8x128xf32>
    %535 = arith.addf %533, %534 : vector<8x128xf32>
    %536 = math.tanh %535 : vector<8x128xf32>
    %537 = arith.mulf %532, %536 : vector<8x128xf32>
    %538 = arith.index_cast %508 : i32 to index
    %c0_156 = arith.constant 0 : index
    %539 = vector.load %arg8[%538, %c0_156] : memref<64x128xf32, #tpu.memory_space<vmem>>, vector<8x128xf32>
    tpu.vector_store %arg8[%538, %c0_156], %537 {strides = array<i32>} : memref<64x128xf32, #tpu.memory_space<vmem>>, vector<8x128xf32>,
    %540 = arith.index_cast %508 : i32 to index
    %c0_157 = arith.constant 0 : index
    %541 = vector.load %arg9[%540, %c0_157] : memref<64x128xf32, #tpu.memory_space<vmem>>, vector<8x128xf32>
    tpu.vector_store %arg9[%540, %c0_157], %535 {strides = array<i32>} : memref<64x128xf32, #tpu.memory_space<vmem>>, vector<8x128xf32>,
    %c7_i32_158 = arith.constant 7 : i32
    %c8_i32_159 = arith.constant 8 : i32
    %542 = arith.muli %c7_i32_158, %c8_i32_159 : i32
    %543 = tpu.assume_multiple %542, 8 : i32
    %544 = arith.index_cast %543 : i32 to index
    %c0_160 = arith.constant 0 : index
    %545 = vector.load %arg13[%544, %c0_160] : memref<64x512xf32, #tpu.memory_space<vmem>>, vector<8x512xf32>
    %cst_161 = arith.constant dense<0.000000e+00> : vector<8x512xf32>
    %546 = tpu.matmul %537, %286, %cst_161 {dimension_numbers = #tpu.dot_dimension_numbers<[1], [0], [0], [1], [0, 0, 1, 1], [], []>} : vector<8x128xf32>, vector<128x512xf32>, vector<8x512xf32> -> vector<8x512xf32>
    %547 = arith.addf %545, %546 : vector<8x512xf32>
    %548 = vector.extract_strided_slice %547 {offsets = [0, 0], sizes = [8, 128], strides = [1, 1]} : vector<8x512xf32> to vector<8x128xf32>
    %549 = arith.negf %548 : vector<8x128xf32>
    %550 = math.exp %549 : vector<8x128xf32>
    %cst_162 = arith.constant 1.000000e+00 : f32
    %551 = vector.broadcast %cst_162 : f32 to vector<8x128xf32>
    %552 = arith.addf %551, %550 : vector<8x128xf32>
    %553 = arith.divf %551, %552 : vector<8x128xf32>
    %554 = vector.extract_strided_slice %547 {offsets = [0, 128], sizes = [8, 128], strides = [1, 1]} : vector<8x512xf32> to vector<8x128xf32>
    %555 = arith.negf %554 : vector<8x128xf32>
    %556 = math.exp %555 : vector<8x128xf32>
    %cst_163 = arith.constant 1.000000e+00 : f32
    %557 = vector.broadcast %cst_163 : f32 to vector<8x128xf32>
    %558 = arith.addf %557, %556 : vector<8x128xf32>
    %559 = arith.divf %557, %558 : vector<8x128xf32>
    %560 = vector.extract_strided_slice %547 {offsets = [0, 256], sizes = [8, 128], strides = [1, 1]} : vector<8x512xf32> to vector<8x128xf32>
    %561 = math.tanh %560 : vector<8x128xf32>
    %562 = vector.extract_strided_slice %547 {offsets = [0, 384], sizes = [8, 128], strides = [1, 1]} : vector<8x512xf32> to vector<8x128xf32>
    %563 = arith.negf %562 : vector<8x128xf32>
    %564 = math.exp %563 : vector<8x128xf32>
    %cst_164 = arith.constant 1.000000e+00 : f32
    %565 = vector.broadcast %cst_164 : f32 to vector<8x128xf32>
    %566 = arith.addf %565, %564 : vector<8x128xf32>
    %567 = arith.divf %565, %566 : vector<8x128xf32>
    %568 = arith.mulf %559, %535 : vector<8x128xf32>
    %569 = arith.mulf %553, %561 : vector<8x128xf32>
    %570 = arith.addf %568, %569 : vector<8x128xf32>
    %571 = math.tanh %570 : vector<8x128xf32>
    %572 = arith.mulf %567, %571 : vector<8x128xf32>
    %573 = arith.index_cast %543 : i32 to index
    %c0_165 = arith.constant 0 : index
    %574 = vector.load %arg8[%573, %c0_165] : memref<64x128xf32, #tpu.memory_space<vmem>>, vector<8x128xf32>
    tpu.vector_store %arg8[%573, %c0_165], %572 {strides = array<i32>} : memref<64x128xf32, #tpu.memory_space<vmem>>, vector<8x128xf32>,
    %575 = arith.index_cast %543 : i32 to index
    %c0_166 = arith.constant 0 : index
    %576 = vector.load %arg9[%575, %c0_166] : memref<64x128xf32, #tpu.memory_space<vmem>>, vector<8x128xf32>
    tpu.vector_store %arg9[%575, %c0_166], %570 {strides = array<i32>} : memref<64x128xf32, #tpu.memory_space<vmem>>, vector<8x128xf32>,
    %c8_i32_167 = arith.constant 8 : i32
    %c1_168 = arith.constant 1 : index
    %c0_169 = arith.constant 0 : index
    %c0_170 = arith.constant 0 : index
    %577 = vector.load %arg10[%c1_168, %c0_169, %c0_170] : memref<2x8x128xf32, #tpu.memory_space<vmem>>, vector<1x8x128xf32>
    %578 = vector.shape_cast %577 : vector<1x8x128xf32> to vector<8x128xf32>
    %579 = vector.shape_cast %572 : vector<8x128xf32> to vector<1x8x128xf32>
    tpu.vector_store %arg10[%c1_168, %c0_169, %c0_170], %579 {strides = array<i32>} : memref<2x8x128xf32, #tpu.memory_space<vmem>>, vector<1x8x128xf32>,
    %c1_171 = arith.constant 1 : index
    %c0_172 = arith.constant 0 : index
    %c0_173 = arith.constant 0 : index
    %580 = vector.load %arg11[%c1_171, %c0_172, %c0_173] : memref<2x8x128xf32, #tpu.memory_space<vmem>>, vector<1x8x128xf32>
    %581 = vector.shape_cast %580 : vector<1x8x128xf32> to vector<8x128xf32>
    %582 = vector.shape_cast %570 : vector<8x128xf32> to vector<1x8x128xf32>
    tpu.vector_store %arg11[%c1_171, %c0_172, %c0_173], %582 {strides = array<i32>} : memref<2x8x128xf32, #tpu.memory_space<vmem>>, vector<1x8x128xf32>,
    return
  }
  func.func @transform_0(%arg0: i32) -> (i32, i32) {
    %c0_i32 = arith.constant 0 : i32
    %c0_i32_0 = arith.constant 0 : i32
    return %arg0, %c0_i32 : i32, i32
  }
  func.func @transform_1(%arg0: i32) -> (i32, i32) {
    %c0_i32 = arith.constant 0 : i32
    %c0_i32_0 = arith.constant 0 : i32
    %c0_i32_1 = arith.constant 0 : i32
    return %c0_i32, %c0_i32_0 : i32, i32
  }
  func.func @transform_2(%arg0: i32) -> (i32, i32) {
    %c0_i32 = arith.constant 0 : i32
    %c0_i32_0 = arith.constant 0 : i32
    %c0_i32_1 = arith.constant 0 : i32
    return %c0_i32, %c0_i32_0 : i32, i32
  }
  func.func @transform_3(%arg0: i32) -> (i32, i32) {
    %c0_i32 = arith.constant 0 : i32
    %c0_i32_0 = arith.constant 0 : i32
    %c0_i32_1 = arith.constant 0 : i32
    return %c0_i32, %c0_i32_0 : i32, i32
  }
  func.func @transform_4(%arg0: i32) -> (i32, i32) {
    %c0_i32 = arith.constant 0 : i32
    %c0_i32_0 = arith.constant 0 : i32
    %c0_i32_1 = arith.constant 0 : i32
    return %c0_i32, %c0_i32_0 : i32, i32
  }
  func.func @transform_5(%arg0: i32) -> (i32, i32) {
    %c0_i32 = arith.constant 0 : i32
    %c0_i32_0 = arith.constant 0 : i32
    %c0_i32_1 = arith.constant 0 : i32
    return %c0_i32, %c0_i32_0 : i32, i32
  }
  func.func @transform_6(%arg0: i32) -> (i32, i32) {
    %c0_i32 = arith.constant 0 : i32
    %c0_i32_0 = arith.constant 0 : i32
    %c0_i32_1 = arith.constant 0 : i32
    return %c0_i32, %c0_i32_0 : i32, i32
  }
  func.func @transform_7(%arg0: i32) -> (i32, i32) {
    %c0_i32 = arith.constant 0 : i32
    %c0_i32_0 = arith.constant 0 : i32
    return %arg0, %c0_i32 : i32, i32
  }
  func.func @transform_8(%arg0: i32) -> (i32, i32) {
    %c0_i32 = arith.constant 0 : i32
    %c0_i32_0 = arith.constant 0 : i32
    return %arg0, %c0_i32 : i32, i32
  }
}

</mosaic_0001>

<bundles_post_ra>
// kernel: tpu_custom_call.1
= control target key start
LH: loop header
LB: loop body
LE: loop exit
PB: predicated region body
PF: predicated region fallthrough
CT: control target
= control target key end

     0   :  { %14 = vsyncpa [#allocation7], 0  ;;  %s5995_s0 = inlined_call_operand.vmem [shape: f32[64,16], index: 0, kind: input, shape index: {}]   ;;  %s5996_s1 = inlined_call_operand.vmem [shape: f32[16,512], index: 1, kind: input, shape index: {}]   ;;  %s5997_s2 = inlined_call_operand.hbm [shape: f32[128,512], index: 2, kind: input, shape index: {}]   ;;  %s5998_s3 = inlined_call_operand.vmem [shape: f32[1,512], index: 3, kind: input, shape index: {}]   ;;  %s5999_s4 = inlined_call_operand.hbm [shape: f32[128,512], index: 4, kind: input, shape index: {}]   ;;  %s6000_s5 = inlined_call_operand.hbm [shape: f32[128,512], index: 5, kind: input, shape index: {}]   ;;  %s6001_s6 = inlined_call_operand.vmem [shape: f32[1,512], index: 6, kind: input, shape index: {}]   ;;  %s6002_s7 = inlined_call_operand.hbm [shape: f32[64,128], index: 7, kind: output, shape index: {0}]   ;;  %s6003_s8 = inlined_call_operand.hbm [shape: f32[64,128], index: 8, kind: output, shape index: {1}]  }
   0x1   :  { %15 = vsyncpa [#allocation10], 0 }
   0x2   :  { %16 = vsyncpa [#allocation8], 0 }
   0x3   :  { %17 = vsyncpa [#allocation14], 0  ;;  %s41_s29 = sshll.u32 %s5999_s4, 4  ;;  %s3880_s30 = smov [#allocation9]   ;;  %s42_s29 = int_to_ptr.hbm [resolvable:$true] %s41_s29 }
   0x4   :  { %s43_s9 = sshll.u32 %s3880_s30, 4  ;;  %s26_s12 = sshll.u32 %s5997_s2, 4  ;;  %s44_s9 = int_to_ptr.vmem [resolvable:$true] %s43_s9  ;;  %s27_s12 = int_to_ptr.hbm [resolvable:$true] %s26_s12 }
   0x5   :  { %s3881_s13 = smov 512   ;;  %s3882_s14 = smov 32  }
   0x6   :  { %49 = dma.hbm_to_vmem [thread:$0]  %s42_s29, 8192, %s44_s9, [#allocation10], %s3881_s13, %s3881_s13, %s3882_s14  }
   0x7   :  { %s3883_s15 = smov [#allocation6]   ;;  %s54_s19 = sshll.u32 %s6000_s5, 4  ;;  %s55_s19 = int_to_ptr.hbm [resolvable:$true] %s54_s19 }
   0x8   :  { %s28_s16 = sshll.u32 %s3883_s15, 4  ;;  %s3884_s4 = smov [#allocation11]   ;;  %s29_s16 = int_to_ptr.vmem [resolvable:$true] %s28_s16 }
   0x9   :  { %34 = dma.hbm_to_vmem [thread:$0]  %s27_s12, 8192, %s29_s16, [#allocation7], %s3881_s13, %s3881_s13, %s3882_s14  }
   0xa   :  { %s56_s20 = sshll.u32 %s3884_s4, 4  ;;  %s57_s20 = int_to_ptr.vmem [resolvable:$true] %s56_s20 }
   0xb   :  { %62 = dma.hbm_to_vmem [thread:$0]  %s55_s19, 8192, %s57_s20, [#allocation10], %s3881_s13, %s3881_s13, %s3882_s14  }
   0xc   :  { %3872 = dma.done.wait [#allocation7], 8192  }
   0xd   :  { %3873 = vsyncadd [#allocation7], 4294959104 }
   0xe   :  { %3874 = dma.done.wait [#allocation10], 16384  }
   0xf   :  { %3875 = vsyncadd [#allocation10], 4294950912  ;;  %v89_v0 = vld [vmem:[%s5996_s1 + $0x20] sm:$0xff]  ;;  %v90_v1 = vld [vmem:[%s5996_s1 + $0x28] sm:$0xff]  ;;  %vm175_vm0 = vcmask 130048   ;;  %s3252_s30 = sshll.u32 %s6003_s8, 4  ;;  %s3253_s30 = int_to_ptr.hbm [resolvable:$true] %s3252_s30 }
  0x10   :  { %v91_v2 = vld [vmem:[%s5996_s1 + $0x30] sm:$0xff]  ;;  %214 = vmatpush.msra.mxu0 %v89_v0  ;;  %255 = vmatpush.msra.mxu1 %v90_v1  ;;  %v92_v3 = vld [vmem:[%s5996_s1 + $0x38] sm:$0xff]  ;;  %v85_v4 = vld [vmem:[%s5996_s1] sm:$0xff]  ;;  %s3887_s9 = smov 128   ;;  %s3888_s10 = smov 8  }
  0x11   :  { %v86_v5 = vld [vmem:[%s5996_s1 + $0x8] sm:$0xff]  ;;  %296 = vmatpush.msra.mxu2 %v91_v2  ;;  %337 = vmatpush.msra.mxu3 %v92_v3  ;;  %v87_v6 = vld [vmem:[%s5996_s1 + $0x10] sm:$0xff]  ;;  %v88_v7 = vld [vmem:[%s5996_s1 + $0x18] sm:$0xff]  ;;  %s3889_s8 = smov [#allocation12]   ;;  %s3239_s14 = sshll.u32 %s6002_s7, 4  ;;  %s3240_s14 = int_to_ptr.hbm [resolvable:$true] %s3239_s14 }
  0x12   :  { %v158_v8 = vld [vmem:[%s5995_s0] sm:$0xff]  ;;  %215 = vmatpush.msra.mxu0 %v85_v4  ;;  %256 = vmatpush.msra.mxu1 %v86_v5  ;;  %v3973_v10 = vld [vmem:[#allocation6 + $0x1e8] sm:$0xff]  ;;  %v3977_v11 = vld [vmem:[#allocation6 + $0x1f8] sm:$0xff]  ;;  %s3237_s11 = sshll.u32 %s3889_s8, 4  ;;  %s3238_s11 = int_to_ptr.vmem [resolvable:$true] %s3237_s11 }
  0x13   :  { %297 = vmatpush.msra.mxu2 %v87_v6  ;;  %338 = vmatpush.msra.mxu3 %v88_v7  ;;  %v3971_v9 = vld [vmem:[#allocation6 + $0x1e0] sm:$0xff]  ;;  %v3983_v13 = vld [vmem:[#allocation6 + $0x1c8] sm:$0xff]  ;;  %v3987_v14 = vld [vmem:[#allocation6 + $0x1d8] sm:$0xff] }
  0x14   :  { %3278 = vmatmul.msk.f32.vlgmr.msra.gmra.mxu0 %vm175_vm0, %v158_v8  ;;  %3286 = vmatmul.msk.f32.vlgmr.msra.gmra.mxu1 %vm175_vm0, %v158_v8  ;;  %v3981_v12 = vld [vmem:[#allocation6 + $0x1c0] sm:$0xff]  ;;  %v3989_v15 = vld [vmem:[#allocation6 + $0x1f0] sm:$0xff]  ;;  %v3994_v17 = vld [vmem:[#allocation6 + $0x1a8] sm:$0xff] }
  0x15   :  { %3294 = vmatmul.msk.f32.vlgmr.msra.gmra.mxu2 %vm175_vm0, %v158_v8  ;;  %3302 = vmatmul.msk.f32.vlgmr.msra.gmra.mxu3 %vm175_vm0, %v158_v8  ;;  %v3992_v16 = vld [vmem:[#allocation6 + $0x1a0] sm:$0xff]  ;;  %v3997_v18 = vld [vmem:[#allocation6 + $0x1d0] sm:$0xff]  ;;  %v4001_v19 = vld [vmem:[#allocation6 + $0x1b8] sm:$0xff] }
  0x16   :  { %405 = vmatpush.msrb.mxu0 %v3971_v9  ;;  %425 = vmatpush.msrb.mxu1 %v3973_v10  ;;  %v159_v20 = vld [vmem:[%s5995_s0 + $0x8] sm:$0xff]  ;;  %v4008_v21 = vld [vmem:[#allocation6 + $0x1b0] sm:$0xff]  ;;  %v4012_v22 = vld [vmem:[#allocation6 + $0x180] sm:$0xff] }
  0x17   :  { %465 = vmatpush.msrb.mxu3 %v3977_v11  ;;  %445 = vmatpush.msrb.mxu2 %v3989_v15  ;;  %v4014_v23 = vld [vmem:[#allocation6 + $0x188] sm:$0xff]  ;;  %v4020_v24 = vld [vmem:[#allocation6 + $0x198] sm:$0xff]  ;;  %v4022_v25 = vld [vmem:[#allocation6 + $0x190] sm:$0xff] }
  0x18   :  { %406 = vmatpush.msrb.mxu0 %v3981_v12  ;;  %426 = vmatpush.msrb.mxu1 %v3983_v13  ;;  %v4026_v26 = vld [vmem:[#allocation6 + $0x160] sm:$0xff]  ;;  %v4028_v27 = vld [vmem:[#allocation6 + $0x168] sm:$0xff]  ;;  %v4032_v28 = vld [vmem:[#allocation6 + $0x178] sm:$0xff] }
  0x19   :  { %466 = vmatpush.msrb.mxu3 %v3987_v14  ;;  %446 = vmatpush.msrb.mxu2 %v3997_v18  ;;  %v4034_v29 = vld [vmem:[#allocation6 + $0x170] sm:$0xff]  ;;  %v4037_v30 = vld [vmem:[#allocation6 + $0x140] sm:$0xff]  ;;  %v4039_v31 = vld [vmem:[#allocation6 + $0x148] sm:$0xff] }
  0x1a   :  { %407 = vmatpush.msrb.mxu0 %v3992_v16  ;;  %427 = vmatpush.msrb.mxu1 %v3994_v17  ;;  %v4044_v32 = vld [vmem:[#allocation6 + $0x158] sm:$0xff]  ;;  %v4046_v33 = vld [vmem:[#allocation6 + $0x150] sm:$0xff]  ;;  %v4055_v35 = vld [vmem:[#allocation6 + $0x120] sm:$0xff] }
  0x1b   :  { %467 = vmatpush.msrb.mxu3 %v4001_v19  ;;  %447 = vmatpush.msrb.mxu2 %v4008_v21  ;;  %v160_v34 = vld [vmem:[%s5995_s0 + $0x10] sm:$0xff]  ;;  %v4057_v36 = vld [vmem:[#allocation6 + $0x128] sm:$0xff]  ;;  %v4063_v37 = vld [vmem:[#allocation6 + $0x138] sm:$0xff] }
  0x1c   :  { %3279 = vmatmul.msk.f32.gmra.mxu0 %vm175_vm0, %v159_v20  ;;  %3287 = vmatmul.msk.f32.gmra.mxu1 %vm175_vm0, %v159_v20  ;;  %v4065_v38 = vld [vmem:[#allocation6 + $0x130] sm:$0xff]  ;;  %v4069_v39 = vld [vmem:[#allocation6 + $0x100] sm:$0xff]  ;;  %v4071_v40 = vld [vmem:[#allocation6 + $0x108] sm:$0xff] }
  0x1d   :  { %3295 = vmatmul.msk.f32.gmra.mxu2 %vm175_vm0, %v159_v20  ;;  %3303 = vmatmul.msk.f32.gmra.mxu3 %vm175_vm0, %v159_v20  ;;  %v4075_v41 = vld [vmem:[#allocation6 + $0x118] sm:$0xff]  ;;  %v4077_v42 = vld [vmem:[#allocation6 + $0x110] sm:$0xff]  ;;  %v4080_v43 = vld [vmem:[#allocation6 + $0xe0] sm:$0xff] }
  0x1e   :  { %408 = vmatpush.msrb.mxu0 %v4012_v22  ;;  %428 = vmatpush.msrb.mxu1 %v4014_v23  ;;  %v4082_v44 = vld [vmem:[#allocation6 + $0xe8] sm:$0xff]  ;;  %v4087_v45 = vld [vmem:[#allocation6 + $0xf8] sm:$0xff]  ;;  %v4089_v46 = vld [vmem:[#allocation6 + $0xf0] sm:$0xff] }
  0x1f   :  { %468 = vmatpush.msrb.mxu3 %v4020_v24  ;;  %448 = vmatpush.msrb.mxu2 %v4022_v25  ;;  %v161_v47 = vld [vmem:[%s5995_s0 + $0x18] sm:$0xff]  ;;  %v4098_v48 = vld [vmem:[#allocation6 + $0xc0] sm:$0xff]  ;;  %v4100_v49 = vld [vmem:[#allocation6 + $0xc8] sm:$0xff] }
  0x20   :  { %409 = vmatpush.msrb.mxu0 %v4026_v26  ;;  %429 = vmatpush.msrb.mxu1 %v4028_v27  ;;  %v4106_v50 = vld [vmem:[#allocation6 + $0xd8] sm:$0xff]  ;;  %v4108_v51 = vld [vmem:[#allocation6 + $0xd0] sm:$0xff]  ;;  %v4112_v52 = vld [vmem:[#allocation6 + $0xa0] sm:$0xff] }
  0x21   :  { %469 = vmatpush.msrb.mxu3 %v4032_v28  ;;  %449 = vmatpush.msrb.mxu2 %v4034_v29  ;;  %6272 = vst [vmem:[#allocation19_spill] sm:$0xff] %v4106_v50  ;;  %v4114_v53 = vld [vmem:[#allocation6 + $0xa8] sm:$0xff]  ;;  %v4118_v54 = vld [vmem:[#allocation6 + $0xb8] sm:$0xff]  ;;  %v4120_v55 = vld [vmem:[#allocation6 + $0xb0] sm:$0xff] }
  0x22   :  { %410 = vmatpush.msrb.mxu0 %v4037_v30  ;;  %430 = vmatpush.msrb.mxu1 %v4039_v31  ;;  %6273 = vst [vmem:[#allocation20_spill] sm:$0xff] %v4108_v51  ;;  %v4123_v56 = vld [vmem:[#allocation6 + $0x80] sm:$0xff]  ;;  %v4125_v57 = vld [vmem:[#allocation6 + $0x88] sm:$0xff]  ;;  %v4130_v58 = vld [vmem:[#allocation6 + $0x98] sm:$0xff] }
  0x23   :  { %470 = vmatpush.msrb.mxu3 %v4044_v32  ;;  %450 = vmatpush.msrb.mxu2 %v4046_v33  ;;  %6274 = vst [vmem:[#allocation21_spill] sm:$0xff] %v4112_v52  ;;  %v4132_v59 = vld [vmem:[#allocation6 + $0x90] sm:$0xff]  ;;  %v162_v60 = vld [vmem:[%s5995_s0 + $0x20] sm:$0xff]  ;;  %v4143_v62 = vld [vmem:[#allocation6 + $0x68] sm:$0xff] }
  0x24   :  { %3280 = vmatmul.msk.f32.gmra.mxu0 %vm175_vm0, %v160_v34  ;;  %3288 = vmatmul.msk.f32.gmra.mxu1 %vm175_vm0, %v160_v34  ;;  %6275 = vst [vmem:[#allocation22_spill] sm:$0xff] %v4114_v53  ;;  %v4141_v61 = vld [vmem:[#allocation6 + $0x60] sm:$0xff]  ;;  %v4149_v63 = vld [vmem:[#allocation6 + $0x78] sm:$0xff]  ;;  %v4151_v0 = vld [vmem:[#allocation6 + $0x70] sm:$0xff] }
  0x25   :  { %3296 = vmatmul.msk.f32.gmra.mxu2 %vm175_vm0, %v160_v34  ;;  %3304 = vmatmul.msk.f32.gmra.mxu3 %vm175_vm0, %v160_v34  ;;  %6276 = vst [vmem:[#allocation23_spill] sm:$0xff] %v4118_v54  ;;  %v4155_v1 = vld [vmem:[#allocation6 + $0x40] sm:$0xff]  ;;  %v4157_v2 = vld [vmem:[#allocation6 + $0x48] sm:$0xff]  ;;  %v4161_v3 = vld [vmem:[#allocation6 + $0x58] sm:$0xff] }
  0x26   :  { %411 = vmatpush.msrb.mxu0 %v4055_v35  ;;  %431 = vmatpush.msrb.mxu1 %v4057_v36  ;;  %6277 = vst [vmem:[#allocation24_spill] sm:$0xff] %v4120_v55  ;;  %v4163_v4 = vld [vmem:[#allocation6 + $0x50] sm:$0xff]  ;;  %v4166_v5 = vld [vmem:[#allocation6 + $0x20] sm:$0xff]  ;;  %v4168_v6 = vld [vmem:[#allocation6 + $0x28] sm:$0xff] }
  0x27   :  { %471 = vmatpush.msrb.mxu3 %v4063_v37  ;;  %451 = vmatpush.msrb.mxu2 %v4065_v38  ;;  %6278 = vst [vmem:[#allocation25_spill] sm:$0xff] %v4123_v56  ;;  %v4173_v7 = vld [vmem:[#allocation6 + $0x30] sm:$0xff]  ;;  %v4175_v8 = vld [vmem:[#allocation6 + $0x38] sm:$0xff]  ;;  %v163_v20 = vld [vmem:[%s5995_s0 + $0x28] sm:$0xff] }
  0x28   :  { %412 = vmatpush.msrb.mxu0 %v4069_v39  ;;  %432 = vmatpush.msrb.mxu1 %v4071_v40  ;;  %6279 = vst [vmem:[#allocation26_spill] sm:$0xff] %v4125_v57  ;;  %v4184_v34 = vld [vmem:[#allocation6] sm:$0xff] }
  0x29   :  { %472 = vmatpush.msrb.mxu3 %v4075_v41  ;;  %452 = vmatpush.msrb.mxu2 %v4077_v42  ;;  %6280 = vst [vmem:[#allocation27_spill] sm:$0xff] %v4130_v58 }
  0x2a   :  { %413 = vmatpush.msrb.mxu0 %v4080_v43  ;;  %433 = vmatpush.msrb.mxu1 %v4082_v44  ;;  %6281 = vst [vmem:[#allocation28_spill] sm:$0xff] %v4132_v59 }
  0x2b   :  { %473 = vmatpush.msrb.mxu3 %v4087_v45  ;;  %453 = vmatpush.msrb.mxu2 %v4089_v46  ;;  %6282 = vst [vmem:[#allocation29_spill] sm:$0xff] %v4141_v61 }
  0x2c   :  { %3281 = vmatmul.msk.f32.gmra.mxu0 %vm175_vm0, %v161_v47  ;;  %3289 = vmatmul.msk.f32.gmra.mxu1 %vm175_vm0, %v161_v47  ;;  %6283 = vst [vmem:[#allocation30_spill] sm:$0xff] %v4143_v62 }
  0x2d   :  { %3297 = vmatmul.msk.f32.gmra.mxu2 %vm175_vm0, %v161_v47  ;;  %3305 = vmatmul.msk.f32.gmra.mxu3 %vm175_vm0, %v161_v47  ;;  %6284 = vst [vmem:[#allocation31_spill] sm:$0xff] %v4149_v63  ;;  %v4186_v47 = vld [vmem:[#allocation6 + $0x8] sm:$0xff] }
  0x2e   :  { %414 = vmatpush.msrb.mxu0 %v4098_v48  ;;  %434 = vmatpush.msrb.mxu1 %v4100_v49  ;;  %6285 = vst [vmem:[#allocation32_spill] sm:$0xff] %v4151_v0 }
  0x2f   :  { %474 = vmatpush.msrb.mxu3 %v4106_v50  ;;  %454 = vmatpush.msrb.mxu2 %v4108_v51  ;;  %6286 = vst [vmem:[#allocation33_spill] sm:$0xff] %v4155_v1 }
  0x30   :  { %415 = vmatpush.msrb.mxu0 %v4112_v52  ;;  %435 = vmatpush.msrb.mxu1 %v4114_v53  ;;  %6287 = vst [vmem:[#allocation34_spill] sm:$0xff] %v4157_v2 }
  0x31   :  { %475 = vmatpush.msrb.mxu3 %v4118_v54  ;;  %455 = vmatpush.msrb.mxu2 %v4120_v55  ;;  %6288 = vst [vmem:[#allocation35_spill] sm:$0xff] %v4161_v3 }
  0x32   :  { %416 = vmatpush.msrb.mxu0 %v4123_v56  ;;  %436 = vmatpush.msrb.mxu1 %v4125_v57  ;;  %6289 = vst [vmem:[#allocation36_spill] sm:$0xff] %v4163_v4 }
  0x33   :  { %476 = vmatpush.msrb.mxu3 %v4130_v58  ;;  %456 = vmatpush.msrb.mxu2 %v4132_v59  ;;  %6290 = vst [vmem:[#allocation37_spill] sm:$0xff] %v4166_v5 }
  0x34   :  { %3282 = vmatmul.msk.f32.gmra.mxu0 %vm175_vm0, %v162_v60  ;;  %3290 = vmatmul.msk.f32.gmra.mxu1 %vm175_vm0, %v162_v60  ;;  %6291 = vst [vmem:[#allocation38_spill] sm:$0xff] %v4168_v6 }
  0x35   :  { %3298 = vmatmul.msk.f32.gmra.mxu2 %vm175_vm0, %v162_v60  ;;  %3306 = vmatmul.msk.f32.gmra.mxu3 %vm175_vm0, %v162_v60  ;;  %6292 = vst [vmem:[#allocation39_spill] sm:$0xff] %v4173_v7  ;;  %v4192_v60 = vld [vmem:[#allocation6 + $0x10] sm:$0xff] }
  0x36   :  { %417 = vmatpush.msrb.mxu0 %v4141_v61  ;;  %437 = vmatpush.msrb.mxu1 %v4143_v62  ;;  %6293 = vst [vmem:[#allocation40_spill] sm:$0xff] %v4175_v8 }
  0x37   :  { %477 = vmatpush.msrb.mxu3 %v4149_v63  ;;  %457 = vmatpush.msrb.mxu2 %v4151_v0  ;;  %6294 = vst [vmem:[#allocation41_spill] sm:$0xff] %v4184_v34 }
  0x38   :  { %418 = vmatpush.msrb.mxu0 %v4155_v1  ;;  %438 = vmatpush.msrb.mxu1 %v4157_v2  ;;  %6295 = vst [vmem:[#allocation42_spill] sm:$0xff] %v4186_v47 }
  0x39   :  { %478 = vmatpush.msrb.mxu3 %v4161_v3  ;;  %458 = vmatpush.msrb.mxu2 %v4163_v4  ;;  %6296 = vst [vmem:[#allocation43_spill] sm:$0xff] %v4192_v60  ;;  %v4194_v3 = vld [vmem:[#allocation6 + $0x18] sm:$0xff] }
  0x3a   :  { %419 = vmatpush.msrb.mxu0 %v4166_v5  ;;  %439 = vmatpush.msrb.mxu1 %v4168_v6  ;;  %6297 = vst [vmem:[#allocation44_spill] sm:$0xff] %v4194_v3 }
  0x3b   :  { %459 = vmatpush.msrb.mxu2 %v4173_v7  ;;  %479 = vmatpush.msrb.mxu3 %v4175_v8  ;;  %v164_v8 = vld [vmem:[%s5995_s0 + $0x30] sm:$0xff] }
  0x3c   :  { %3283 = vmatmul.msk.f32.gmra.mxu0 %vm175_vm0, %v163_v20  ;;  %3291 = vmatmul.msk.f32.gmra.mxu1 %vm175_vm0, %v163_v20 }
  0x3d   :  { %3299 = vmatmul.msk.f32.gmra.mxu2 %vm175_vm0, %v163_v20  ;;  %3307 = vmatmul.msk.f32.gmra.mxu3 %vm175_vm0, %v163_v20  ;;  %v165_v20 = vld [vmem:[%s5995_s0 + $0x38] sm:$0xff] }
  0x3e   :  { %420 = vmatpush.msrb.mxu0 %v4184_v34  ;;  %440 = vmatpush.msrb.mxu1 %v4186_v47 }
  0x3f   :  { %460 = vmatpush.msrb.mxu2 %v4192_v60  ;;  %480 = vmatpush.msrb.mxu3 %v4194_v3 }
  0x40   :  { %560 = vmatpush.msra.mxu0 %v3971_v9  ;;  %580 = vmatpush.msra.mxu1 %v3973_v10 }
  0x41   :  { %600 = vmatpush.msra.mxu2 %v3989_v15  ;;  %620 = vmatpush.msra.mxu3 %v3977_v11 }
  0x42   :  { %561 = vmatpush.msra.mxu0 %v3981_v12  ;;  %581 = vmatpush.msra.mxu1 %v3983_v13 }
  0x43   :  { %601 = vmatpush.msra.mxu2 %v3997_v18  ;;  %621 = vmatpush.msra.mxu3 %v3987_v14 }
  0x44   :  { %3284 = vmatmul.msk.f32.gmra.mxu0 %vm175_vm0, %v164_v8  ;;  %3292 = vmatmul.msk.f32.gmra.mxu1 %vm175_vm0, %v164_v8 }
  0x45   :  { %3300 = vmatmul.msk.f32.gmra.mxu2 %vm175_vm0, %v164_v8  ;;  %3308 = vmatmul.msk.f32.gmra.mxu3 %vm175_vm0, %v164_v8  ;;  %v6008_v8 = vmov 0.0  }
  0x46   :  { %562 = vmatpush.msra.mxu0 %v3992_v16  ;;  %582 = vmatpush.msra.mxu1 %v3994_v17 }
  0x47   :  { %602 = vmatpush.msra.mxu2 %v4008_v21  ;;  %622 = vmatpush.msra.mxu3 %v4001_v19 }
  0x48   :  { %563 = vmatpush.msra.mxu0 %v4012_v22  ;;  %583 = vmatpush.msra.mxu1 %v4014_v23 }
  0x49   :  { %603 = vmatpush.msra.mxu2 %v4022_v25  ;;  %623 = vmatpush.msra.mxu3 %v4020_v24 }
  0x4a   :  { %564 = vmatpush.msra.mxu0 %v4026_v26  ;;  %584 = vmatpush.msra.mxu1 %v4028_v27 }
  0x4b   :  { %604 = vmatpush.msra.mxu2 %v4034_v29  ;;  %624 = vmatpush.msra.mxu3 %v4032_v28 }
  0x4c   :  { %3285 = vmatmul.msk.f32.gmra.mxu0 %vm175_vm0, %v165_v20  ;;  %3293 = vmatmul.msk.f32.gmra.mxu1 %vm175_vm0, %v165_v20 }
  0x4d   :  { %3301 = vmatmul.msk.f32.gmra.mxu2 %vm175_vm0, %v165_v20  ;;  %3309 = vmatmul.msk.f32.gmra.mxu3 %vm175_vm0, %v165_v20  ;;  %v6298_v20 = vld [vmem:[#allocation35_spill] sm:$0xff] }
  0x4e   :  { %565 = vmatpush.msra.mxu0 %v4037_v30  ;;  %585 = vmatpush.msra.mxu1 %v4039_v31 }
  0x4f   :  { %605 = vmatpush.msra.mxu2 %v4046_v33  ;;  %625 = vmatpush.msra.mxu3 %v4044_v32 }
  0x50   :  { %566 = vmatpush.msra.mxu0 %v4055_v35  ;;  %586 = vmatpush.msra.mxu1 %v4057_v36 }
  0x51   :  { %606 = vmatpush.msra.mxu2 %v4065_v38  ;;  %626 = vmatpush.msra.mxu3 %v4063_v37 }
  0x52   :  { %567 = vmatpush.msra.mxu0 %v4069_v39  ;;  %587 = vmatpush.msra.mxu1 %v4071_v40 }
  0x53   :  { %607 = vmatpush.msra.mxu2 %v4077_v42  ;;  %627 = vmatpush.msra.mxu3 %v4075_v41 }
  0x54   :  { %421 = vmatmul.f32.vlgmr.msrb.gmra.mxu0 %v6008_v8  ;;  %441 = vmatmul.f32.vlgmr.msrb.gmra.mxu1 %v6008_v8 }
  0x55   :  { %461 = vmatmul.f32.vlgmr.msrb.gmra.mxu2 %v6008_v8  ;;  %481 = vmatmul.f32.vlgmr.msrb.gmra.mxu3 %v6008_v8  ;;  %v6299_v8 = vld [vmem:[#allocation40_spill] sm:$0xff] }
  0x56   :  { %568 = vmatpush.msra.mxu0 %v4080_v43  ;;  %588 = vmatpush.msra.mxu1 %v4082_v44 }
  0x57   :  { %608 = vmatpush.msra.mxu2 %v4089_v46  ;;  %628 = vmatpush.msra.mxu3 %v4087_v45 }
  0x58   :  { %569 = vmatpush.msra.mxu0 %v4098_v48  ;;  %589 = vmatpush.msra.mxu1 %v4100_v49 }
  0x59   :  { %609 = vmatpush.msra.mxu2 %v4108_v51  ;;  %629 = vmatpush.msra.mxu3 %v4106_v50 }
  0x5a   :  { %570 = vmatpush.msra.mxu0 %v4112_v52  ;;  %590 = vmatpush.msra.mxu1 %v4114_v53 }
  0x5b   :  { %610 = vmatpush.msra.mxu2 %v4120_v55  ;;  %630 = vmatpush.msra.mxu3 %v4118_v54 }
  0x5c   :  { %571 = vmatpush.msra.mxu0 %v4123_v56  ;;  %591 = vmatpush.msra.mxu1 %v4125_v57 }
  0x5d   :  { %611 = vmatpush.msra.mxu2 %v4132_v59  ;;  %631 = vmatpush.msra.mxu3 %v4130_v58 }
  0x5e   :  { %572 = vmatpush.msra.mxu0 %v4141_v61  ;;  %592 = vmatpush.msra.mxu1 %v4143_v62 }
  0x5f   :  { %612 = vmatpush.msra.mxu2 %v4151_v0  ;;  %632 = vmatpush.msra.mxu3 %v4149_v63 }
  0x60   :  { %573 = vmatpush.msra.mxu0 %v4155_v1  ;;  %593 = vmatpush.msra.mxu1 %v4157_v2 }
  0x61   :  { %613 = vmatpush.msra.mxu2 %v4163_v4  ;;  %633 = vmatpush.msra.mxu3 %v6298_v20 }
  0x62   :  { %574 = vmatpush.msra.mxu0 %v4166_v5  ;;  %594 = vmatpush.msra.mxu1 %v4168_v6 }
  0x63   :  { %614 = vmatpush.msra.mxu2 %v4173_v7  ;;  %634 = vmatpush.msra.mxu3 %v6299_v8 }
  0x64   :  { %575 = vmatpush.msra.mxu0 %v4184_v34  ;;  %595 = vmatpush.msra.mxu1 %v4186_v47 }
  0x65   :  { %615 = vmatpush.msra.mxu2 %v4192_v60  ;;  %635 = vmatpush.msra.mxu3 %v4194_v3 }
  0x66   :  { %716 = vmatpush.msrb.mxu0 %v3971_v9  ;;  %736 = vmatpush.msrb.mxu1 %v3973_v10 }
  0x67   :  { %756 = vmatpush.msrb.mxu2 %v3989_v15  ;;  %776 = vmatpush.msrb.mxu3 %v3977_v11 }
  0x68   :  { %717 = vmatpush.msrb.mxu0 %v3981_v12  ;;  %737 = vmatpush.msrb.mxu1 %v3983_v13 }
  0x69   :  { %757 = vmatpush.msrb.mxu2 %v3997_v18  ;;  %777 = vmatpush.msrb.mxu3 %v3987_v14 }
  0x6a   :  { %718 = vmatpush.msrb.mxu0 %v3992_v16  ;;  %738 = vmatpush.msrb.mxu1 %v3994_v17 }
  0x6b   :  { %758 = vmatpush.msrb.mxu2 %v4008_v21  ;;  %778 = vmatpush.msrb.mxu3 %v4001_v19 }
  0x6c   :  { %719 = vmatpush.msrb.mxu0 %v4012_v22  ;;  %739 = vmatpush.msrb.mxu1 %v4014_v23 }
  0x6d   :  { %759 = vmatpush.msrb.mxu2 %v4022_v25  ;;  %779 = vmatpush.msrb.mxu3 %v4020_v24 }
  0x6e   :  { %720 = vmatpush.msrb.mxu0 %v4026_v26  ;;  %740 = vmatpush.msrb.mxu1 %v4028_v27 }
  0x6f   :  { %760 = vmatpush.msrb.mxu2 %v4034_v29  ;;  %780 = vmatpush.msrb.mxu3 %v4032_v28 }
  0x70   :  { %721 = vmatpush.msrb.mxu0 %v4037_v30  ;;  %741 = vmatpush.msrb.mxu1 %v4039_v31 }
  0x71   :  { %761 = vmatpush.msrb.mxu2 %v4046_v33  ;;  %781 = vmatpush.msrb.mxu3 %v4044_v32 }
  0x72   :  { %722 = vmatpush.msrb.mxu0 %v4055_v35  ;;  %742 = vmatpush.msrb.mxu1 %v4057_v36 }
  0x73   :  { %762 = vmatpush.msrb.mxu2 %v4065_v38  ;;  %782 = vmatpush.msrb.mxu3 %v4063_v37 }
  0x74   :  { %723 = vmatpush.msrb.mxu0 %v4069_v39  ;;  %743 = vmatpush.msrb.mxu1 %v4071_v40 }
  0x75   :  { %763 = vmatpush.msrb.mxu2 %v4077_v42  ;;  %783 = vmatpush.msrb.mxu3 %v4075_v41 }
  0x76   :  { %724 = vmatpush.msrb.mxu0 %v4080_v43  ;;  %744 = vmatpush.msrb.mxu1 %v4082_v44 }
  0x77   :  { %764 = vmatpush.msrb.mxu2 %v4089_v46  ;;  %784 = vmatpush.msrb.mxu3 %v4087_v45 }
  0x78   :  { %725 = vmatpush.msrb.mxu0 %v4098_v48  ;;  %745 = vmatpush.msrb.mxu1 %v4100_v49 }
  0x79   :  { %765 = vmatpush.msrb.mxu2 %v4108_v51  ;;  %785 = vmatpush.msrb.mxu3 %v4106_v50 }
  0x7a   :  { %726 = vmatpush.msrb.mxu0 %v4112_v52  ;;  %746 = vmatpush.msrb.mxu1 %v4114_v53 }
  0x7b   :  { %766 = vmatpush.msrb.mxu2 %v4120_v55  ;;  %786 = vmatpush.msrb.mxu3 %v4118_v54 }
  0x7c   :  { %727 = vmatpush.msrb.mxu0 %v4123_v56  ;;  %747 = vmatpush.msrb.mxu1 %v4125_v57 }
  0x7d   :  { %767 = vmatpush.msrb.mxu2 %v4132_v59  ;;  %787 = vmatpush.msrb.mxu3 %v4130_v58 }
  0x7e   :  { %728 = vmatpush.msrb.mxu0 %v4141_v61  ;;  %748 = vmatpush.msrb.mxu1 %v4143_v62 }
  0x7f   :  { %768 = vmatpush.msrb.mxu2 %v4151_v0  ;;  %788 = vmatpush.msrb.mxu3 %v4149_v63 }
  0x80   :  { %729 = vmatpush.msrb.mxu0 %v4155_v1  ;;  %749 = vmatpush.msrb.mxu1 %v4157_v2 }
  0x81   :  { %769 = vmatpush.msrb.mxu2 %v4163_v4  ;;  %789 = vmatpush.msrb.mxu3 %v6298_v20 }
  0x82   :  { %730 = vmatpush.msrb.mxu0 %v4166_v5  ;;  %750 = vmatpush.msrb.mxu1 %v4168_v6 }
  0x83   :  { %770 = vmatpush.msrb.mxu2 %v4173_v7  ;;  %790 = vmatpush.msrb.mxu3 %v6299_v8 }
  0x84   :  { %731 = vmatpush.msrb.mxu0 %v4184_v34  ;;  %751 = vmatpush.msrb.mxu1 %v4186_v47 }
  0x85   :  { %771 = vmatpush.msrb.mxu2 %v4192_v60  ;;  %791 = vmatpush.msrb.mxu3 %v4194_v3 }
  0x91   :  { %v217_v2 = vpop.f32.mrf.mxu0  ;;  %v258_v4 = vpop.f32.mrf.mxu1 }
  0x98   :  { %v299_v1 = vpop.f32.mrf.mxu2  ;;  %v340_v20 = vpop.f32.mrf.mxu3 }
  0x99   :  { %v4348_v63 = vpop.f32.mrf.mxu0  ;;  %v4350_v5 = vpop.f32.mrf.mxu1 }
  0x9a   :  { %6300 = vst [vmem:[#allocation45_spill] sm:$0xff] %v4348_v63 }
  0x9b   :  { %6301 = vst [vmem:[#allocation46_spill] sm:$0xff] %v4350_v5 }
  0xa0   :  { %v4352_v6 = vpop.f32.mrf.mxu2  ;;  %v4354_v7 = vpop.f32.mrf.mxu3 }
  0xa1   :  { %6302 = vst [vmem:[#allocation47_spill] sm:$0xff] %v4352_v6  ;;  %v4356_v8 = vpop.f32.mrf.mxu0  ;;  %v4358_v34 = vpop.f32.mrf.mxu1 }
  0xa2   :  { %6303 = vst [vmem:[#allocation48_spill] sm:$0xff] %v4354_v7 }
  0xa3   :  { %6304 = vst [vmem:[#allocation49_spill] sm:$0xff] %v4356_v8 }
  0xa4   :  { %6305 = vst [vmem:[#allocation50_spill] sm:$0xff] %v4358_v34 }
  0xa8   :  { %v4360_v47 = vpop.f32.mrf.mxu2  ;;  %v4362_v60 = vpop.f32.mrf.mxu3 }
  0xa9   :  { %6306 = vst [vmem:[#allocation51_spill] sm:$0xff] %v4360_v47  ;;  %v4364_v3 = vpop.f32.mrf.mxu0  ;;  %v4366_v0 = vpop.f32.mrf.mxu1 }
  0xaa   :  { %6307 = vst [vmem:[#allocation52_spill] sm:$0xff] %v4362_v60 }
  0xab   :  { %6308 = vst [vmem:[#allocation53_spill] sm:$0xff] %v4364_v3 }
  0xac   :  { %6309 = vst [vmem:[#allocation54_spill] sm:$0xff] %v4366_v0 }
  0xb0   :  { %v4368_v62 = vpop.f32.mrf.mxu2  ;;  %v4370_v63 = vpop.f32.mrf.mxu3 }
  0xb1   :  { %6310 = vst [vmem:[#allocation55_spill] sm:$0xff] %v4368_v62  ;;  %v4372_v5 = vpop.f32.mrf.mxu0  ;;  %v4374_v6 = vpop.f32.mrf.mxu1 }
  0xb2   :  { %6311 = vst [vmem:[#allocation56_spill] sm:$0xff] %v4370_v63 }
  0xb3   :  { %6312 = vst [vmem:[#allocation57_spill] sm:$0xff] %v4372_v5 }
  0xb4   :  { %6313 = vst [vmem:[#allocation58_spill] sm:$0xff] %v4374_v6 }
  0xb8   :  { %v4376_v7 = vpop.f32.mrf.mxu3  ;;  %v4382_v47 = vpop.f32.mrf.mxu2 }
  0xb9   :  { %6314 = vst [vmem:[#allocation59_spill] sm:$0xff] %v4376_v7  ;;  %v4378_v8 = vpop.f32.mrf.mxu0  ;;  %v4380_v34 = vpop.f32.mrf.mxu1  ;;  %v157_v7 = vld [vmem:[%s5998_s3] sm:$0xf] }
  0xba   :  { %6315 = vst [vmem:[#allocation60_spill] sm:$0xff] %v4378_v8  ;;  %v4411_v59 = vperm.slane %v157_v7, 3 }
  0xbb   :  { %6316 = vst [vmem:[#allocation61_spill] sm:$0xff] %v4380_v34  ;;  %v4401_v34 = vperm.slane %v157_v7, 0 }
  0xbc   :  { %6317 = vst [vmem:[#allocation62_spill] sm:$0xff] %v4382_v47  ;;  %v4403_v47 = vperm.slane %v157_v7, 1  ;;  %v341_v57 = vadd.f32 %v340_v20, %v4411_v59 }
  0xbd   :  { %6325 = vst [vmem:[#allocation70_spill] sm:$0xff] %v4401_v34 }
  0xbe   :  { %6326 = vst [vmem:[#allocation71_spill] sm:$0xff] %v4403_v47 }
  0xbf   :  { %6329 = vst [vmem:[#allocation74_spill] sm:$0xff] %v4411_v59 }
  0xc0   :  { %v4384_v60 = vpop.f32.mrf.mxu3  ;;  %v4390_v62 = vpop.f32.mrf.mxu2 }
  0xc1   :  { %6318 = vst [vmem:[#allocation63_spill] sm:$0xff] %v4384_v60  ;;  %v4386_v3 = vpop.f32.mrf.mxu0  ;;  %v4388_v0 = vpop.f32.mrf.mxu1 }
  0xc2   :  { %6319 = vst [vmem:[#allocation64_spill] sm:$0xff] %v4386_v3  ;;  %v259_v3 = vadd.f32 %v258_v4, %v4403_v47 }
  0xc3   :  { %6320 = vst [vmem:[#allocation65_spill] sm:$0xff] %v4388_v0  ;;  %v218_v0 = vadd.f32 %v217_v2, %v4401_v34 }
  0xc4   :  { %6321 = vst [vmem:[#allocation66_spill] sm:$0xff] %v4390_v62 }
  0xc8   :  { %v4392_v63 = vpop.f32.mrf.mxu3  ;;  %v4405_v60 = vpop.f32.mrf.mxu2 }
  0xc9   :  { %6322 = vst [vmem:[#allocation67_spill] sm:$0xff] %v4392_v63  ;;  %v4397_v6 = vpop.f32.mrf.mxu0  ;;  %v4399_v8 = vpop.f32.mrf.mxu1 }
  0xca   :  { %6323 = vst [vmem:[#allocation68_spill] sm:$0xff] %v4397_v6 }
  0xcb   :  { %6324 = vst [vmem:[#allocation69_spill] sm:$0xff] %v4399_v8 }
  0xcc   :  { %6327 = vst [vmem:[#allocation72_spill] sm:$0xff] %v4405_v60 }
  0xd0   :  { %v4409_v62 = vpop.f32.mrf.mxu3  ;;  %v4414_v56 = vpop.f32.mrf.mxu2 }
  0xd1   :  { %6328 = vst [vmem:[#allocation73_spill] sm:$0xff] %v4409_v62  ;;  %v422_v63 = vpop.f32.mrf.mxu0  ;;  %v442_v5 = vpop.f32.mrf.mxu1 }
  0xd2   :  { %v485_v61 = vadd.f32 %v422_v63, %v218_v0  ;;  %v486_v58 = vadd.f32 %v442_v5, %v259_v3  ;;  %6330 = vst [vmem:[#allocation75_spill] sm:$0xff] %v4414_v56  ;;  %v4416_v63 = vperm.slane %v157_v7, 2 }
  0xd4   :  { %v3310_v6 = vmul.f32 -1.442695, %v485_v61  ;;  %v3311_v8 = vmul.f32 -1.442695, %v486_v58  ;;  %6331 = vst [vmem:[#allocation76_spill] sm:$0xff] %v4416_v63  ;;  %v300_v0 = vadd.f32 %v299_v1, %v4416_v63 }
  0xd6   :  { %3368 = vpow2.f32 %v3310_v6 }
  0xd7   :  { %3370 = vpow2.f32 %v3311_v8 }
  0xd8   :  { %v482_v60 = vpop.f32.mrf.mxu3  ;;  %v462_v61 = vpop.f32.mrf.mxu2 }
  0xd9   :  { %v488_v2 = vadd.f32 %v482_v60, %v341_v57  ;;  %v487_v6 = vadd.f32 %v462_v61, %v300_v0 }
  0xdb   :  { %v3312_v34 = vmul.f32 -1.442695, %v488_v2 }
  0xdc   :  { %v3369_v4 = vpop.eup %3368 }
  0xdd   :  { %v3371_v47 = vpop.eup %3370  ;;  %v492_v62 = vadd.f32 1.0, %v3369_v4  ;;  %3372 = vpow2.f32 %v3312_v34 }
  0xde   :  { %v511_v54 = vadd.f32 1.0, %v3371_v47 }
  0xdf   :  { %3374 = vrcp.f32 %v492_v62  ;;  %v504_v4 = vand.u32 2147483648, %v492_v62  ;;  %v502_v47 = vand.u32 2147483647, %v492_v62  ;;  %vm498_vm3 = vweird.f32 %v492_v62 }
  0xe0   :  { %3376 = vrcp.f32 %v511_v54  ;;  %v523_v34 = vand.u32 2147483648, %v511_v54  ;;  %v521_v59 = vand.u32 2147483647, %v511_v54  ;;  %vm517_vm4 = vweird.f32 %v511_v54 }
  0xe1   :  { %v505_v61 = vor.u32 1.1754944e-38, %v504_v4  ;;  %vm503_vm6 = vcmp.eq.f32.partialorder %v502_v47, 8.507059e+37 }
  0xe2   :  { %v524_v63 = vor.u32 1.1754944e-38, %v523_v34  ;;  %vm522_vm8 = vcmp.eq.f32.partialorder %v521_v59, 8.507059e+37 }
  0xe3   :  { %v3373_v58 = vpop.eup %3372 }
  0xe4   :  { %v531_v3 = vadd.f32 1.0, %v3373_v58 }
  0xe5   :  { %v3375_v5 = vpop.eup %3374 }
  0xe6   :  { %v3377_v8 = vpop.eup %3376  ;;  %v494_v20 = vmul.f32 %v3375_v5, %v492_v62  ;;  %3378 = vrcp.f32 %v531_v3  ;;  %vm499_vm1 = vweird.f32 %v3375_v5  ;;  %vm537_vm10 = vweird.f32 %v531_v3 }
  0xe7   :  { %v513_v57 = vmul.f32 %v3377_v8, %v511_v54  ;;  %3380 = vtanh.f32 %v487_v6  ;;  %vm518_vm2 = vweird.f32 %v3377_v8  ;;  %vm500_vm5 = vmor %vm498_vm3, %vm499_vm1  ;;  %v541_v62 = vand.u32 2147483647, %v531_v3 }
  0xe8   :  { %v495_v60 = vsub.f32 1.0, %v494_v20  ;;  %vm519_vm7 = vmor %vm517_vm4, %vm518_vm2 }
  0xe9   :  { %v514_v2 = vsub.f32 1.0, %v513_v57  ;;  %vm542_vm12 = vcmp.eq.f32.partialorder %v541_v62, 8.507059e+37 }
  0xea   :  { %v496_v7 = vmul.f32 %v3375_v5, %v495_v60 }
  0xeb   :  { %v515_v56 = vmul.f32 %v3377_v8, %v514_v2 }
  0xec   :  { %v3379_v55 = vpop.eup %3378  ;;  %v497_v1 = vadd.f32 %v3375_v5, %v496_v7 }
  0xed   :  { %v516_v58 = vadd.f32 %v3377_v8, %v515_v56  ;;  %v533_v0 = vmul.f32 %v3379_v55, %v531_v3  ;;  %v3381_v6 = vpop.eup %3380  ;;  %vm538_vm9 = vweird.f32 %v3379_v55  ;;  %v543_v56 = vand.u32 2147483648, %v531_v3 }
  0xee   :  { %v501_v20 = vsel %vm500_vm5, %v3375_v5, %v497_v1  ;;  %vm539_vm11 = vmor %vm537_vm10, %vm538_vm9 }
  0xef   :  { %v506_v57 = vsel %vm503_vm6, %v505_v61, %v501_v20  ;;  %v520_v60 = vsel %vm519_vm7, %v3377_v8, %v516_v58  ;;  %v534_v53 = vsub.f32 1.0, %v533_v0  ;;  %v544_v4 = vor.u32 1.1754944e-38, %v543_v56  ;;  %v6365_v20 = vld [vmem:[#allocation76_spill] sm:$0xff] }
  0xf0   :  { %v525_v2 = vsel %vm522_vm8, %v524_v63, %v520_v60  ;;  %v548_v52 = vmul.f32 %v3381_v6, %v506_v57  ;;  %v6366_v6 = vld [vmem:[#allocation47_spill] sm:$0xff] }
  0xf1   :  { %v547_v50 = vmul.f32 0.0, %v525_v2  ;;  %v535_v51 = vmul.f32 %v3379_v55, %v534_v53  ;;  %v303_v57 = vadd.f32 %v6366_v6, %v6365_v20 }
  0xf3   :  { %v4419_v7 = vadd.f32 %v548_v52, %v547_v50  ;;  %v536_v54 = vadd.f32 %v3379_v55, %v535_v51  ;;  %v6363_v50 = vld [vmem:[#allocation74_spill] sm:$0xff]  ;;  %v6364_v51 = vld [vmem:[#allocation48_spill] sm:$0xff] }
  0xf4   :  { %v344_v52 = vadd.f32 %v6364_v51, %v6363_v50 }
  0xf5   :  { %3382 = vtanh.f32 %v4419_v7  ;;  %v540_v5 = vsel %vm539_vm11, %v3379_v55, %v536_v54 }
  0xf6   :  { %v545_v59 = vsel %vm542_vm12, %v544_v4, %v540_v5 }
  0xfb   :  { %v3383_v8 = vpop.eup %3382 }
  0xfc   :  { %v4422_v34 = vmul.f32 %v3383_v8, %v545_v59 }
  0xfe   :  { %6332 = vst [vmem:[#allocation77_spill] sm:$0xff] %v4422_v34  ;;  %576 = vmatmul.f32.vlgmr.msra.gmra.mxu0 %v4422_v34  ;;  %596 = vmatmul.f32.vlgmr.msra.gmra.mxu1 %v4422_v34 }
  0xff   :  { %616 = vmatmul.f32.vlgmr.msra.gmra.mxu2 %v4422_v34  ;;  %636 = vmatmul.f32.vlgmr.msra.gmra.mxu3 %v4422_v34  ;;  %v4606_v34 = vld [vmem:[#allocation6 + $0xe0] sm:$0xff] }
 0x100   :  { %872 = vmatpush.msra.mxu0 %v3971_v9  ;;  %892 = vmatpush.msra.mxu1 %v3973_v10  ;;  %v6333_v9 = vld [vmem:[#allocation20_spill] sm:$0xff]  ;;  %v6334_v10 = vld [vmem:[#allocation19_spill] sm:$0xff] }
 0x101   :  { %912 = vmatpush.msra.mxu2 %v3989_v15  ;;  %932 = vmatpush.msra.mxu3 %v3977_v11  ;;  %v6335_v11 = vld [vmem:[#allocation21_spill] sm:$0xff] }
 0x102   :  { %873 = vmatpush.msra.mxu0 %v3981_v12  ;;  %893 = vmatpush.msra.mxu1 %v3983_v13  ;;  %v6336_v12 = vld [vmem:[#allocation22_spill] sm:$0xff]  ;;  %v6337_v13 = vld [vmem:[#allocation24_spill] sm:$0xff]  ;;  %v6339_v15 = vld [vmem:[#allocation25_spill] sm:$0xff] }
 0x103   :  { %913 = vmatpush.msra.mxu2 %v3997_v18  ;;  %933 = vmatpush.msra.mxu3 %v3987_v14  ;;  %v6338_v14 = vld [vmem:[#allocation23_spill] sm:$0xff] }
 0x104   :  { %874 = vmatpush.msra.mxu0 %v3992_v16  ;;  %894 = vmatpush.msra.mxu1 %v3994_v17  ;;  %v6340_v16 = vld [vmem:[#allocation26_spill] sm:$0xff]  ;;  %v6341_v17 = vld [vmem:[#allocation28_spill] sm:$0xff]  ;;  %v6342_v18 = vld [vmem:[#allocation27_spill] sm:$0xff] }
 0x105   :  { %914 = vmatpush.msra.mxu2 %v4008_v21  ;;  %934 = vmatpush.msra.mxu3 %v4001_v19  ;;  %v6343_v19 = vld [vmem:[#allocation29_spill] sm:$0xff]  ;;  %v6344_v21 = vld [vmem:[#allocation30_spill] sm:$0xff] }
 0x106   :  { %875 = vmatpush.msra.mxu0 %v4012_v22  ;;  %895 = vmatpush.msra.mxu1 %v4014_v23  ;;  %v6345_v22 = vld [vmem:[#allocation32_spill] sm:$0xff]  ;;  %v6346_v23 = vld [vmem:[#allocation31_spill] sm:$0xff] }
 0x107   :  { %915 = vmatpush.msra.mxu2 %v4022_v25  ;;  %935 = vmatpush.msra.mxu3 %v4020_v24  ;;  %v6347_v24 = vld [vmem:[#allocation33_spill] sm:$0xff]  ;;  %v6348_v25 = vld [vmem:[#allocation34_spill] sm:$0xff] }
 0x108   :  { %876 = vmatpush.msra.mxu0 %v4026_v26  ;;  %896 = vmatpush.msra.mxu1 %v4028_v27  ;;  %v6349_v26 = vld [vmem:[#allocation36_spill] sm:$0xff]  ;;  %v6350_v27 = vld [vmem:[#allocation35_spill] sm:$0xff] }
 0x109   :  { %916 = vmatpush.msra.mxu2 %v4034_v29  ;;  %936 = vmatpush.msra.mxu3 %v4032_v28  ;;  %v6351_v28 = vld [vmem:[#allocation37_spill] sm:$0xff]  ;;  %v6352_v29 = vld [vmem:[#allocation38_spill] sm:$0xff] }
 0x10a   :  { %877 = vmatpush.msra.mxu0 %v4037_v30  ;;  %897 = vmatpush.msra.mxu1 %v4039_v31  ;;  %v6353_v30 = vld [vmem:[#allocation39_spill] sm:$0xff]  ;;  %v6354_v31 = vld [vmem:[#allocation40_spill] sm:$0xff] }
 0x10b   :  { %917 = vmatpush.msra.mxu2 %v4046_v33  ;;  %937 = vmatpush.msra.mxu3 %v4044_v32  ;;  %v6355_v32 = vld [vmem:[#allocation41_spill] sm:$0xff]  ;;  %v6356_v33 = vld [vmem:[#allocation42_spill] sm:$0xff] }
 0x10c   :  { %878 = vmatpush.msra.mxu0 %v4055_v35  ;;  %898 = vmatpush.msra.mxu1 %v4057_v36  ;;  %v6357_v35 = vld [vmem:[#allocation43_spill] sm:$0xff]  ;;  %v6358_v36 = vld [vmem:[#allocation44_spill] sm:$0xff] }
 0x10d   :  { %918 = vmatpush.msra.mxu2 %v4065_v38  ;;  %938 = vmatpush.msra.mxu3 %v4063_v37  ;;  %v6359_v37 = vld [vmem:[#allocation70_spill] sm:$0xff]  ;;  %v6360_v38 = vld [vmem:[#allocation45_spill] sm:$0xff] }
 0x10e   :  { %879 = vmatpush.msra.mxu0 %v4069_v39  ;;  %899 = vmatpush.msra.mxu1 %v4071_v40  ;;  %v221_v39 = vadd.f32 %v6360_v38, %v6359_v37  ;;  %v6361_v40 = vld [vmem:[#allocation71_spill] sm:$0xff] }
 0x10f   :  { %919 = vmatpush.msra.mxu2 %v4077_v42  ;;  %939 = vmatpush.msra.mxu3 %v4075_v41  ;;  %v6362_v41 = vld [vmem:[#allocation46_spill] sm:$0xff] }
 0x110   :  { %880 = vmatpush.msra.mxu0 %v4080_v43  ;;  %900 = vmatpush.msra.mxu1 %v4082_v44  ;;  %v262_v42 = vadd.f32 %v6362_v41, %v6361_v40 }
 0x111   :  { %920 = vmatpush.msra.mxu2 %v4089_v46  ;;  %940 = vmatpush.msra.mxu3 %v4087_v45 }
 0x112   :  { %881 = vmatpush.msra.mxu0 %v4098_v48  ;;  %901 = vmatpush.msra.mxu1 %v4100_v49 }
 0x113   :  { %921 = vmatpush.msra.mxu2 %v6333_v9  ;;  %941 = vmatpush.msra.mxu3 %v6334_v10 }
 0x114   :  { %882 = vmatpush.msra.mxu0 %v6335_v11  ;;  %902 = vmatpush.msra.mxu1 %v6336_v12 }
 0x115   :  { %922 = vmatpush.msra.mxu2 %v6337_v13  ;;  %942 = vmatpush.msra.mxu3 %v6338_v14 }
 0x116   :  { %883 = vmatpush.msra.mxu0 %v6339_v15  ;;  %903 = vmatpush.msra.mxu1 %v6340_v16 }
 0x117   :  { %923 = vmatpush.msra.mxu2 %v6341_v17  ;;  %943 = vmatpush.msra.mxu3 %v6342_v18 }
 0x118   :  { %884 = vmatpush.msra.mxu0 %v6343_v19  ;;  %904 = vmatpush.msra.mxu1 %v6344_v21 }
 0x119   :  { %924 = vmatpush.msra.mxu2 %v6345_v22  ;;  %944 = vmatpush.msra.mxu3 %v6346_v23 }
 0x11a   :  { %885 = vmatpush.msra.mxu0 %v6347_v24  ;;  %905 = vmatpush.msra.mxu1 %v6348_v25 }
 0x11b   :  { %925 = vmatpush.msra.mxu2 %v6349_v26  ;;  %945 = vmatpush.msra.mxu3 %v6350_v27 }
 0x11c   :  { %886 = vmatpush.msra.mxu0 %v6351_v28  ;;  %906 = vmatpush.msra.mxu1 %v6352_v29 }
 0x11d   :  { %926 = vmatpush.msra.mxu2 %v6353_v30  ;;  %946 = vmatpush.msra.mxu3 %v6354_v31 }
 0x11e   :  { %887 = vmatpush.msra.mxu0 %v6355_v32  ;;  %907 = vmatpush.msra.mxu1 %v6356_v33 }
 0x11f   :  { %927 = vmatpush.msra.mxu2 %v6357_v35  ;;  %947 = vmatpush.msra.mxu3 %v6358_v36 }
 0x17b   :  { %v577_v43 = vpop.f32.mrf.mxu0  ;;  %v597_v44 = vpop.f32.mrf.mxu1 }
 0x17c   :  { %v640_v45 = vadd.f32 %v577_v43, %v221_v39  ;;  %v641_v46 = vadd.f32 %v597_v44, %v262_v42 }
 0x17e   :  { %v3313_v48 = vmul.f32 -1.442695, %v640_v45  ;;  %v3314_v49 = vmul.f32 -1.442695, %v641_v46 }
 0x180   :  { %3384 = vpow2.f32 %v3313_v48 }
 0x181   :  { %3386 = vpow2.f32 %v3314_v49 }
 0x182   :  { %v637_v53 = vpop.f32.mrf.mxu3  ;;  %v617_v58 = vpop.f32.mrf.mxu2 }
 0x183   :  { %v643_v55 = vadd.f32 %v637_v53, %v344_v52  ;;  %v642_v54 = vadd.f32 %v617_v58, %v303_v57 }
 0x185   :  { %v3315_v63 = vmul.f32 -1.442695, %v643_v55 }
 0x186   :  { %v3385_v3 = vpop.eup %3384 }
 0x187   :  { %v3387_v47 = vpop.eup %3386  ;;  %v647_v1 = vadd.f32 1.0, %v3385_v3  ;;  %3388 = vpow2.f32 %v3315_v63 }
 0x188   :  { %v666_v61 = vadd.f32 1.0, %v3387_v47 }
 0x189   :  { %3390 = vrcp.f32 %v647_v1  ;;  %v659_v59 = vand.u32 2147483648, %v647_v1  ;;  %v657_v41 = vand.u32 2147483647, %v647_v1  ;;  %vm653_vm15 = vweird.f32 %v647_v1 }
 0x18a   :  { %3392 = vrcp.f32 %v666_v61  ;;  %v678_v38 = vand.u32 2147483648, %v666_v61  ;;  %v676_v43 = vand.u32 2147483647, %v666_v61  ;;  %vm672_vm0 = vweird.f32 %v666_v61 }
 0x18b   :  { %v660_v46 = vor.u32 1.1754944e-38, %v659_v59  ;;  %vm658_vm3 = vcmp.eq.f32.partialorder %v657_v41, 8.507059e+37  ;;  %v4519_v59 = vld [vmem:[#allocation6 + $0x1f8] sm:$0xff]  ;;  %v4528_v41 = vld [vmem:[#allocation6 + $0x1d0] sm:$0xff] }
 0x18c   :  { %v679_v51 = vor.u32 1.1754944e-38, %v678_v38  ;;  %vm677_vm4 = vcmp.eq.f32.partialorder %v676_v43, 8.507059e+37  ;;  %v4522_v38 = vld [vmem:[#allocation6 + $0x1c0] sm:$0xff] }
 0x18d   :  { %v3389_v0 = vpop.eup %3388  ;;  %v4534_v43 = vld [vmem:[#allocation6 + $0x1a0] sm:$0xff] }
 0x18e   :  { %v686_v60 = vadd.f32 1.0, %v3389_v0 }
 0x18f   :  { %v3391_v2 = vpop.eup %3390 }
 0x190   :  { %v3393_v56 = vpop.eup %3392  ;;  %v649_v62 = vmul.f32 %v3391_v2, %v647_v1  ;;  %3394 = vrcp.f32 %v686_v60  ;;  %vm654_vm13 = vweird.f32 %v3391_v2  ;;  %v698_v57 = vand.u32 2147483648, %v686_v60 }
 0x191   :  { %v668_v5 = vmul.f32 %v3393_v56, %v666_v61  ;;  %3396 = vtanh.f32 %v642_v54  ;;  %vm673_vm14 = vweird.f32 %v3393_v56  ;;  %vm655_vm1 = vmor %vm653_vm15, %vm654_vm13  ;;  %vm692_vm6 = vweird.f32 %v686_v60 }
 0x192   :  { %v650_v4 = vsub.f32 1.0, %v649_v62  ;;  %vm674_vm2 = vmor %vm672_vm0, %vm673_vm14  ;;  %v699_v62 = vor.u32 1.1754944e-38, %v698_v57  ;;  %v4585_v57 = vld [vmem:[#allocation6 + $0x128] sm:$0xff] }
 0x193   :  { %v669_v8 = vsub.f32 1.0, %v668_v5 }
 0x194   :  { %v651_v39 = vmul.f32 %v3391_v2, %v650_v4 }
 0x195   :  { %v670_v42 = vmul.f32 %v3393_v56, %v669_v8  ;;  %v4516_v8 = vld [vmem:[#allocation6 + $0x1f0] sm:$0xff] }
 0x196   :  { %v3395_v44 = vpop.eup %3394  ;;  %v652_v45 = vadd.f32 %v3391_v2, %v651_v39  ;;  %v4525_v39 = vld [vmem:[#allocation6 + $0x1c8] sm:$0xff] }
 0x197   :  { %v671_v48 = vadd.f32 %v3393_v56, %v670_v42  ;;  %v688_v49 = vmul.f32 %v3395_v44, %v686_v60  ;;  %v3397_v53 = vpop.eup %3396  ;;  %vm693_vm5 = vweird.f32 %v3395_v44  ;;  %v4531_v42 = vld [vmem:[#allocation6 + $0x1d8] sm:$0xff] }
 0x198   :  { %v656_v52 = vsel %vm655_vm1, %v3391_v2, %v652_v45  ;;  %v696_v2 = vand.u32 2147483647, %v686_v60  ;;  %vm694_vm7 = vmor %vm692_vm6, %vm693_vm5  ;;  %v4513_v60 = vld [vmem:[#allocation6 + $0x1e8] sm:$0xff]  ;;  %v4540_v45 = vld [vmem:[#allocation6 + $0x1b0] sm:$0xff] }
 0x199   :  { %v661_v55 = vsel %vm658_vm3, %v660_v46, %v656_v52  ;;  %v675_v63 = vsel %vm674_vm2, %v3393_v56, %v671_v48  ;;  %v689_v3 = vsub.f32 1.0, %v688_v49  ;;  %v4543_v46 = vld [vmem:[#allocation6 + $0x1b8] sm:$0xff]  ;;  %v4546_v48 = vld [vmem:[#allocation6 + $0x180] sm:$0xff]  ;;  %v4549_v49 = vld [vmem:[#allocation6 + $0x188] sm:$0xff] }
 0x19a   :  { %v680_v47 = vsel %vm677_vm4, %v679_v51, %v675_v63  ;;  %v703_v58 = vmul.f32 %v3397_v53, %v661_v55  ;;  %vm697_vm8 = vcmp.eq.f32.partialorder %v696_v2, 8.507059e+37  ;;  %v4552_v51 = vld [vmem:[#allocation6 + $0x190] sm:$0xff]  ;;  %v4555_v52 = vld [vmem:[#allocation6 + $0x198] sm:$0xff]  ;;  %v4558_v53 = vld [vmem:[#allocation6 + $0x160] sm:$0xff] }
 0x19b   :  { %v702_v0 = vmul.f32 %v680_v47, %v4419_v7  ;;  %v690_v6 = vmul.f32 %v3395_v44, %v689_v3  ;;  %v4510_v7 = vld [vmem:[#allocation6 + $0x1e0] sm:$0xff]  ;;  %v4561_v55 = vld [vmem:[#allocation6 + $0x168] sm:$0xff]  ;;  %v4564_v63 = vld [vmem:[#allocation6 + $0x170] sm:$0xff] }
 0x19c   :  { %v4567_v3 = vld [vmem:[#allocation6 + $0x178] sm:$0xff]  ;;  %v4570_v47 = vld [vmem:[#allocation6 + $0x140] sm:$0xff]  ;;  %v4588_v2 = vld [vmem:[#allocation6 + $0x130] sm:$0xff] }
 0x19d   :  { %v4501_v1 = vadd.f32 %v703_v58, %v702_v0  ;;  %v691_v61 = vadd.f32 %v3395_v44, %v690_v6  ;;  %v4573_v58 = vld [vmem:[#allocation6 + $0x148] sm:$0xff]  ;;  %v4576_v0 = vld [vmem:[#allocation6 + $0x150] sm:$0xff]  ;;  %v4579_v6 = vld [vmem:[#allocation6 + $0x158] sm:$0xff] }
 0x19f   :  { %3398 = vtanh.f32 %v4501_v1  ;;  %v695_v54 = vsel %vm694_vm7, %v3395_v44, %v691_v61  ;;  %v4537_v44 = vld [vmem:[#allocation6 + $0x1a8] sm:$0xff]  ;;  %v4582_v61 = vld [vmem:[#allocation6 + $0x120] sm:$0xff] }
 0x1a0   :  { %v700_v5 = vsel %vm697_vm8, %v699_v62, %v695_v54  ;;  %v4591_v54 = vld [vmem:[#allocation6 + $0x138] sm:$0xff]  ;;  %v4594_v62 = vld [vmem:[#allocation6 + $0x100] sm:$0xff] }
 0x1a1   :  { %6368 = vst [vmem:[#allocation19_spill] sm:$0xff] %v4591_v54 }
 0x1a2   :  { %6369 = vst [vmem:[#allocation21_spill] sm:$0xff] %v4594_v62 }
 0x1a5   :  { %v3399_v56 = vpop.eup %3398 }
 0x1a6   :  { %v4504_v4 = vmul.f32 %v3399_v56, %v700_v5  ;;  %v4597_v56 = vld [vmem:[#allocation6 + $0x108] sm:$0xff]  ;;  %v4600_v5 = vld [vmem:[#allocation6 + $0x110] sm:$0xff] }
 0x1a7   :  { %6370 = vst [vmem:[#allocation22_spill] sm:$0xff] %v4597_v56 }
 0x1a8   :  { %6367 = vst [vmem:[#allocation20_spill] sm:$0xff] %v4504_v4  ;;  %732 = vmatmul.f32.vlgmr.msrb.gmra.mxu0 %v4504_v4  ;;  %752 = vmatmul.f32.vlgmr.msrb.gmra.mxu1 %v4504_v4 }
 0x1a9   :  { %772 = vmatmul.f32.vlgmr.msrb.gmra.mxu2 %v4504_v4  ;;  %792 = vmatmul.f32.vlgmr.msrb.gmra.mxu3 %v4504_v4  ;;  %6371 = vst [vmem:[#allocation24_spill] sm:$0xff] %v4600_v5  ;;  %v4603_v4 = vld [vmem:[#allocation6 + $0x118] sm:$0xff] }
 0x1aa   :  { %1028 = vmatpush.msrb.mxu0 %v4510_v7  ;;  %1048 = vmatpush.msrb.mxu1 %v4513_v60  ;;  %6372 = vst [vmem:[#allocation23_spill] sm:$0xff] %v4603_v4 }
 0x1ab   :  { %1068 = vmatpush.msrb.mxu2 %v4516_v8  ;;  %1088 = vmatpush.msrb.mxu3 %v4519_v59 }
 0x1ac   :  { %1029 = vmatpush.msrb.mxu0 %v4522_v38  ;;  %1049 = vmatpush.msrb.mxu1 %v4525_v39 }
 0x1ad   :  { %1069 = vmatpush.msrb.mxu2 %v4528_v41  ;;  %1089 = vmatpush.msrb.mxu3 %v4531_v42 }
 0x1ae   :  { %1030 = vmatpush.msrb.mxu0 %v4534_v43  ;;  %1050 = vmatpush.msrb.mxu1 %v4537_v44 }
 0x1af   :  { %1070 = vmatpush.msrb.mxu2 %v4540_v45  ;;  %1090 = vmatpush.msrb.mxu3 %v4543_v46 }
 0x1b0   :  { %1031 = vmatpush.msrb.mxu0 %v4546_v48  ;;  %1051 = vmatpush.msrb.mxu1 %v4549_v49 }
 0x1b1   :  { %1071 = vmatpush.msrb.mxu2 %v4552_v51  ;;  %1091 = vmatpush.msrb.mxu3 %v4555_v52 }
 0x1b2   :  { %1032 = vmatpush.msrb.mxu0 %v4558_v53  ;;  %1052 = vmatpush.msrb.mxu1 %v4561_v55 }
 0x1b3   :  { %1072 = vmatpush.msrb.mxu2 %v4564_v63  ;;  %1092 = vmatpush.msrb.mxu3 %v4567_v3 }
 0x1b4   :  { %1033 = vmatpush.msrb.mxu0 %v4570_v47  ;;  %1053 = vmatpush.msrb.mxu1 %v4573_v58 }
 0x1b5   :  { %1073 = vmatpush.msrb.mxu2 %v4576_v0  ;;  %1093 = vmatpush.msrb.mxu3 %v4579_v6 }
 0x1b6   :  { %1034 = vmatpush.msrb.mxu0 %v4582_v61  ;;  %1054 = vmatpush.msrb.mxu1 %v4585_v57 }
 0x1b7   :  { %1074 = vmatpush.msrb.mxu2 %v4588_v2  ;;  %1094 = vmatpush.msrb.mxu3 %v4591_v54  ;;  %v4609_v54 = vld [vmem:[#allocation6 + $0xe8] sm:$0xff] }
 0x1b8   :  { %1035 = vmatpush.msrb.mxu0 %v4594_v62  ;;  %1055 = vmatpush.msrb.mxu1 %v4597_v56  ;;  %v4612_v62 = vld [vmem:[#allocation6 + $0xf0] sm:$0xff]  ;;  %v4615_v56 = vld [vmem:[#allocation6 + $0xf8] sm:$0xff] }
 0x1b9   :  { %1075 = vmatpush.msrb.mxu2 %v4600_v5  ;;  %1095 = vmatpush.msrb.mxu3 %v4603_v4  ;;  %v4618_v5 = vld [vmem:[#allocation6 + $0xc0] sm:$0xff]  ;;  %v4621_v4 = vld [vmem:[#allocation6 + $0xc8] sm:$0xff] }
 0x1ba   :  { %1036 = vmatpush.msrb.mxu0 %v4606_v34  ;;  %1056 = vmatpush.msrb.mxu1 %v4609_v54 }
 0x1bb   :  { %1076 = vmatpush.msrb.mxu2 %v4612_v62  ;;  %1096 = vmatpush.msrb.mxu3 %v4615_v56 }
 0x1bc   :  { %1037 = vmatpush.msrb.mxu0 %v4618_v5  ;;  %1057 = vmatpush.msrb.mxu1 %v4621_v4 }
 0x1bd   :  { %1077 = vmatpush.msrb.mxu2 %v6333_v9  ;;  %1097 = vmatpush.msrb.mxu3 %v6334_v10  ;;  %v6373_v9 = vld [vmem:[#allocation49_spill] sm:$0xff] }
 0x1be   :  { %1038 = vmatpush.msrb.mxu0 %v6335_v11  ;;  %1058 = vmatpush.msrb.mxu1 %v6336_v12  ;;  %v224_v10 = vadd.f32 %v6373_v9, %v6359_v37  ;;  %v6374_v11 = vld [vmem:[#allocation50_spill] sm:$0xff] }
 0x1bf   :  { %1078 = vmatpush.msrb.mxu2 %v6337_v13  ;;  %1098 = vmatpush.msrb.mxu3 %v6338_v14  ;;  %v265_v12 = vadd.f32 %v6374_v11, %v6361_v40 }
 0x1c0   :  { %1039 = vmatpush.msrb.mxu0 %v6339_v15  ;;  %1059 = vmatpush.msrb.mxu1 %v6340_v16 }
 0x1c1   :  { %1079 = vmatpush.msrb.mxu2 %v6341_v17  ;;  %1099 = vmatpush.msrb.mxu3 %v6342_v18 }
 0x1c2   :  { %1040 = vmatpush.msrb.mxu0 %v6343_v19  ;;  %1060 = vmatpush.msrb.mxu1 %v6344_v21  ;;  %v6375_v19 = vld [vmem:[#allocation52_spill] sm:$0xff] }
 0x1c3   :  { %1080 = vmatpush.msrb.mxu2 %v6345_v22  ;;  %1100 = vmatpush.msrb.mxu3 %v6346_v23  ;;  %v347_v21 = vadd.f32 %v6375_v19, %v6363_v50 }
 0x1c4   :  { %1041 = vmatpush.msrb.mxu0 %v6347_v24  ;;  %1061 = vmatpush.msrb.mxu1 %v6348_v25 }
 0x1c5   :  { %1081 = vmatpush.msrb.mxu2 %v6349_v26  ;;  %1101 = vmatpush.msrb.mxu3 %v6350_v27 }
 0x1c6   :  { %1042 = vmatpush.msrb.mxu0 %v6351_v28  ;;  %1062 = vmatpush.msrb.mxu1 %v6352_v29 }
 0x1c7   :  { %1082 = vmatpush.msrb.mxu2 %v6353_v30  ;;  %1102 = vmatpush.msrb.mxu3 %v6354_v31  ;;  %v6376_v31 = vld [vmem:[#allocation51_spill] sm:$0xff] }
 0x1c8   :  { %1043 = vmatpush.msrb.mxu0 %v6355_v32  ;;  %1063 = vmatpush.msrb.mxu1 %v6356_v33  ;;  %v306_v32 = vadd.f32 %v6376_v31, %v6365_v20 }
 0x1c9   :  { %1083 = vmatpush.msrb.mxu2 %v6357_v35  ;;  %1103 = vmatpush.msrb.mxu3 %v6358_v36 }
 0x225   :  { %v733_v13 = vpop.f32.mrf.mxu0  ;;  %v753_v14 = vpop.f32.mrf.mxu1 }
 0x226   :  { %v796_v15 = vadd.f32 %v733_v13, %v224_v10  ;;  %v797_v16 = vadd.f32 %v753_v14, %v265_v12 }
 0x228   :  { %v3316_v17 = vmul.f32 -1.442695, %v796_v15  ;;  %v3317_v18 = vmul.f32 -1.442695, %v797_v16 }
 0x22a   :  { %3400 = vpow2.f32 %v3316_v17 }
 0x22b   :  { %3402 = vpow2.f32 %v3317_v18 }
 0x22c   :  { %v793_v22 = vpop.f32.mrf.mxu3  ;;  %v773_v29 = vpop.f32.mrf.mxu2 }
 0x22d   :  { %v799_v23 = vadd.f32 %v793_v22, %v347_v21  ;;  %v798_v36 = vadd.f32 %v773_v29, %v306_v32 }
 0x22f   :  { %v3318_v24 = vmul.f32 -1.442695, %v799_v23 }
 0x230   :  { %v3401_v25 = vpop.eup %3400 }
 0x231   :  { %v3403_v26 = vpop.eup %3402  ;;  %v803_v27 = vadd.f32 1.0, %v3401_v25  ;;  %3404 = vpow2.f32 %v3318_v24 }
 0x232   :  { %v822_v28 = vadd.f32 1.0, %v3403_v26 }
 0x233   :  { %3406 = vrcp.f32 %v803_v27  ;;  %v815_v14 = vand.u32 2147483648, %v803_v27  ;;  %v813_v17 = vand.u32 2147483647, %v803_v27  ;;  %vm809_vm11 = vweird.f32 %v803_v27 }
 0x234   :  { %3408 = vrcp.f32 %v822_v28  ;;  %v834_v15 = vand.u32 2147483648, %v822_v28  ;;  %v832_v19 = vand.u32 2147483647, %v822_v28  ;;  %vm828_vm12 = vweird.f32 %v822_v28 }
 0x235   :  { %v816_v23 = vor.u32 1.1754944e-38, %v815_v14  ;;  %vm814_vm15 = vcmp.eq.f32.partialorder %v813_v17, 8.507059e+37 }
 0x236   :  { %v835_v26 = vor.u32 1.1754944e-38, %v834_v15  ;;  %vm833_vm0 = vcmp.eq.f32.partialorder %v832_v19, 8.507059e+37  ;;  %v6380_v19 = vld [vmem:[#allocation22_spill] sm:$0xff] }
 0x237   :  { %v3405_v30 = vpop.eup %3404 }
 0x238   :  { %v842_v33 = vadd.f32 1.0, %v3405_v30 }
 0x239   :  { %v3407_v35 = vpop.eup %3406 }
 0x23a   :  { %v3409_v9 = vpop.eup %3408  ;;  %v805_v10 = vmul.f32 %v3407_v35, %v803_v27  ;;  %3410 = vrcp.f32 %v842_v33  ;;  %vm810_vm9 = vweird.f32 %v3407_v35  ;;  %v854_v14 = vand.u32 2147483648, %v842_v33 }
 0x23b   :  { %v824_v11 = vmul.f32 %v3409_v9, %v822_v28  ;;  %3412 = vtanh.f32 %v798_v36  ;;  %vm829_vm10 = vweird.f32 %v3409_v9  ;;  %vm811_vm13 = vmor %vm809_vm11, %vm810_vm9  ;;  %vm848_vm2 = vweird.f32 %v842_v33 }
 0x23c   :  { %v806_v12 = vsub.f32 1.0, %v805_v10  ;;  %vm830_vm14 = vmor %vm828_vm12, %vm829_vm10 }
 0x23d   :  { %v825_v13 = vsub.f32 1.0, %v824_v11 }
 0x23e   :  { %v807_v16 = vmul.f32 %v3407_v35, %v806_v12 }
 0x23f   :  { %v826_v18 = vmul.f32 %v3409_v9, %v825_v13 }
 0x240   :  { %v3411_v21 = vpop.eup %3410  ;;  %v808_v22 = vadd.f32 %v3407_v35, %v807_v16  ;;  %v855_v16 = vor.u32 1.1754944e-38, %v854_v14  ;;  %v4748_v14 = vld [vmem:[#allocation6 + $0x40] sm:$0xff] }
 0x241   :  { %v827_v24 = vadd.f32 %v3409_v9, %v826_v18  ;;  %v844_v25 = vmul.f32 %v3411_v21, %v842_v33  ;;  %v3413_v30 = vpop.eup %3412  ;;  %vm849_vm1 = vweird.f32 %v3411_v21  ;;  %6397 = vst [vmem:[#allocation40_spill] sm:$0xff] %v4748_v14 }
 0x242   :  { %v812_v29 = vsel %vm811_vm13, %v3407_v35, %v808_v22  ;;  %v852_v35 = vand.u32 2147483647, %v842_v33  ;;  %vm850_vm3 = vmor %vm848_vm2, %vm849_vm1  ;;  %v6379_v33 = vld [vmem:[#allocation21_spill] sm:$0xff]  ;;  %v6382_v22 = vld [vmem:[#allocation23_spill] sm:$0xff] }
 0x243   :  { %v817_v31 = vsel %vm814_vm15, %v816_v23, %v812_v29  ;;  %v831_v32 = vsel %vm830_vm14, %v3409_v9, %v827_v24  ;;  %v845_v36 = vsub.f32 1.0, %v844_v25  ;;  %v4706_v23 = vld [vmem:[#allocation6 + $0xd0] sm:$0xff]  ;;  %v4709_v24 = vld [vmem:[#allocation6 + $0xd8] sm:$0xff]  ;;  %v4712_v25 = vld [vmem:[#allocation6 + $0xa0] sm:$0xff] }
 0x244   :  { %v836_v10 = vsel %vm833_vm0, %v835_v26, %v831_v32  ;;  %v859_v11 = vmul.f32 %v3413_v30, %v817_v31  ;;  %vm853_vm4 = vcmp.eq.f32.partialorder %v852_v35, 8.507059e+37  ;;  %6383 = vst [vmem:[#allocation26_spill] sm:$0xff] %v4706_v23  ;;  %v4715_v26 = vld [vmem:[#allocation6 + $0xa8] sm:$0xff]  ;;  %v4718_v29 = vld [vmem:[#allocation6 + $0xb0] sm:$0xff]  ;;  %v4721_v30 = vld [vmem:[#allocation6 + $0xb8] sm:$0xff] }
 0x245   :  { %v858_v12 = vmul.f32 %v836_v10, %v4501_v1  ;;  %v846_v13 = vmul.f32 %v3411_v21, %v845_v36  ;;  %v6378_v1 = vld [vmem:[#allocation19_spill] sm:$0xff]  ;;  %6384 = vst [vmem:[#allocation28_spill] sm:$0xff] %v4709_v24  ;;  %v4727_v32 = vld [vmem:[#allocation6 + $0x88] sm:$0xff]  ;;  %v4730_v36 = vld [vmem:[#allocation6 + $0x90] sm:$0xff] }
 0x246   :  { %6385 = vst [vmem:[#allocation27_spill] sm:$0xff] %v4712_v25  ;;  %v4724_v31 = vld [vmem:[#allocation6 + $0x80] sm:$0xff]  ;;  %v4733_v10 = vld [vmem:[#allocation6 + $0x98] sm:$0xff]  ;;  %v4751_v35 = vld [vmem:[#allocation6 + $0x48] sm:$0xff] }
 0x247   :  { %v4659_v27 = vadd.f32 %v859_v11, %v858_v12  ;;  %v847_v28 = vadd.f32 %v3411_v21, %v846_v13  ;;  %6386 = vst [vmem:[#allocation29_spill] sm:$0xff] %v4715_v26  ;;  %v4736_v11 = vld [vmem:[#allocation6 + $0x60] sm:$0xff]  ;;  %v4739_v12 = vld [vmem:[#allocation6 + $0x68] sm:$0xff]  ;;  %v4742_v13 = vld [vmem:[#allocation6 + $0x70] sm:$0xff] }
 0x248   :  { %6387 = vst [vmem:[#allocation30_spill] sm:$0xff] %v4718_v29 }
 0x249   :  { %3414 = vtanh.f32 %v4659_v27  ;;  %v851_v15 = vsel %vm850_vm3, %v3411_v21, %v847_v28  ;;  %v6381_v21 = vld [vmem:[#allocation24_spill] sm:$0xff]  ;;  %6388 = vst [vmem:[#allocation32_spill] sm:$0xff] %v4721_v30  ;;  %v4745_v28 = vld [vmem:[#allocation6 + $0x78] sm:$0xff] }
 0x24a   :  { %v856_v17 = vsel %vm853_vm4, %v855_v16, %v851_v15  ;;  %6389 = vst [vmem:[#allocation31_spill] sm:$0xff] %v4724_v31  ;;  %v4754_v15 = vld [vmem:[#allocation6 + $0x50] sm:$0xff]  ;;  %v4757_v16 = vld [vmem:[#allocation6 + $0x58] sm:$0xff] }
 0x24b   :  { %6390 = vst [vmem:[#allocation33_spill] sm:$0xff] %v4727_v32 }
 0x24c   :  { %6391 = vst [vmem:[#allocation34_spill] sm:$0xff] %v4730_v36 }
 0x24d   :  { %6392 = vst [vmem:[#allocation36_spill] sm:$0xff] %v4733_v10 }
 0x24e   :  { %6393 = vst [vmem:[#allocation35_spill] sm:$0xff] %v4736_v11 }
 0x24f   :  { %v3415_v9 = vpop.eup %3414  ;;  %6394 = vst [vmem:[#allocation37_spill] sm:$0xff] %v4739_v12 }
 0x250   :  { %v4662_v18 = vmul.f32 %v3415_v9, %v856_v17  ;;  %6395 = vst [vmem:[#allocation38_spill] sm:$0xff] %v4742_v13  ;;  %v4760_v9 = vld [vmem:[#allocation6 + $0x20] sm:$0xff]  ;;  %v4763_v17 = vld [vmem:[#allocation6 + $0x28] sm:$0xff] }
 0x251   :  { %6396 = vst [vmem:[#allocation39_spill] sm:$0xff] %v4745_v28 }
 0x252   :  { %6377 = vst [vmem:[#allocation25_spill] sm:$0xff] %v4662_v18  ;;  %888 = vmatmul.f32.vlgmr.msra.gmra.mxu0 %v4662_v18  ;;  %908 = vmatmul.f32.vlgmr.msra.gmra.mxu1 %v4662_v18 }
 0x253   :  { %928 = vmatmul.f32.vlgmr.msra.gmra.mxu2 %v4662_v18  ;;  %948 = vmatmul.f32.vlgmr.msra.gmra.mxu3 %v4662_v18  ;;  %6398 = vst [vmem:[#allocation41_spill] sm:$0xff] %v4751_v35  ;;  %v4766_v18 = vld [vmem:[#allocation6 + $0x30] sm:$0xff] }
 0x254   :  { %1184 = vmatpush.msra.mxu0 %v4510_v7  ;;  %1204 = vmatpush.msra.mxu1 %v4513_v60  ;;  %6399 = vst [vmem:[#allocation42_spill] sm:$0xff] %v4754_v15 }
 0x255   :  { %1224 = vmatpush.msra.mxu2 %v4516_v8  ;;  %1244 = vmatpush.msra.mxu3 %v4519_v59  ;;  %6400 = vst [vmem:[#allocation43_spill] sm:$0xff] %v4757_v16 }
 0x256   :  { %1185 = vmatpush.msra.mxu0 %v4522_v38  ;;  %1205 = vmatpush.msra.mxu1 %v4525_v39  ;;  %6401 = vst [vmem:[#allocation44_spill] sm:$0xff] %v4760_v9 }
 0x257   :  { %1225 = vmatpush.msra.mxu2 %v4528_v41  ;;  %1245 = vmatpush.msra.mxu3 %v4531_v42  ;;  %6402 = vst [vmem:[#allocation45_spill] sm:$0xff] %v4763_v17 }
 0x258   :  { %1186 = vmatpush.msra.mxu0 %v4534_v43  ;;  %1206 = vmatpush.msra.mxu1 %v4537_v44  ;;  %6403 = vst [vmem:[#allocation46_spill] sm:$0xff] %v4766_v18 }
 0x259   :  { %1226 = vmatpush.msra.mxu2 %v4540_v45  ;;  %1246 = vmatpush.msra.mxu3 %v4543_v46 }
 0x25a   :  { %1187 = vmatpush.msra.mxu0 %v4546_v48  ;;  %1207 = vmatpush.msra.mxu1 %v4549_v49 }
 0x25b   :  { %1227 = vmatpush.msra.mxu2 %v4552_v51  ;;  %1247 = vmatpush.msra.mxu3 %v4555_v52 }
 0x25c   :  { %1188 = vmatpush.msra.mxu0 %v4558_v53  ;;  %1208 = vmatpush.msra.mxu1 %v4561_v55 }
 0x25d   :  { %1228 = vmatpush.msra.mxu2 %v4564_v63  ;;  %1248 = vmatpush.msra.mxu3 %v4567_v3 }
 0x25e   :  { %1189 = vmatpush.msra.mxu0 %v4570_v47  ;;  %1209 = vmatpush.msra.mxu1 %v4573_v58 }
 0x25f   :  { %1229 = vmatpush.msra.mxu2 %v4576_v0  ;;  %1249 = vmatpush.msra.mxu3 %v4579_v6 }
 0x260   :  { %1190 = vmatpush.msra.mxu0 %v4582_v61  ;;  %1210 = vmatpush.msra.mxu1 %v4585_v57 }
 0x261   :  { %1230 = vmatpush.msra.mxu2 %v4588_v2  ;;  %1250 = vmatpush.msra.mxu3 %v6378_v1 }
 0x262   :  { %1191 = vmatpush.msra.mxu0 %v6379_v33  ;;  %1211 = vmatpush.msra.mxu1 %v6380_v19 }
 0x263   :  { %1231 = vmatpush.msra.mxu2 %v6381_v21  ;;  %1251 = vmatpush.msra.mxu3 %v6382_v22 }
 0x264   :  { %1192 = vmatpush.msra.mxu0 %v4606_v34  ;;  %1212 = vmatpush.msra.mxu1 %v4609_v54 }
 0x265   :  { %1232 = vmatpush.msra.mxu2 %v4612_v62  ;;  %1252 = vmatpush.msra.mxu3 %v4615_v56 }
 0x266   :  { %1193 = vmatpush.msra.mxu0 %v4618_v5  ;;  %1213 = vmatpush.msra.mxu1 %v4621_v4 }
 0x267   :  { %1233 = vmatpush.msra.mxu2 %v4706_v23  ;;  %1253 = vmatpush.msra.mxu3 %v4709_v24 }
 0x268   :  { %1194 = vmatpush.msra.mxu0 %v4712_v25  ;;  %1214 = vmatpush.msra.mxu1 %v4715_v26 }
 0x269   :  { %1234 = vmatpush.msra.mxu2 %v4718_v29  ;;  %1254 = vmatpush.msra.mxu3 %v4721_v30 }
 0x26a   :  { %1195 = vmatpush.msra.mxu0 %v4724_v31  ;;  %1215 = vmatpush.msra.mxu1 %v4727_v32 }
 0x26b   :  { %1235 = vmatpush.msra.mxu2 %v4730_v36  ;;  %1255 = vmatpush.msra.mxu3 %v4733_v10  ;;  %v6411_v36 = vld [vmem:[#allocation56_spill] sm:$0xff] }
 0x26c   :  { %1196 = vmatpush.msra.mxu0 %v4736_v11  ;;  %1216 = vmatpush.msra.mxu1 %v4739_v12 }
 0x26d   :  { %1236 = vmatpush.msra.mxu2 %v4742_v13  ;;  %1256 = vmatpush.msra.mxu3 %v4745_v28 }
 0x26e   :  { %1197 = vmatpush.msra.mxu0 %v4748_v14  ;;  %1217 = vmatpush.msra.mxu1 %v4751_v35  ;;  %v4769_v35 = vld [vmem:[#allocation6 + $0x38] sm:$0xff] }
 0x26f   :  { %1237 = vmatpush.msra.mxu2 %v4754_v15  ;;  %1257 = vmatpush.msra.mxu3 %v4757_v16  ;;  %6404 = vst [vmem:[#allocation48_spill] sm:$0xff] %v4769_v35  ;;  %v4772_v15 = vld [vmem:[#allocation6] sm:$0xff]  ;;  %v4775_v16 = vld [vmem:[#allocation6 + $0x8] sm:$0xff] }
 0x270   :  { %1198 = vmatpush.msra.mxu0 %v4760_v9  ;;  %1218 = vmatpush.msra.mxu1 %v4763_v17  ;;  %6405 = vst [vmem:[#allocation47_spill] sm:$0xff] %v4772_v15  ;;  %v4778_v9 = vld [vmem:[#allocation6 + $0x10] sm:$0xff]  ;;  %v4781_v17 = vld [vmem:[#allocation6 + $0x18] sm:$0xff] }
 0x271   :  { %1238 = vmatpush.msra.mxu2 %v4766_v18  ;;  %1258 = vmatpush.msra.mxu3 %v4769_v35  ;;  %6406 = vst [vmem:[#allocation49_spill] sm:$0xff] %v4775_v16  ;;  %v6409_v18 = vld [vmem:[#allocation53_spill] sm:$0xff]  ;;  %v6410_v35 = vld [vmem:[#allocation54_spill] sm:$0xff] }
 0x272   :  { %1199 = vmatpush.msra.mxu0 %v4772_v15  ;;  %1219 = vmatpush.msra.mxu1 %v4775_v16  ;;  %6407 = vst [vmem:[#allocation50_spill] sm:$0xff] %v4778_v9  ;;  %v227_v14 = vadd.f32 %v6409_v18, %v6359_v37  ;;  %v268_v28 = vadd.f32 %v6410_v35, %v6361_v40 }
 0x273   :  { %1239 = vmatpush.msra.mxu2 %v4778_v9  ;;  %6408 = vst [vmem:[#allocation52_spill] sm:$0xff] %v4781_v17  ;;  %1259 = vmatpush.msra.mxu3 %v4781_v17  ;;  %v350_v9 = vadd.f32 %v6411_v36, %v6363_v50 }
 0x2cf   :  { %v889_v13 = vpop.f32.mrf.mxu0  ;;  %v909_v15 = vpop.f32.mrf.mxu1 }
 0x2d0   :  { %v952_v12 = vadd.f32 %v889_v13, %v227_v14  ;;  %v953_v11 = vadd.f32 %v909_v15, %v268_v28 }
 0x2d2   :  { %v3319_v10 = vmul.f32 -1.442695, %v952_v12  ;;  %v3320_v16 = vmul.f32 -1.442695, %v953_v11  ;;  %v6412_v12 = vld [vmem:[#allocation55_spill] sm:$0xff] }
 0x2d3   :  { %v309_v11 = vadd.f32 %v6412_v12, %v6365_v20 }
 0x2d4   :  { %3416 = vpow2.f32 %v3319_v10 }
 0x2d5   :  { %3418 = vpow2.f32 %v3320_v16 }
 0x2d6   :  { %v949_v32 = vpop.f32.mrf.mxu3  ;;  %v929_v35 = vpop.f32.mrf.mxu2 }
 0x2d7   :  { %v955_v31 = vadd.f32 %v949_v32, %v350_v9  ;;  %v954_v14 = vadd.f32 %v929_v35, %v309_v11 }
 0x2d9   :  { %v3321_v17 = vmul.f32 -1.442695, %v955_v31 }
 0x2da   :  { %v3417_v30 = vpop.eup %3416 }
 0x2db   :  { %v3419_v29 = vpop.eup %3418  ;;  %v959_v18 = vadd.f32 1.0, %v3417_v30  ;;  %3420 = vpow2.f32 %v3321_v17 }
 0x2dc   :  { %v978_v37 = vadd.f32 1.0, %v3419_v29 }
 0x2dd   :  { %3422 = vrcp.f32 %v959_v18  ;;  %v971_v9 = vand.u32 2147483648, %v959_v18  ;;  %v969_v17 = vand.u32 2147483647, %v959_v18  ;;  %vm965_vm7 = vweird.f32 %v959_v18 }
 0x2de   :  { %3424 = vrcp.f32 %v978_v37  ;;  %v990_v30 = vand.u32 2147483648, %v978_v37  ;;  %v988_v40 = vand.u32 2147483647, %v978_v37  ;;  %vm984_vm8 = vweird.f32 %v978_v37 }
 0x2df   :  { %v972_v35 = vor.u32 1.1754944e-38, %v971_v9  ;;  %vm970_vm11 = vcmp.eq.f32.partialorder %v969_v17, 8.507059e+37 }
 0x2e0   :  { %vm989_vm12 = vcmp.eq.f32.partialorder %v988_v40, 8.507059e+37 }
 0x2e1   :  { %v3421_v13 = vpop.eup %3420 }
 0x2e2   :  { %v998_v10 = vadd.f32 1.0, %v3421_v13 }
 0x2e3   :  { %v3423_v28 = vpop.eup %3422 }
 0x2e4   :  { %v3425_v36 = vpop.eup %3424  ;;  %v961_v15 = vmul.f32 %v3423_v28, %v959_v18  ;;  %3426 = vrcp.f32 %v998_v10  ;;  %vm966_vm5 = vweird.f32 %v3423_v28  ;;  %vm1004_vm14 = vweird.f32 %v998_v10 }
 0x2e5   :  { %v980_v32 = vmul.f32 %v3425_v36, %v978_v37  ;;  %3428 = vtanh.f32 %v954_v14  ;;  %vm985_vm6 = vweird.f32 %v3425_v36  ;;  %vm967_vm9 = vmor %vm965_vm7, %vm966_vm5 }
 0x2e6   :  { %v962_v31 = vsub.f32 1.0, %v961_v15  ;;  %vm986_vm10 = vmor %vm984_vm8, %vm985_vm6  ;;  %v991_v15 = vor.u32 1.1754944e-38, %v990_v30 }
 0x2e7   :  { %v981_v16 = vsub.f32 1.0, %v980_v32 }
 0x2e8   :  { %v963_v29 = vmul.f32 %v3423_v28, %v962_v31 }
 0x2e9   :  { %v982_v50 = vmul.f32 %v3425_v36, %v981_v16 }
 0x2ea   :  { %v3427_v26 = vpop.eup %3426  ;;  %v964_v12 = vadd.f32 %v3423_v28, %v963_v29 }
 0x2eb   :  { %v983_v13 = vadd.f32 %v3425_v36, %v982_v50  ;;  %v1000_v11 = vmul.f32 %v3427_v26, %v998_v10  ;;  %v3429_v14 = vpop.eup %3428  ;;  %vm1005_vm13 = vweird.f32 %v3427_v26  ;;  %v1010_v50 = vand.u32 2147483648, %v998_v10 }
 0x2ec   :  { %v968_v32 = vsel %vm967_vm9, %v3423_v28, %v964_v12  ;;  %v1008_v28 = vand.u32 2147483647, %v998_v10  ;;  %vm1006_vm15 = vmor %vm1004_vm14, %vm1005_vm13  ;;  %v6420_v10 = vld [vmem:[#allocation31_spill] sm:$0xff]  ;;  %v6421_v12 = vld [vmem:[#allocation33_spill] sm:$0xff] }
 0x2ed   :  { %v973_v20 = vsel %vm970_vm11, %v972_v35, %v968_v32  ;;  %v987_v31 = vsel %vm986_vm10, %v3425_v36, %v983_v13  ;;  %v1001_v25 = vsub.f32 1.0, %v1000_v11  ;;  %v1011_v30 = vor.u32 1.1754944e-38, %v1010_v50  ;;  %v6422_v35 = vld [vmem:[#allocation34_spill] sm:$0xff]  ;;  %v6423_v13 = vld [vmem:[#allocation36_spill] sm:$0xff]  ;;  %v6424_v11 = vld [vmem:[#allocation35_spill] sm:$0xff] }
 0x2ee   :  { %v992_v16 = vsel %vm989_vm12, %v991_v15, %v987_v31  ;;  %v1015_v24 = vmul.f32 %v3429_v14, %v973_v20  ;;  %vm1009_vm0 = vcmp.eq.f32.partialorder %v1008_v28, 8.507059e+37  ;;  %v6414_v20 = vld [vmem:[#allocation26_spill] sm:$0xff]  ;;  %v6425_v15 = vld [vmem:[#allocation37_spill] sm:$0xff]  ;;  %v6427_v14 = vld [vmem:[#allocation39_spill] sm:$0xff] }
 0x2ef   :  { %v1014_v23 = vmul.f32 %v992_v16, %v4659_v27  ;;  %v1002_v29 = vmul.f32 %v3427_v26, %v1001_v25  ;;  %v6415_v27 = vld [vmem:[#allocation28_spill] sm:$0xff]  ;;  %v6418_v25 = vld [vmem:[#allocation30_spill] sm:$0xff]  ;;  %v6429_v16 = vld [vmem:[#allocation41_spill] sm:$0xff] }
 0x2f0   :  { %v6426_v32 = vld [vmem:[#allocation38_spill] sm:$0xff]  ;;  %v6428_v31 = vld [vmem:[#allocation40_spill] sm:$0xff]  ;;  %v6433_v28 = vld [vmem:[#allocation45_spill] sm:$0xff] }
 0x2f1   :  { %v4793_v18 = vadd.f32 %v1015_v24, %v1014_v23  ;;  %v1003_v37 = vadd.f32 %v3427_v26, %v1002_v29  ;;  %v6416_v23 = vld [vmem:[#allocation27_spill] sm:$0xff]  ;;  %v6417_v24 = vld [vmem:[#allocation29_spill] sm:$0xff]  ;;  %v6430_v29 = vld [vmem:[#allocation42_spill] sm:$0xff] }
 0x2f2   :  { %v6432_v50 = vld [vmem:[#allocation44_spill] sm:$0xff] }
 0x2f3   :  { %3430 = vtanh.f32 %v4793_v18  ;;  %v1007_v9 = vsel %vm1006_vm15, %v3427_v26, %v1003_v37  ;;  %v6419_v26 = vld [vmem:[#allocation32_spill] sm:$0xff]  ;;  %v6431_v37 = vld [vmem:[#allocation43_spill] sm:$0xff] }
 0x2f4   :  { %v1012_v36 = vsel %vm1009_vm0, %v1011_v30, %v1007_v9  ;;  %v6434_v9 = vld [vmem:[#allocation46_spill] sm:$0xff]  ;;  %v6435_v30 = vld [vmem:[#allocation48_spill] sm:$0xff] }
 0x2f9   :  { %v3431_v40 = vpop.eup %3430 }
 0x2fa   :  { %v4796_v17 = vmul.f32 %v3431_v40, %v1012_v36  ;;  %v6436_v40 = vld [vmem:[#allocation47_spill] sm:$0xff]  ;;  %v6437_v36 = vld [vmem:[#allocation49_spill] sm:$0xff] }
 0x2fc   :  { %6413 = vst [vmem:[#allocation51_spill] sm:$0xff] %v4796_v17  ;;  %1044 = vmatmul.f32.vlgmr.msrb.gmra.mxu0 %v4796_v17  ;;  %1064 = vmatmul.f32.vlgmr.msrb.gmra.mxu1 %v4796_v17 }
 0x2fd   :  { %1084 = vmatmul.f32.vlgmr.msrb.gmra.mxu2 %v4796_v17  ;;  %1104 = vmatmul.f32.vlgmr.msrb.gmra.mxu3 %v4796_v17  ;;  %v6438_v17 = vld [vmem:[#allocation50_spill] sm:$0xff] }
 0x2fe   :  { %1340 = vmatpush.msrb.mxu0 %v4510_v7  ;;  %1360 = vmatpush.msrb.mxu1 %v4513_v60 }
 0x2ff   :  { %1380 = vmatpush.msrb.mxu2 %v4516_v8  ;;  %1400 = vmatpush.msrb.mxu3 %v4519_v59 }
 0x300   :  { %1341 = vmatpush.msrb.mxu0 %v4522_v38  ;;  %1361 = vmatpush.msrb.mxu1 %v4525_v39 }
 0x301   :  { %1381 = vmatpush.msrb.mxu2 %v4528_v41  ;;  %1401 = vmatpush.msrb.mxu3 %v4531_v42 }
 0x302   :  { %1342 = vmatpush.msrb.mxu0 %v4534_v43  ;;  %1362 = vmatpush.msrb.mxu1 %v4537_v44 }
 0x303   :  { %1382 = vmatpush.msrb.mxu2 %v4540_v45  ;;  %1402 = vmatpush.msrb.mxu3 %v4543_v46 }
 0x304   :  { %1343 = vmatpush.msrb.mxu0 %v4546_v48  ;;  %1363 = vmatpush.msrb.mxu1 %v4549_v49 }
 0x305   :  { %1383 = vmatpush.msrb.mxu2 %v4552_v51  ;;  %1403 = vmatpush.msrb.mxu3 %v4555_v52 }
 0x306   :  { %1344 = vmatpush.msrb.mxu0 %v4558_v53  ;;  %1364 = vmatpush.msrb.mxu1 %v4561_v55 }
 0x307   :  { %1384 = vmatpush.msrb.mxu2 %v4564_v63  ;;  %1404 = vmatpush.msrb.mxu3 %v4567_v3 }
 0x308   :  { %1345 = vmatpush.msrb.mxu0 %v4570_v47  ;;  %1365 = vmatpush.msrb.mxu1 %v4573_v58 }
 0x309   :  { %1385 = vmatpush.msrb.mxu2 %v4576_v0  ;;  %1405 = vmatpush.msrb.mxu3 %v4579_v6 }
 0x30a   :  { %1346 = vmatpush.msrb.mxu0 %v4582_v61  ;;  %1366 = vmatpush.msrb.mxu1 %v4585_v57 }
 0x30b   :  { %1386 = vmatpush.msrb.mxu2 %v4588_v2  ;;  %1406 = vmatpush.msrb.mxu3 %v6378_v1 }
 0x30c   :  { %1347 = vmatpush.msrb.mxu0 %v6379_v33  ;;  %1367 = vmatpush.msrb.mxu1 %v6380_v19 }
 0x30d   :  { %1387 = vmatpush.msrb.mxu2 %v6381_v21  ;;  %1407 = vmatpush.msrb.mxu3 %v6382_v22 }
 0x30e   :  { %1348 = vmatpush.msrb.mxu0 %v4606_v34  ;;  %1368 = vmatpush.msrb.mxu1 %v4609_v54 }
 0x30f   :  { %1388 = vmatpush.msrb.mxu2 %v4612_v62  ;;  %1408 = vmatpush.msrb.mxu3 %v4615_v56 }
 0x310   :  { %1349 = vmatpush.msrb.mxu0 %v4618_v5  ;;  %1369 = vmatpush.msrb.mxu1 %v4621_v4 }
 0x311   :  { %1389 = vmatpush.msrb.mxu2 %v6414_v20  ;;  %1409 = vmatpush.msrb.mxu3 %v6415_v27 }
 0x312   :  { %1350 = vmatpush.msrb.mxu0 %v6416_v23  ;;  %1370 = vmatpush.msrb.mxu1 %v6417_v24 }
 0x313   :  { %1390 = vmatpush.msrb.mxu2 %v6418_v25  ;;  %1410 = vmatpush.msrb.mxu3 %v6419_v26 }
 0x314   :  { %1351 = vmatpush.msrb.mxu0 %v6420_v10  ;;  %1371 = vmatpush.msrb.mxu1 %v6421_v12 }
 0x315   :  { %1391 = vmatpush.msrb.mxu2 %v6422_v35  ;;  %1411 = vmatpush.msrb.mxu3 %v6423_v13  ;;  %v6445_v35 = vld [vmem:[#allocation59_spill] sm:$0xff] }
 0x316   :  { %1352 = vmatpush.msrb.mxu0 %v6424_v11  ;;  %1372 = vmatpush.msrb.mxu1 %v6425_v15 }
 0x317   :  { %1392 = vmatpush.msrb.mxu2 %v6426_v32  ;;  %1412 = vmatpush.msrb.mxu3 %v6427_v14  ;;  %v6443_v32 = vld [vmem:[#allocation58_spill] sm:$0xff] }
 0x318   :  { %1353 = vmatpush.msrb.mxu0 %v6428_v31  ;;  %1373 = vmatpush.msrb.mxu1 %v6429_v16  ;;  %v6439_v31 = vld [vmem:[#allocation52_spill] sm:$0xff]  ;;  %v6440_v16 = vld [vmem:[#allocation70_spill] sm:$0xff] }
 0x319   :  { %1393 = vmatpush.msrb.mxu2 %v6430_v29  ;;  %1413 = vmatpush.msrb.mxu3 %v6431_v37  ;;  %v6441_v29 = vld [vmem:[#allocation57_spill] sm:$0xff]  ;;  %v6442_v37 = vld [vmem:[#allocation71_spill] sm:$0xff] }
 0x31a   :  { %1354 = vmatpush.msrb.mxu0 %v6432_v50  ;;  %1374 = vmatpush.msrb.mxu1 %v6433_v28  ;;  %v230_v14 = vadd.f32 %v6441_v29, %v6440_v16  ;;  %v271_v50 = vadd.f32 %v6443_v32, %v6442_v37 }
 0x31b   :  { %1394 = vmatpush.msrb.mxu2 %v6434_v9  ;;  %1414 = vmatpush.msrb.mxu3 %v6435_v30 }
 0x31c   :  { %1355 = vmatpush.msrb.mxu0 %v6436_v40  ;;  %1375 = vmatpush.msrb.mxu1 %v6437_v36  ;;  %v6444_v40 = vld [vmem:[#allocation74_spill] sm:$0xff] }
 0x31d   :  { %1395 = vmatpush.msrb.mxu2 %v6438_v17  ;;  %1415 = vmatpush.msrb.mxu3 %v6439_v31  ;;  %v353_v36 = vadd.f32 %v6445_v35, %v6444_v40 }
 0x379   :  { %v1045_v15 = vpop.f32.mrf.mxu0  ;;  %v1065_v28 = vpop.f32.mrf.mxu1 }
 0x37a   :  { %v1108_v11 = vadd.f32 %v1045_v15, %v230_v14  ;;  %v1109_v9 = vadd.f32 %v1065_v28, %v271_v50  ;;  %v6446_v14 = vld [vmem:[#allocation76_spill] sm:$0xff] }
 0x37c   :  { %v3322_v13 = vmul.f32 -1.442695, %v1108_v11  ;;  %v3323_v30 = vmul.f32 -1.442695, %v1109_v9  ;;  %v6447_v11 = vld [vmem:[#allocation62_spill] sm:$0xff] }
 0x37d   :  { %v312_v50 = vadd.f32 %v6447_v11, %v6446_v14 }
 0x37e   :  { %3432 = vpow2.f32 %v3322_v13 }
 0x37f   :  { %3434 = vpow2.f32 %v3323_v30 }
 0x380   :  { %v1105_v17 = vpop.f32.mrf.mxu3  ;;  %v1085_v32 = vpop.f32.mrf.mxu2 }
 0x381   :  { %v1111_v12 = vadd.f32 %v1105_v17, %v353_v36  ;;  %v1110_v9 = vadd.f32 %v1085_v32, %v312_v50 }
 0x383   :  { %v3324_v31 = vmul.f32 -1.442695, %v1111_v12 }
 0x384   :  { %v3433_v10 = vpop.eup %3432 }
 0x385   :  { %v3435_v26 = vpop.eup %3434  ;;  %v1115_v29 = vadd.f32 1.0, %v3433_v10  ;;  %3436 = vpow2.f32 %v3324_v31 }
 0x386   :  { %v1134_v16 = vadd.f32 1.0, %v3435_v26 }
 0x387   :  { %3438 = vrcp.f32 %v1115_v29  ;;  %v1127_v40 = vand.u32 2147483648, %v1115_v29  ;;  %v1125_v31 = vand.u32 2147483647, %v1115_v29  ;;  %vm1121_vm3 = vweird.f32 %v1115_v29 }
 0x388   :  { %3440 = vrcp.f32 %v1134_v16  ;;  %v1146_v10 = vand.u32 2147483648, %v1134_v16  ;;  %v1144_v25 = vand.u32 2147483647, %v1134_v16  ;;  %vm1140_vm4 = vweird.f32 %v1134_v16 }
 0x389   :  { %v1128_v32 = vor.u32 1.1754944e-38, %v1127_v40  ;;  %vm1126_vm7 = vcmp.eq.f32.partialorder %v1125_v31, 8.507059e+37 }
 0x38a   :  { %vm1145_vm8 = vcmp.eq.f32.partialorder %v1144_v25, 8.507059e+37 }
 0x38b   :  { %v3437_v15 = vpop.eup %3436 }
 0x38c   :  { %v1154_v13 = vadd.f32 1.0, %v3437_v15 }
 0x38d   :  { %v3439_v28 = vpop.eup %3438 }
 0x38e   :  { %v3441_v35 = vpop.eup %3440  ;;  %v1117_v30 = vmul.f32 %v3439_v28, %v1115_v29  ;;  %3442 = vrcp.f32 %v1154_v13  ;;  %vm1122_vm1 = vweird.f32 %v3439_v28  ;;  %vm1160_vm10 = vweird.f32 %v1154_v13 }
 0x38f   :  { %v1136_v17 = vmul.f32 %v3441_v35, %v1134_v16  ;;  %3444 = vtanh.f32 %v1110_v9  ;;  %vm1141_vm2 = vweird.f32 %v3441_v35  ;;  %vm1123_vm5 = vmor %vm1121_vm3, %vm1122_vm1  ;;  %v1164_v40 = vand.u32 2147483647, %v1154_v13 }
 0x390   :  { %v1118_v12 = vsub.f32 1.0, %v1117_v30  ;;  %vm1142_vm6 = vmor %vm1140_vm4, %vm1141_vm2  ;;  %v1147_v30 = vor.u32 1.1754944e-38, %v1146_v10 }
 0x391   :  { %v1137_v36 = vsub.f32 1.0, %v1136_v17  ;;  %vm1165_vm12 = vcmp.eq.f32.partialorder %v1164_v40, 8.507059e+37 }
 0x392   :  { %v1119_v26 = vmul.f32 %v3439_v28, %v1118_v12 }
 0x393   :  { %v1138_v37 = vmul.f32 %v3441_v35, %v1137_v36 }
 0x394   :  { %v3443_v24 = vpop.eup %3442  ;;  %v1120_v11 = vadd.f32 %v3439_v28, %v1119_v26 }
 0x395   :  { %v1139_v15 = vadd.f32 %v3441_v35, %v1138_v37  ;;  %v1156_v50 = vmul.f32 %v3443_v24, %v1154_v13  ;;  %v3445_v9 = vpop.eup %3444  ;;  %vm1161_vm9 = vweird.f32 %v3443_v24  ;;  %v1166_v37 = vand.u32 2147483648, %v1154_v13 }
 0x396   :  { %v1124_v17 = vsel %vm1123_vm5, %v3439_v28, %v1120_v11  ;;  %vm1162_vm11 = vmor %vm1160_vm10, %vm1161_vm9 }
 0x397   :  { %v1129_v14 = vsel %vm1126_vm7, %v1128_v32, %v1124_v17  ;;  %v1143_v12 = vsel %vm1142_vm6, %v3441_v35, %v1139_v15  ;;  %v1157_v23 = vsub.f32 1.0, %v1156_v50  ;;  %v1167_v10 = vor.u32 1.1754944e-38, %v1166_v37  ;;  %v6480_v17 = vld [vmem:[#allocation76_spill] sm:$0xff] }
 0x398   :  { %v1148_v36 = vsel %vm1145_vm8, %v1147_v30, %v1143_v12  ;;  %v1171_v27 = vmul.f32 %v3445_v9, %v1129_v14  ;;  %v6481_v9 = vld [vmem:[#allocation66_spill] sm:$0xff] }
 0x399   :  { %v1170_v20 = vmul.f32 %v1148_v36, %v4793_v18  ;;  %v1158_v26 = vmul.f32 %v3443_v24, %v1157_v23  ;;  %v6478_v18 = vld [vmem:[#allocation74_spill] sm:$0xff]  ;;  %v315_v12 = vadd.f32 %v6481_v9, %v6480_v17  ;;  %v6482_v9 = vld [vmem:[#allocation64_spill] sm:$0xff] }
 0x39b   :  { %v4875_v29 = vadd.f32 %v1171_v27, %v1170_v20  ;;  %v1159_v16 = vadd.f32 %v3443_v24, %v1158_v26  ;;  %v6479_v20 = vld [vmem:[#allocation63_spill] sm:$0xff] }
 0x39c   :  { %v356_v27 = vadd.f32 %v6479_v20, %v6478_v18  ;;  %v1699_v20 = vld [vmem:[#allocation9 + $0x1a0] sm:$0xff] }
 0x39d   :  { %3446 = vtanh.f32 %v4875_v29  ;;  %v1163_v28 = vsel %vm1162_vm11, %v3443_v24, %v1159_v16 }
 0x39e   :  { %v1168_v35 = vsel %vm1165_vm12, %v1167_v10, %v1163_v28 }
 0x3a3   :  { %v3447_v25 = vpop.eup %3446 }
 0x3a4   :  { %v4878_v31 = vmul.f32 %v3447_v25, %v1168_v35 }
 0x3a6   :  { %1200 = vmatmul.f32.vlgmr.msra.gmra.mxu0 %v4878_v31  ;;  %1220 = vmatmul.f32.vlgmr.msra.gmra.mxu1 %v4878_v31 }
 0x3a7   :  { %1240 = vmatmul.f32.vlgmr.msra.gmra.mxu2 %v4878_v31  ;;  %1260 = vmatmul.f32.vlgmr.msra.gmra.mxu3 %v4878_v31 }
 0x3a8   :  { %1496 = vmatpush.msra.mxu0 %v4510_v7  ;;  %1516 = vmatpush.msra.mxu1 %v4513_v60  ;;  %v6448_v7 = vld [vmem:[#allocation26_spill] sm:$0xff]  ;;  %v6449_v60 = vld [vmem:[#allocation28_spill] sm:$0xff] }
 0x3a9   :  { %1536 = vmatpush.msra.mxu2 %v4516_v8  ;;  %1556 = vmatpush.msra.mxu3 %v4519_v59  ;;  %v6450_v8 = vld [vmem:[#allocation27_spill] sm:$0xff]  ;;  %v6451_v59 = vld [vmem:[#allocation29_spill] sm:$0xff] }
 0x3aa   :  { %1497 = vmatpush.msra.mxu0 %v4522_v38  ;;  %1517 = vmatpush.msra.mxu1 %v4525_v39  ;;  %v6452_v38 = vld [vmem:[#allocation30_spill] sm:$0xff]  ;;  %v6454_v39 = vld [vmem:[#allocation31_spill] sm:$0xff] }
 0x3ab   :  { %1537 = vmatpush.msra.mxu2 %v4528_v41  ;;  %1557 = vmatpush.msra.mxu3 %v4531_v42  ;;  %v6455_v41 = vld [vmem:[#allocation33_spill] sm:$0xff]  ;;  %v6456_v42 = vld [vmem:[#allocation34_spill] sm:$0xff] }
 0x3ac   :  { %1498 = vmatpush.msra.mxu0 %v4534_v43  ;;  %1518 = vmatpush.msra.mxu1 %v4537_v44  ;;  %v6457_v43 = vld [vmem:[#allocation36_spill] sm:$0xff]  ;;  %v6459_v44 = vld [vmem:[#allocation37_spill] sm:$0xff] }
 0x3ad   :  { %1538 = vmatpush.msra.mxu2 %v4540_v45  ;;  %1558 = vmatpush.msra.mxu3 %v4543_v46  ;;  %v6460_v45 = vld [vmem:[#allocation38_spill] sm:$0xff]  ;;  %v6461_v46 = vld [vmem:[#allocation39_spill] sm:$0xff] }
 0x3ae   :  { %1499 = vmatpush.msra.mxu0 %v4546_v48  ;;  %1519 = vmatpush.msra.mxu1 %v4549_v49  ;;  %v6462_v48 = vld [vmem:[#allocation40_spill] sm:$0xff]  ;;  %v6463_v49 = vld [vmem:[#allocation41_spill] sm:$0xff] }
 0x3af   :  { %1539 = vmatpush.msra.mxu2 %v4552_v51  ;;  %1559 = vmatpush.msra.mxu3 %v4555_v52  ;;  %v6464_v51 = vld [vmem:[#allocation42_spill] sm:$0xff]  ;;  %v6465_v52 = vld [vmem:[#allocation43_spill] sm:$0xff] }
 0x3b0   :  { %1500 = vmatpush.msra.mxu0 %v4558_v53  ;;  %1520 = vmatpush.msra.mxu1 %v4561_v55  ;;  %v6466_v53 = vld [vmem:[#allocation44_spill] sm:$0xff]  ;;  %v6467_v55 = vld [vmem:[#allocation45_spill] sm:$0xff] }
 0x3b1   :  { %1540 = vmatpush.msra.mxu2 %v4564_v63  ;;  %1560 = vmatpush.msra.mxu3 %v4567_v3  ;;  %v6468_v63 = vld [vmem:[#allocation46_spill] sm:$0xff]  ;;  %v6469_v3 = vld [vmem:[#allocation48_spill] sm:$0xff] }
 0x3b2   :  { %1501 = vmatpush.msra.mxu0 %v4570_v47  ;;  %1521 = vmatpush.msra.mxu1 %v4573_v58  ;;  %v6470_v47 = vld [vmem:[#allocation47_spill] sm:$0xff]  ;;  %v6471_v58 = vld [vmem:[#allocation49_spill] sm:$0xff] }
 0x3b3   :  { %1541 = vmatpush.msra.mxu2 %v4576_v0  ;;  %1561 = vmatpush.msra.mxu3 %v4579_v6  ;;  %v6472_v0 = vld [vmem:[#allocation50_spill] sm:$0xff]  ;;  %v6473_v6 = vld [vmem:[#allocation52_spill] sm:$0xff] }
 0x3b4   :  { %1502 = vmatpush.msra.mxu0 %v4582_v61  ;;  %1522 = vmatpush.msra.mxu1 %v4585_v57  ;;  %v6474_v61 = vld [vmem:[#allocation70_spill] sm:$0xff]  ;;  %v6475_v57 = vld [vmem:[#allocation60_spill] sm:$0xff] }
 0x3b5   :  { %1542 = vmatpush.msra.mxu2 %v4588_v2  ;;  %1562 = vmatpush.msra.mxu3 %v6378_v1  ;;  %v233_v2 = vadd.f32 %v6475_v57, %v6474_v61 }
 0x3b6   :  { %1503 = vmatpush.msra.mxu0 %v6379_v33  ;;  %1523 = vmatpush.msra.mxu1 %v6380_v19 }
 0x3b7   :  { %1543 = vmatpush.msra.mxu2 %v6381_v21  ;;  %1563 = vmatpush.msra.mxu3 %v6382_v22 }
 0x3b8   :  { %1504 = vmatpush.msra.mxu0 %v4606_v34  ;;  %1524 = vmatpush.msra.mxu1 %v4609_v54  ;;  %v6453_v34 = vld [vmem:[#allocation32_spill] sm:$0xff]  ;;  %v6476_v54 = vld [vmem:[#allocation71_spill] sm:$0xff] }
 0x3b9   :  { %1544 = vmatpush.msra.mxu2 %v4612_v62  ;;  %1564 = vmatpush.msra.mxu3 %v4615_v56  ;;  %v6477_v62 = vld [vmem:[#allocation61_spill] sm:$0xff] }
 0x3ba   :  { %1505 = vmatpush.msra.mxu0 %v4618_v5  ;;  %1525 = vmatpush.msra.mxu1 %v4621_v4  ;;  %v6458_v4 = vld [vmem:[#allocation35_spill] sm:$0xff]  ;;  %v274_v56 = vadd.f32 %v6477_v62, %v6476_v54 }
 0x3bb   :  { %1545 = vmatpush.msra.mxu2 %v6448_v7  ;;  %1565 = vmatpush.msra.mxu3 %v6449_v60 }
 0x3bc   :  { %1506 = vmatpush.msra.mxu0 %v6450_v8  ;;  %1526 = vmatpush.msra.mxu1 %v6451_v59 }
 0x3bd   :  { %1546 = vmatpush.msra.mxu2 %v6452_v38  ;;  %1566 = vmatpush.msra.mxu3 %v6453_v34 }
 0x3be   :  { %1507 = vmatpush.msra.mxu0 %v6454_v39  ;;  %1527 = vmatpush.msra.mxu1 %v6455_v41 }
 0x3bf   :  { %1547 = vmatpush.msra.mxu2 %v6456_v42  ;;  %1567 = vmatpush.msra.mxu3 %v6457_v43 }
 0x3c0   :  { %1508 = vmatpush.msra.mxu0 %v6458_v4  ;;  %1528 = vmatpush.msra.mxu1 %v6459_v44 }
 0x3c1   :  { %1548 = vmatpush.msra.mxu2 %v6460_v45  ;;  %1568 = vmatpush.msra.mxu3 %v6461_v46 }
 0x3c2   :  { %1509 = vmatpush.msra.mxu0 %v6462_v48  ;;  %1529 = vmatpush.msra.mxu1 %v6463_v49 }
 0x3c3   :  { %1549 = vmatpush.msra.mxu2 %v6464_v51  ;;  %1569 = vmatpush.msra.mxu3 %v6465_v52 }
 0x3c4   :  { %1510 = vmatpush.msra.mxu0 %v6466_v53  ;;  %1530 = vmatpush.msra.mxu1 %v6467_v55 }
 0x3c5   :  { %1550 = vmatpush.msra.mxu2 %v6468_v63  ;;  %1570 = vmatpush.msra.mxu3 %v6469_v3 }
 0x3c6   :  { %1511 = vmatpush.msra.mxu0 %v6470_v47  ;;  %1531 = vmatpush.msra.mxu1 %v6471_v58 }
 0x3c7   :  { %1551 = vmatpush.msra.mxu2 %v6472_v0  ;;  %1571 = vmatpush.msra.mxu3 %v6473_v6 }
 0x423   :  { %v1201_v5 = vpop.f32.mrf.mxu0  ;;  %v1221_v1 = vpop.f32.mrf.mxu1 }
 0x424   :  { %v1264_v33 = vadd.f32 %v1201_v5, %v233_v2  ;;  %v1265_v19 = vadd.f32 %v1221_v1, %v274_v56  ;;  %v1708_v56 = vld [vmem:[#allocation9 + $0x1e8] sm:$0xff]  ;;  %v1709_v5 = vld [vmem:[#allocation9 + $0x1f0] sm:$0xff]  ;;  %v1710_v1 = vld [vmem:[#allocation9 + $0x1f8] sm:$0xff] }
 0x426   :  { %v3325_v21 = vmul.f32 -1.442695, %v1264_v33  ;;  %v3326_v22 = vmul.f32 -1.442695, %v1265_v19  ;;  %v1703_v33 = vld [vmem:[#allocation9 + $0x1c0] sm:$0xff]  ;;  %v1704_v19 = vld [vmem:[#allocation9 + $0x1c8] sm:$0xff] }
 0x428   :  { %3448 = vpow2.f32 %v3325_v21  ;;  %v1705_v21 = vld [vmem:[#allocation9 + $0x1d0] sm:$0xff] }
 0x429   :  { %3450 = vpow2.f32 %v3326_v22  ;;  %v1706_v22 = vld [vmem:[#allocation9 + $0x1d8] sm:$0xff] }
 0x42a   :  { %v1261_v23 = vpop.f32.mrf.mxu3  ;;  %v1241_v50 = vpop.f32.mrf.mxu2 }
 0x42b   :  { %v1267_v24 = vadd.f32 %v1261_v23, %v356_v27  ;;  %v1266_v16 = vadd.f32 %v1241_v50, %v315_v12  ;;  %v1700_v27 = vld [vmem:[#allocation9 + $0x1a8] sm:$0xff]  ;;  %v1701_v23 = vld [vmem:[#allocation9 + $0x1b0] sm:$0xff]  ;;  %v236_v12 = vadd.f32 %v6482_v9, %v6474_v61 }
 0x42c   :  { %v1692_v50 = vld [vmem:[#allocation9 + $0x168] sm:$0xff] }
 0x42d   :  { %v3327_v14 = vmul.f32 -1.442695, %v1267_v24  ;;  %v1702_v24 = vld [vmem:[#allocation9 + $0x1b8] sm:$0xff] }
 0x42e   :  { %v3449_v13 = vpop.eup %3448 }
 0x42f   :  { %v3451_v11 = vpop.eup %3450  ;;  %v1271_v32 = vadd.f32 1.0, %v3449_v13  ;;  %3452 = vpow2.f32 %v3327_v14  ;;  %v1695_v14 = vld [vmem:[#allocation9 + $0x180] sm:$0xff]  ;;  %v1696_v13 = vld [vmem:[#allocation9 + $0x188] sm:$0xff] }
 0x430   :  { %v1290_v15 = vadd.f32 1.0, %v3451_v11  ;;  %v1697_v11 = vld [vmem:[#allocation9 + $0x190] sm:$0xff] }
 0x431   :  { %3454 = vrcp.f32 %v1271_v32  ;;  %v1283_v35 = vand.u32 2147483648, %v1271_v32  ;;  %v1281_v8 = vand.u32 2147483647, %v1271_v32  ;;  %vm1277_vm15 = vweird.f32 %v1271_v32 }
 0x432   :  { %3456 = vrcp.f32 %v1290_v15  ;;  %v1302_v7 = vand.u32 2147483648, %v1290_v15  ;;  %v1300_v38 = vand.u32 2147483647, %v1290_v15  ;;  %vm1296_vm0 = vweird.f32 %v1290_v15 }
 0x433   :  { %v1284_v41 = vor.u32 1.1754944e-38, %v1283_v35  ;;  %vm1282_vm3 = vcmp.eq.f32.partialorder %v1281_v8, 8.507059e+37  ;;  %v1683_v8 = vld [vmem:[#allocation9 + $0x120] sm:$0xff] }
 0x434   :  { %v1303_v4 = vor.u32 1.1754944e-38, %v1302_v7  ;;  %vm1301_vm4 = vcmp.eq.f32.partialorder %v1300_v38, 8.507059e+37  ;;  %v1685_v38 = vld [vmem:[#allocation9 + $0x130] sm:$0xff] }
 0x435   :  { %v3453_v30 = vpop.eup %3452 }
 0x436   :  { %v1310_v36 = vadd.f32 1.0, %v3453_v30  ;;  %v1693_v30 = vld [vmem:[#allocation9 + $0x170] sm:$0xff] }
 0x437   :  { %v3455_v26 = vpop.eup %3454 }
 0x438   :  { %v3457_v37 = vpop.eup %3456  ;;  %v1273_v40 = vmul.f32 %v3455_v26, %v1271_v32  ;;  %3458 = vrcp.f32 %v1310_v36  ;;  %vm1278_vm13 = vweird.f32 %v3455_v26  ;;  %v1322_v47 = vand.u32 2147483648, %v1310_v36  ;;  %v1698_v32 = vld [vmem:[#allocation9 + $0x198] sm:$0xff] }
 0x439   :  { %v1292_v28 = vmul.f32 %v3457_v37, %v1290_v15  ;;  %3460 = vtanh.f32 %v1266_v16  ;;  %vm1297_vm14 = vweird.f32 %v3457_v37  ;;  %vm1279_vm1 = vmor %vm1277_vm15, %vm1278_vm13  ;;  %vm1316_vm6 = vweird.f32 %v1310_v36  ;;  %v1691_v15 = vld [vmem:[#allocation9 + $0x160] sm:$0xff]  ;;  %v1694_v16 = vld [vmem:[#allocation9 + $0x178] sm:$0xff] }
 0x43a   :  { %v1274_v10 = vsub.f32 1.0, %v1273_v40  ;;  %vm1298_vm2 = vmor %vm1296_vm0, %vm1297_vm14  ;;  %v1320_v58 = vand.u32 2147483647, %v1310_v36  ;;  %v1323_v6 = vor.u32 1.1754944e-38, %v1322_v47  ;;  %v1672_v47 = vld [vmem:[#allocation9 + $0xc8] sm:$0xff] }
 0x43b   :  { %v1293_v25 = vsub.f32 1.0, %v1292_v28  ;;  %v1687_v28 = vld [vmem:[#allocation9 + $0x140] sm:$0xff] }
 0x43c   :  { %v1275_v60 = vmul.f32 %v3455_v26, %v1274_v10  ;;  %vm1321_vm8 = vcmp.eq.f32.partialorder %v1320_v58, 8.507059e+37  ;;  %v1688_v10 = vld [vmem:[#allocation9 + $0x148] sm:$0xff]  ;;  %v1673_v58 = vld [vmem:[#allocation9 + $0xd0] sm:$0xff] }
 0x43d   :  { %v1294_v59 = vmul.f32 %v3457_v37, %v1293_v25  ;;  %v1689_v25 = vld [vmem:[#allocation9 + $0x150] sm:$0xff] }
 0x43e   :  { %v3459_v34 = vpop.eup %3458  ;;  %v1276_v39 = vadd.f32 %v3455_v26, %v1275_v60  ;;  %v1690_v60 = vld [vmem:[#allocation9 + $0x158] sm:$0xff] }
 0x43f   :  { %v1295_v42 = vadd.f32 %v3457_v37, %v1294_v59  ;;  %v1312_v43 = vmul.f32 %v3459_v34, %v1310_v36  ;;  %v3461_v45 = vpop.eup %3460  ;;  %vm1317_vm5 = vweird.f32 %v3459_v34  ;;  %v6483_v36 = vld [vmem:[#allocation65_spill] sm:$0xff]  ;;  %v1684_v59 = vld [vmem:[#allocation9 + $0x128] sm:$0xff] }
 0x440   :  { %v1280_v44 = vsel %vm1279_vm1, %v3455_v26, %v1276_v39  ;;  %vm1318_vm7 = vmor %vm1316_vm6, %vm1317_vm5  ;;  %v277_v26 = vadd.f32 %v6483_v36, %v6476_v54  ;;  %v1653_v36 = vld [vmem:[#allocation9 + $0x30] sm:$0xff] }
 0x441   :  { %v1285_v46 = vsel %vm1282_vm3, %v1284_v41, %v1280_v44  ;;  %v1299_v48 = vsel %vm1298_vm2, %v3457_v37, %v1295_v42  ;;  %v1313_v49 = vsub.f32 1.0, %v1312_v43  ;;  %v1686_v41 = vld [vmem:[#allocation9 + $0x138] sm:$0xff]  ;;  %v1679_v42 = vld [vmem:[#allocation9 + $0x100] sm:$0xff]  ;;  %v1680_v43 = vld [vmem:[#allocation9 + $0x108] sm:$0xff] }
 0x442   :  { %v1304_v51 = vsel %vm1301_vm4, %v1303_v4, %v1299_v48  ;;  %v1327_v52 = vmul.f32 %v3461_v45, %v1285_v46  ;;  %v1681_v4 = vld [vmem:[#allocation9 + $0x110] sm:$0xff]  ;;  %v1682_v44 = vld [vmem:[#allocation9 + $0x118] sm:$0xff]  ;;  %v6484_v45 = vld [vmem:[#allocation67_spill] sm:$0xff] }
 0x443   :  { %v1326_v53 = vmul.f32 %v1304_v51, %v4875_v29  ;;  %v1314_v55 = vmul.f32 %v3459_v34, %v1313_v49  ;;  %v1707_v29 = vld [vmem:[#allocation9 + $0x1e0] sm:$0xff]  ;;  %v359_v46 = vadd.f32 %v6484_v45, %v6478_v18  ;;  %v1676_v49 = vld [vmem:[#allocation9 + $0xe8] sm:$0xff]  ;;  %v1677_v51 = vld [vmem:[#allocation9 + $0xf0] sm:$0xff] }
 0x444   :  { %v1675_v48 = vld [vmem:[#allocation9 + $0xe0] sm:$0xff] }
 0x445   :  { %v4957_v63 = vadd.f32 %v1327_v52, %v1326_v53  ;;  %v1315_v3 = vadd.f32 %v3459_v34, %v1314_v55  ;;  %v1678_v53 = vld [vmem:[#allocation9 + $0xf8] sm:$0xff] }
 0x447   :  { %3462 = vtanh.f32 %v4957_v63  ;;  %v1319_v0 = vsel %vm1318_vm7, %v3459_v34, %v1315_v3  ;;  %v1671_v3 = vld [vmem:[#allocation9 + $0xc0] sm:$0xff] }
 0x448   :  { %v1324_v2 = vsel %vm1321_vm8, %v1323_v6, %v1319_v0  ;;  %v1674_v0 = vld [vmem:[#allocation9 + $0xd8] sm:$0xff] }
 0x44d   :  { %v3463_v57 = vpop.eup %3462 }
 0x44e   :  { %v4960_v62 = vmul.f32 %v3463_v57, %v1324_v2  ;;  %v1667_v57 = vld [vmem:[#allocation9 + $0xa0] sm:$0xff]  ;;  %v1668_v2 = vld [vmem:[#allocation9 + $0xa8] sm:$0xff] }
 0x450   :  { %1356 = vmatmul.f32.vlgmr.msrb.gmra.mxu0 %v4960_v62  ;;  %1376 = vmatmul.f32.vlgmr.msrb.gmra.mxu1 %v4960_v62 }
 0x451   :  { %1396 = vmatmul.f32.vlgmr.msrb.gmra.mxu2 %v4960_v62  ;;  %1416 = vmatmul.f32.vlgmr.msrb.gmra.mxu3 %v4960_v62 }
 0x452   :  { %1793 = vmatpush.msrb.mxu0 %v1707_v29  ;;  %1834 = vmatpush.msrb.mxu1 %v1708_v56  ;;  %v1669_v29 = vld [vmem:[#allocation9 + $0xb0] sm:$0xff] }
 0x453   :  { %1875 = vmatpush.msrb.mxu2 %v1709_v5  ;;  %1916 = vmatpush.msrb.mxu3 %v1710_v1  ;;  %v1670_v5 = vld [vmem:[#allocation9 + $0xb8] sm:$0xff]  ;;  %v1663_v1 = vld [vmem:[#allocation9 + $0x80] sm:$0xff] }
 0x454   :  { %1794 = vmatpush.msrb.mxu0 %v1703_v33  ;;  %1835 = vmatpush.msrb.mxu1 %v1704_v19  ;;  %v1664_v33 = vld [vmem:[#allocation9 + $0x88] sm:$0xff] }
 0x455   :  { %1876 = vmatpush.msrb.mxu2 %v1705_v21  ;;  %1917 = vmatpush.msrb.mxu3 %v1706_v22  ;;  %v1665_v22 = vld [vmem:[#allocation9 + $0x90] sm:$0xff] }
 0x456   :  { %1795 = vmatpush.msrb.mxu0 %v1699_v20  ;;  %1836 = vmatpush.msrb.mxu1 %v1700_v27  ;;  %v1666_v20 = vld [vmem:[#allocation9 + $0x98] sm:$0xff] }
 0x457   :  { %1877 = vmatpush.msrb.mxu2 %v1701_v23  ;;  %1918 = vmatpush.msrb.mxu3 %v1702_v24  ;;  %v1659_v23 = vld [vmem:[#allocation9 + $0x60] sm:$0xff]  ;;  %v1660_v24 = vld [vmem:[#allocation9 + $0x68] sm:$0xff] }
 0x458   :  { %1796 = vmatpush.msrb.mxu0 %v1695_v14  ;;  %1837 = vmatpush.msrb.mxu1 %v1696_v13  ;;  %v1661_v14 = vld [vmem:[#allocation9 + $0x70] sm:$0xff]  ;;  %v1662_v13 = vld [vmem:[#allocation9 + $0x78] sm:$0xff] }
 0x459   :  { %1878 = vmatpush.msrb.mxu2 %v1697_v11  ;;  %1919 = vmatpush.msrb.mxu3 %v1698_v32  ;;  %v1655_v11 = vld [vmem:[#allocation9 + $0x40] sm:$0xff]  ;;  %v1656_v32 = vld [vmem:[#allocation9 + $0x48] sm:$0xff] }
 0x45a   :  { %1797 = vmatpush.msrb.mxu0 %v1691_v15  ;;  %1838 = vmatpush.msrb.mxu1 %v1692_v50  ;;  %v1657_v15 = vld [vmem:[#allocation9 + $0x50] sm:$0xff]  ;;  %v1658_v50 = vld [vmem:[#allocation9 + $0x58] sm:$0xff] }
 0x45b   :  { %1879 = vmatpush.msrb.mxu2 %v1693_v30  ;;  %1920 = vmatpush.msrb.mxu3 %v1694_v16  ;;  %v1651_v30 = vld [vmem:[#allocation9 + $0x20] sm:$0xff] }
 0x45c   :  { %1798 = vmatpush.msrb.mxu0 %v1687_v28  ;;  %1839 = vmatpush.msrb.mxu1 %v1688_v10  ;;  %v1647_v28 = vld [vmem:[#allocation9] sm:$0xff]  ;;  %v1648_v10 = vld [vmem:[#allocation9 + $0x8] sm:$0xff] }
 0x45d   :  { %1880 = vmatpush.msrb.mxu2 %v1689_v25  ;;  %1921 = vmatpush.msrb.mxu3 %v1690_v60 }
 0x45e   :  { %1799 = vmatpush.msrb.mxu0 %v1683_v8  ;;  %1840 = vmatpush.msrb.mxu1 %v1684_v59 }
 0x45f   :  { %1881 = vmatpush.msrb.mxu2 %v1685_v38  ;;  %1922 = vmatpush.msrb.mxu3 %v1686_v41 }
 0x460   :  { %1800 = vmatpush.msrb.mxu0 %v1679_v42  ;;  %1841 = vmatpush.msrb.mxu1 %v1680_v43 }
 0x461   :  { %1882 = vmatpush.msrb.mxu2 %v1681_v4  ;;  %1923 = vmatpush.msrb.mxu3 %v1682_v44 }
 0x462   :  { %1801 = vmatpush.msrb.mxu0 %v1675_v48  ;;  %1842 = vmatpush.msrb.mxu1 %v1676_v49 }
 0x463   :  { %1883 = vmatpush.msrb.mxu2 %v1677_v51  ;;  %1924 = vmatpush.msrb.mxu3 %v1678_v53 }
 0x464   :  { %1802 = vmatpush.msrb.mxu0 %v1671_v3  ;;  %1843 = vmatpush.msrb.mxu1 %v1672_v47 }
 0x465   :  { %1884 = vmatpush.msrb.mxu2 %v1673_v58  ;;  %1925 = vmatpush.msrb.mxu3 %v1674_v0 }
 0x466   :  { %1803 = vmatpush.msrb.mxu0 %v1667_v57  ;;  %1844 = vmatpush.msrb.mxu1 %v1668_v2 }
 0x467   :  { %1885 = vmatpush.msrb.mxu2 %v1669_v29  ;;  %1926 = vmatpush.msrb.mxu3 %v1670_v5 }
 0x468   :  { %1804 = vmatpush.msrb.mxu0 %v1663_v1  ;;  %1845 = vmatpush.msrb.mxu1 %v1664_v33 }
 0x469   :  { %1886 = vmatpush.msrb.mxu2 %v1665_v22  ;;  %1927 = vmatpush.msrb.mxu3 %v1666_v20 }
 0x46a   :  { %1805 = vmatpush.msrb.mxu0 %v1659_v23  ;;  %1846 = vmatpush.msrb.mxu1 %v1660_v24  ;;  %v6487_v24 = vld [vmem:[#allocation20_spill] sm:$0xff] }
 0x46b   :  { %1887 = vmatpush.msrb.mxu2 %v1661_v14  ;;  %1928 = vmatpush.msrb.mxu3 %v1662_v13  ;;  %v6488_v14 = vld [vmem:[#allocation25_spill] sm:$0xff]  ;;  %v5004_v13 = vld [vmem:[#allocation11 + $0x1e0] sm:$0xff] }
 0x46c   :  { %1806 = vmatpush.msrb.mxu0 %v1655_v11  ;;  %1847 = vmatpush.msrb.mxu1 %v1656_v32  ;;  %6489 = vst [vmem:[#allocation19_spill] sm:$0xff] %v5004_v13  ;;  %v5006_v11 = vld [vmem:[#allocation11 + $0x1e8] sm:$0xff]  ;;  %v5008_v32 = vld [vmem:[#allocation11 + $0x1c0] sm:$0xff] }
 0x46d   :  { %1888 = vmatpush.msrb.mxu2 %v1657_v15  ;;  %1929 = vmatpush.msrb.mxu3 %v1658_v50  ;;  %v5012_v15 = vld [vmem:[#allocation11 + $0x1c8] sm:$0xff]  ;;  %v5014_v50 = vld [vmem:[#allocation11 + $0x1f8] sm:$0xff] }
 0x46e   :  { %1807 = vmatpush.msrb.mxu0 %v1651_v30  ;;  %6490 = vst [vmem:[#allocation21_spill] sm:$0xff] %v5012_v15  ;;  %v5017_v30 = vld [vmem:[#allocation11 + $0x1a0] sm:$0xff] }
 0x46f   :  { %1889 = vmatpush.msrb.mxu2 %v1653_v36  ;;  %v6493_v36 = vld [vmem:[#allocation51_spill] sm:$0xff] }
 0x470   :  { %1808 = vmatpush.msrb.mxu0 %v1647_v28  ;;  %v5052_v28 = vld [vmem:[#allocation11 + $0x188] sm:$0xff] }
 0x4cd   :  { %v1357_v37 = vpop.f32.mrf.mxu0  ;;  %v1377_v40 = vpop.f32.mrf.mxu1 }
 0x4ce   :  { %v1420_v35 = vadd.f32 %v1357_v37, %v236_v12  ;;  %v1421_v7 = vadd.f32 %v1377_v40, %v277_v26  ;;  %v1652_v12 = vld [vmem:[#allocation9 + $0x28] sm:$0xff]  ;;  %v1654_v26 = vld [vmem:[#allocation9 + $0x38] sm:$0xff] }
 0x4cf   :  { %v6485_v37 = vld [vmem:[#allocation72_spill] sm:$0xff]  ;;  %1848 = vmatpush.msrb.mxu1 %v1652_v12  ;;  %1930 = vmatpush.msrb.mxu3 %v1654_v26  ;;  %v5021_v12 = vld [vmem:[#allocation11 + $0x1d8] sm:$0xff]  ;;  %v5040_v26 = vld [vmem:[#allocation11 + $0x1f0] sm:$0xff] }
 0x4d0   :  { %v3328_v34 = vmul.f32 -1.442695, %v1420_v35  ;;  %v3329_v39 = vmul.f32 -1.442695, %v1421_v7  ;;  %v318_v40 = vadd.f32 %v6485_v37, %v6480_v17  ;;  %v1649_v35 = vld [vmem:[#allocation9 + $0x10] sm:$0xff]  ;;  %v1650_v7 = vld [vmem:[#allocation9 + $0x18] sm:$0xff] }
 0x4d1   :  { %1849 = vmatpush.msrb.mxu1 %v1648_v10  ;;  %1890 = vmatpush.msrb.mxu2 %v1649_v35  ;;  %6492 = vst [vmem:[#allocation24_spill] sm:$0xff] %v5021_v12  ;;  %v5048_v37 = vld [vmem:[#allocation11 + $0x1b0] sm:$0xff]  ;;  %v5060_v10 = vld [vmem:[#allocation11 + $0x168] sm:$0xff] }
 0x4d2   :  { %3464 = vpow2.f32 %v3328_v34  ;;  %1931 = vmatpush.msrb.mxu3 %v1650_v7  ;;  %v5064_v35 = vld [vmem:[#allocation11 + $0x190] sm:$0xff]  ;;  %v5070_v7 = vld [vmem:[#allocation11 + $0x178] sm:$0xff] }
 0x4d3   :  { %3466 = vpow2.f32 %v3329_v39 }
 0x4d4   :  { %v1417_v52 = vpop.f32.mrf.mxu3  ;;  %v1397_v9 = vpop.f32.mrf.mxu2 }
 0x4d5   :  { %v1423_v55 = vadd.f32 %v1417_v52, %v359_v46  ;;  %v1422_v8 = vadd.f32 %v1397_v9, %v318_v40  ;;  %v5019_v9 = vld [vmem:[#allocation11 + $0x1a8] sm:$0xff]  ;;  %v5050_v40 = vld [vmem:[#allocation11 + $0x180] sm:$0xff] }
 0x4d6   :  { %6491 = vst [vmem:[#allocation22_spill] sm:$0xff] %v5019_v9 }
 0x4d7   :  { %v3330_v6 = vmul.f32 -1.442695, %v1423_v55  ;;  %6495 = vst [vmem:[#allocation53_spill] sm:$0xff] %v5050_v40 }
 0x4d8   :  { %v3465_v56 = vpop.eup %3464 }
 0x4d9   :  { %v3467_v19 = vpop.eup %3466  ;;  %v4972_v21 = vadd.f32 1.0, %v3465_v56  ;;  %3468 = vpow2.f32 %v3330_v6 }
 0x4da   :  { %v4974_v27 = vadd.f32 1.0, %v3467_v19 }
 0x4db   :  { %3470 = vrcp.f32 %v4972_v21  ;;  %v1439_v42 = vand.u32 2147483648, %v4972_v21  ;;  %v1437_v44 = vand.u32 2147483647, %v4972_v21  ;;  %vm1433_vm11 = vweird.f32 %v4972_v21 }
 0x4dc   :  { %3472 = vrcp.f32 %v4974_v27  ;;  %v1458_v43 = vand.u32 2147483648, %v4974_v27  ;;  %v1456_v46 = vand.u32 2147483647, %v4974_v27  ;;  %vm1452_vm12 = vweird.f32 %v4974_v27 }
 0x4dd   :  { %v1440_v51 = vor.u32 1.1754944e-38, %v1439_v42  ;;  %vm1438_vm15 = vcmp.eq.f32.partialorder %v1437_v44, 8.507059e+37  ;;  %v5084_v42 = vld [vmem:[#allocation11 + $0x158] sm:$0xff]  ;;  %v5088_v44 = vld [vmem:[#allocation11 + $0x150] sm:$0xff] }
 0x4de   :  { %v1459_v55 = vor.u32 1.1754944e-38, %v1458_v43  ;;  %vm1457_vm0 = vcmp.eq.f32.partialorder %v1456_v46, 8.507059e+37 }
 0x4df   :  { %v3469_v16 = vpop.eup %3468 }
 0x4e0   :  { %v1466_v25 = vadd.f32 1.0, %v3469_v16  ;;  %v5043_v16 = vld [vmem:[#allocation11 + $0x1d0] sm:$0xff] }
 0x4e1   :  { %v3471_v60 = vpop.eup %3470 }
 0x4e2   :  { %v3473_v59 = vpop.eup %3472  ;;  %v1429_v38 = vmul.f32 %v3471_v60, %v4972_v21  ;;  %3474 = vrcp.f32 %v1466_v25  ;;  %vm1434_vm9 = vweird.f32 %v3471_v60  ;;  %v1478_v33 = vand.u32 2147483648, %v1466_v25 }
 0x4e3   :  { %v1448_v34 = vmul.f32 %v3473_v59, %v4974_v27  ;;  %3476 = vtanh.f32 %v1422_v8  ;;  %vm1453_vm10 = vweird.f32 %v3473_v59  ;;  %vm1435_vm13 = vmor %vm1433_vm11, %vm1434_vm9  ;;  %vm1472_vm2 = vweird.f32 %v1466_v25  ;;  %v6496_v8 = vld [vmem:[#allocation68_spill] sm:$0xff] }
 0x4e4   :  { %v1430_v39 = vsub.f32 1.0, %v1429_v38  ;;  %vm1454_vm14 = vmor %vm1452_vm12, %vm1453_vm10  ;;  %v1476_v19 = vand.u32 2147483647, %v1466_v25  ;;  %v1479_v22 = vor.u32 1.1754944e-38, %v1478_v33  ;;  %v6497_v38 = vld [vmem:[#allocation69_spill] sm:$0xff]  ;;  %v5130_v33 = vld [vmem:[#allocation11 + $0xa0] sm:$0xff] }
 0x4e5   :  { %v1449_v41 = vsub.f32 1.0, %v1448_v34  ;;  %v280_v34 = vadd.f32 %v6497_v38, %v6476_v54  ;;  %v5095_v54 = vld [vmem:[#allocation11 + $0x138] sm:$0xff]  ;;  %6500 = vst [vmem:[#allocation56_spill] sm:$0xff] %v5130_v33 }
 0x4e6   :  { %v1431_v4 = vmul.f32 %v3471_v60, %v1430_v39  ;;  %vm1477_vm4 = vcmp.eq.f32.partialorder %v1476_v19, 8.507059e+37  ;;  %v5080_v39 = vld [vmem:[#allocation11 + $0x140] sm:$0xff]  ;;  %v5132_v19 = vld [vmem:[#allocation11 + $0xa8] sm:$0xff] }
 0x4e7   :  { %v1450_v45 = vmul.f32 %v3473_v59, %v1449_v41  ;;  %v5082_v41 = vld [vmem:[#allocation11 + $0x148] sm:$0xff]  ;;  %6501 = vst [vmem:[#allocation55_spill] sm:$0xff] %v5132_v19 }
 0x4e8   :  { %v3475_v48 = vpop.eup %3474  ;;  %v1432_v49 = vadd.f32 %v3471_v60, %v1431_v4 }
 0x4e9   :  { %v1451_v52 = vadd.f32 %v3473_v59, %v1450_v45  ;;  %v1468_v53 = vmul.f32 %v3475_v48, %v1466_v25  ;;  %v3477_v47 = vpop.eup %3476  ;;  %vm1473_vm1 = vweird.f32 %v3475_v48  ;;  %v5062_v25 = vld [vmem:[#allocation11 + $0x198] sm:$0xff] }
 0x4ea   :  { %v1436_v3 = vsel %vm1435_vm13, %v3471_v60, %v1432_v49  ;;  %vm1474_vm3 = vmor %vm1472_vm2, %vm1473_vm1  ;;  %v5072_v60 = vld [vmem:[#allocation11 + $0x170] sm:$0xff] }
 0x4eb   :  { %v1441_v58 = vsel %vm1438_vm15, %v1440_v51, %v1436_v3  ;;  %v1455_v0 = vsel %vm1454_vm14, %v3473_v59, %v1451_v52  ;;  %v1469_v6 = vsub.f32 1.0, %v1468_v53  ;;  %v239_v59 = vadd.f32 %v6496_v8, %v6474_v61  ;;  %v5090_v61 = vld [vmem:[#allocation11 + $0x120] sm:$0xff]  ;;  %v5100_v49 = vld [vmem:[#allocation11 + $0x130] sm:$0xff] }
 0x4ec   :  { %v1460_v57 = vsel %vm1457_vm0, %v1459_v55, %v1455_v0  ;;  %v1483_v2 = vmul.f32 %v3477_v47, %v1441_v58  ;;  %v5102_v53 = vld [vmem:[#allocation11 + $0x100] sm:$0xff]  ;;  %v5104_v55 = vld [vmem:[#allocation11 + $0x108] sm:$0xff]  ;;  %v5114_v58 = vld [vmem:[#allocation11 + $0x118] sm:$0xff] }
 0x4ed   :  { %v1482_v29 = vmul.f32 %v1460_v57, %v4957_v63  ;;  %v1470_v56 = vmul.f32 %v3475_v48, %v1469_v6  ;;  %v6486_v63 = vld [vmem:[#allocation77_spill] sm:$0xff]  ;;  %v5110_v3 = vld [vmem:[#allocation11 + $0xe0] sm:$0xff]  ;;  %v5112_v47 = vld [vmem:[#allocation11 + $0xe8] sm:$0xff] }
 0x4ee   :  { %v5117_v0 = vld [vmem:[#allocation11 + $0xc0] sm:$0xff]  ;;  %v5119_v6 = vld [vmem:[#allocation11 + $0xc8] sm:$0xff]  ;;  %v5121_v57 = vld [vmem:[#allocation11 + $0xf8] sm:$0xff] }
 0x4ef   :  { %v4989_v5 = vadd.f32 %v1483_v2, %v1482_v29  ;;  %v1471_v1 = vadd.f32 %v3475_v48, %v1470_v56  ;;  %v6498_v2 = vld [vmem:[#allocation73_spill] sm:$0xff]  ;;  %v5127_v56 = vld [vmem:[#allocation11 + $0xd8] sm:$0xff]  ;;  %v5156_v8 = vld [vmem:[#allocation11 + $0x60] sm:$0xff] }
 0x4f0   :  { %v362_v29 = vadd.f32 %v6498_v2, %v6478_v18  ;;  %6499 = vst [vmem:[#allocation54_spill] sm:$0xff] %v5127_v56  ;;  %v5138_v18 = vld [vmem:[#allocation11 + $0xb8] sm:$0xff]  ;;  %v5184_v2 = vld [vmem:[#allocation11 + $0x20] sm:$0xff] }
 0x4f1   :  { %3478 = vtanh.f32 %v4989_v5  ;;  %v1475_v21 = vsel %vm1474_vm3, %v3475_v48, %v1471_v1  ;;  %v5092_v48 = vld [vmem:[#allocation11 + $0x128] sm:$0xff]  ;;  %6502 = vst [vmem:[#allocation57_spill] sm:$0xff] %v5138_v18 }
 0x4f2   :  { %v1480_v27 = vsel %vm1477_vm4, %v1479_v22, %v1475_v21  ;;  %v5134_v21 = vld [vmem:[#allocation11 + $0x110] sm:$0xff]  ;;  %6507 = vst [vmem:[#allocation28_spill] sm:$0xff] %v5156_v8 }
 0x4f3   :  { %6514 = vst [vmem:[#allocation34_spill] sm:$0xff] %v5184_v2 }
 0x4f7   :  { %v3479_v20 = vpop.eup %3478 }
 0x4f8   :  { %v1486_v23 = vmul.f32 %v3479_v20, %v1480_v27  ;;  %v5140_v20 = vld [vmem:[#allocation11 + $0xf0] sm:$0xff]  ;;  %v5144_v27 = vld [vmem:[#allocation11 + $0x80] sm:$0xff] }
 0x4f9   :  { %6503 = vst [vmem:[#allocation58_spill] sm:$0xff] %v5144_v27 }
 0x4fa   :  { %1512 = vmatmul.f32.vlgmr.msra.gmra.mxu0 %v1486_v23  ;;  %1532 = vmatmul.f32.vlgmr.msra.gmra.mxu1 %v1486_v23 }
 0x4fb   :  { %1552 = vmatmul.f32.vlgmr.msra.gmra.mxu2 %v1486_v23  ;;  %1572 = vmatmul.f32.vlgmr.msra.gmra.mxu3 %v1486_v23 }
 0x4fc   :  { %1997 = vmatpush.msra.mxu0 %v5004_v13  ;;  %2017 = vmatpush.msra.mxu1 %v5006_v11 }
 0x4fd   :  { %2057 = vmatpush.msra.mxu3 %v5014_v50  ;;  %2037 = vmatpush.msra.mxu2 %v5040_v26 }
 0x4fe   :  { %1998 = vmatpush.msra.mxu0 %v5008_v32  ;;  %2018 = vmatpush.msra.mxu1 %v5012_v15 }
 0x4ff   :  { %2058 = vmatpush.msra.mxu3 %v5021_v12  ;;  %2038 = vmatpush.msra.mxu2 %v5043_v16 }
 0x500   :  { %1999 = vmatpush.msra.mxu0 %v5017_v30  ;;  %2019 = vmatpush.msra.mxu1 %v5019_v9 }
 0x501   :  { %2039 = vmatpush.msra.mxu2 %v5048_v37 }
 0x502   :  { %1809 = vmatmul.f32.vlgmr.msrb.gmra.mxu0 %v6486_v63  ;;  %1850 = vmatmul.f32.vlgmr.msrb.gmra.mxu1 %v6486_v63 }
 0x503   :  { %1891 = vmatmul.f32.vlgmr.msrb.gmra.mxu2 %v6486_v63  ;;  %1932 = vmatmul.f32.vlgmr.msrb.gmra.mxu3 %v6486_v63 }
 0x504   :  { %2000 = vmatpush.msra.mxu0 %v5050_v40  ;;  %2020 = vmatpush.msra.mxu1 %v5052_v28 }
 0x505   :  { %2040 = vmatpush.msra.mxu2 %v5064_v35 }
 0x506   :  { %2021 = vmatpush.msra.mxu1 %v5060_v10 }
 0x507   :  { %2041 = vmatpush.msra.mxu2 %v5072_v60 }
 0x508   :  { %2022 = vmatpush.msra.mxu1 %v5082_v41 }
 0x509   :  { %2042 = vmatpush.msra.mxu2 %v5088_v44 }
 0x50a   :  { %1812 = vmatmul.f32.gmra.mxu0 %v6487_v24  ;;  %1853 = vmatmul.f32.gmra.mxu1 %v6487_v24 }
 0x50b   :  { %1894 = vmatmul.f32.gmra.mxu2 %v6487_v24  ;;  %1935 = vmatmul.f32.gmra.mxu3 %v6487_v24  ;;  %v5150_v24 = vld [vmem:[#allocation11 + $0x98] sm:$0xff] }
 0x50c   :  { %2023 = vmatpush.msra.mxu1 %v5092_v48  ;;  %2043 = vmatpush.msra.mxu2 %v5100_v49  ;;  %6505 = vst [vmem:[#allocation62_spill] sm:$0xff] %v5150_v24 }
 0x50e   :  { %2024 = vmatpush.msra.mxu1 %v5104_v55  ;;  %2044 = vmatpush.msra.mxu2 %v5134_v21 }
 0x510   :  { %2025 = vmatpush.msra.mxu1 %v5112_v47  ;;  %2045 = vmatpush.msra.mxu2 %v5140_v20 }
 0x512   :  { %1815 = vmatmul.f32.gmra.mxu0 %v6488_v14  ;;  %1856 = vmatmul.f32.gmra.mxu1 %v6488_v14 }
 0x513   :  { %1897 = vmatmul.f32.gmra.mxu2 %v6488_v14  ;;  %1938 = vmatmul.f32.gmra.mxu3 %v6488_v14  ;;  %v5152_v14 = vld [vmem:[#allocation11 + $0xd0] sm:$0xff] }
 0x514   :  { %2026 = vmatpush.msra.mxu1 %v5119_v6  ;;  %6506 = vst [vmem:[#allocation26_spill] sm:$0xff] %v5152_v14  ;;  %2046 = vmatpush.msra.mxu2 %v5152_v14 }
 0x516   :  { %2027 = vmatpush.msra.mxu1 %v5132_v19 }
 0x51a   :  { %1818 = vmatmul.f32.gmra.mxu0 %v6493_v36  ;;  %1859 = vmatmul.f32.gmra.mxu1 %v6493_v36 }
 0x51b   :  { %1900 = vmatmul.f32.gmra.mxu2 %v6493_v36  ;;  %1941 = vmatmul.f32.gmra.mxu3 %v6493_v36 }
 0x522   :  { %1821 = vmatmul.f32.gmra.mxu0 %v4878_v31  ;;  %1862 = vmatmul.f32.gmra.mxu1 %v4878_v31 }
 0x523   :  { %1903 = vmatmul.f32.gmra.mxu2 %v4878_v31  ;;  %1944 = vmatmul.f32.gmra.mxu3 %v4878_v31  ;;  %v5046_v31 = vld [vmem:[#allocation11 + $0x1b8] sm:$0xff] }
 0x524   :  { %6494 = vst [vmem:[#allocation23_spill] sm:$0xff] %v5046_v31  ;;  %2059 = vmatpush.msra.mxu3 %v5046_v31 }
 0x526   :  { %2060 = vmatpush.msra.mxu3 %v5062_v25 }
 0x528   :  { %2061 = vmatpush.msra.mxu3 %v5070_v7 }
 0x52a   :  { %1824 = vmatmul.f32.gmra.mxu0 %v4960_v62  ;;  %1865 = vmatmul.f32.gmra.mxu1 %v4960_v62 }
 0x52b   :  { %1906 = vmatmul.f32.gmra.mxu2 %v4960_v62  ;;  %1947 = vmatmul.f32.gmra.mxu3 %v4960_v62  ;;  %v5055_v62 = vld [vmem:[#allocation11 + $0x160] sm:$0xff] }
 0x52c   :  { %2001 = vmatpush.msra.mxu0 %v5055_v62  ;;  %2062 = vmatpush.msra.mxu3 %v5084_v42 }
 0x52e   :  { %2002 = vmatpush.msra.mxu0 %v5080_v39  ;;  %2063 = vmatpush.msra.mxu3 %v5095_v54 }
 0x530   :  { %2003 = vmatpush.msra.mxu0 %v5090_v61  ;;  %2064 = vmatpush.msra.mxu3 %v5114_v58 }
 0x532   :  { %1827 = vmatmul.f32.gmra.mxu0 %v1486_v23  ;;  %1868 = vmatmul.f32.gmra.mxu1 %v1486_v23 }
 0x533   :  { %1909 = vmatmul.f32.gmra.mxu2 %v1486_v23  ;;  %1950 = vmatmul.f32.gmra.mxu3 %v1486_v23  ;;  %v5146_v23 = vld [vmem:[#allocation11 + $0x88] sm:$0xff] }
 0x534   :  { %2004 = vmatpush.msra.mxu0 %v5102_v53  ;;  %2065 = vmatpush.msra.mxu3 %v5121_v57  ;;  %6504 = vst [vmem:[#allocation59_spill] sm:$0xff] %v5146_v23 }
 0x535   :  { %2028 = vmatpush.msra.mxu1 %v5146_v23 }
 0x536   :  { %2005 = vmatpush.msra.mxu0 %v5110_v3  ;;  %2066 = vmatpush.msra.mxu3 %v5127_v56 }
 0x538   :  { %2006 = vmatpush.msra.mxu0 %v5117_v0  ;;  %2067 = vmatpush.msra.mxu3 %v5138_v18 }
 0x53a   :  { %2007 = vmatpush.msra.mxu0 %v5130_v33  ;;  %2068 = vmatpush.msra.mxu3 %v5150_v24  ;;  %v5208_v24 = vld [vmem:[#allocation11 + $0x18] sm:$0xff] }
 0x53b   :  { %6523 = vst [vmem:[#allocation42_spill] sm:$0xff] %v5208_v24 }
 0x53c   :  { %2008 = vmatpush.msra.mxu0 %v5144_v27 }
 0x53e   :  { %2009 = vmatpush.msra.mxu0 %v5156_v8 }
 0x577   :  { %v1513_v43 = vpop.f32.mrf.mxu0  ;;  %v1533_v4 = vpop.f32.mrf.mxu1 }
 0x578   :  { %v1576_v45 = vadd.f32 %v1513_v43, %v239_v59  ;;  %v1577_v46 = vadd.f32 %v1533_v4, %v280_v34  ;;  %v5158_v59 = vld [vmem:[#allocation11 + $0x68] sm:$0xff]  ;;  %v5164_v43 = vld [vmem:[#allocation11 + $0xb0] sm:$0xff]  ;;  %v5166_v4 = vld [vmem:[#allocation11 + $0x78] sm:$0xff] }
 0x579   :  { %6508 = vst [vmem:[#allocation27_spill] sm:$0xff] %v5158_v59  ;;  %2029 = vmatpush.msra.mxu1 %v5158_v59  ;;  %2047 = vmatpush.msra.mxu2 %v5164_v43  ;;  %v6520_v59 = vld [vmem:[#allocation75_spill] sm:$0xff] }
 0x57a   :  { %v3331_v51 = vmul.f32 -1.442695, %v1576_v45  ;;  %v3332_v52 = vmul.f32 -1.442695, %v1577_v46  ;;  %6509 = vst [vmem:[#allocation29_spill] sm:$0xff] %v5164_v43  ;;  %v5172_v46 = vld [vmem:[#allocation11 + $0x40] sm:$0xff]  ;;  %2069 = vmatpush.msra.mxu3 %v5166_v4  ;;  %v321_v8 = vadd.f32 %v6520_v59, %v6480_v17 }
 0x57b   :  { %6510 = vst [vmem:[#allocation30_spill] sm:$0xff] %v5166_v4  ;;  %2010 = vmatpush.msra.mxu0 %v5172_v46  ;;  %v5216_v17 = vld [vmem:[#allocation11 + $0x30] sm:$0xff] }
 0x57c   :  { %3480 = vpow2.f32 %v3331_v51  ;;  %6511 = vst [vmem:[#allocation32_spill] sm:$0xff] %v5172_v46  ;;  %v5174_v51 = vld [vmem:[#allocation11 + $0x48] sm:$0xff]  ;;  %v5206_v46 = vld [vmem:[#allocation11 + $0x38] sm:$0xff] }
 0x57d   :  { %3482 = vpow2.f32 %v3332_v52  ;;  %6512 = vst [vmem:[#allocation31_spill] sm:$0xff] %v5174_v51  ;;  %v5179_v52 = vld [vmem:[#allocation11 + $0x90] sm:$0xff]  ;;  %2030 = vmatpush.msra.mxu1 %v5174_v51  ;;  %2011 = vmatpush.msra.mxu0 %v5184_v2 }
 0x57e   :  { %v1573_v1 = vpop.f32.mrf.mxu3  ;;  %6513 = vst [vmem:[#allocation33_spill] sm:$0xff] %v5179_v52  ;;  %2048 = vmatpush.msra.mxu2 %v5179_v52  ;;  %v5204_v51 = vld [vmem:[#allocation11 + $0x50] sm:$0xff] }
 0x57f   :  { %v1579_v22 = vadd.f32 %v1573_v1, %v362_v29  ;;  %v5186_v29 = vld [vmem:[#allocation11 + $0x28] sm:$0xff]  ;;  %v5188_v1 = vld [vmem:[#allocation11 + $0x58] sm:$0xff]  ;;  %6521 = vst [vmem:[#allocation40_spill] sm:$0xff] %v5204_v51 }
 0x580   :  { %6515 = vst [vmem:[#allocation36_spill] sm:$0xff] %v5186_v29  ;;  %2070 = vmatpush.msra.mxu3 %v5188_v1  ;;  %2031 = vmatpush.msra.mxu1 %v5186_v29 }
 0x581   :  { %v3333_v63 = vmul.f32 -1.442695, %v1579_v22  ;;  %6516 = vst [vmem:[#allocation35_spill] sm:$0xff] %v5188_v1  ;;  %v5192_v22 = vld [vmem:[#allocation11 + $0x70] sm:$0xff] }
 0x582   :  { %v3481_v36 = vpop.eup %3480  ;;  %6517 = vst [vmem:[#allocation37_spill] sm:$0xff] %v5192_v22  ;;  %2049 = vmatpush.msra.mxu2 %v5192_v22  ;;  %2071 = vmatpush.msra.mxu3 %v5206_v46 }
 0x583   :  { %v3483_v38 = vpop.eup %3482  ;;  %v5160_v34 = vadd.f32 1.0, %v3481_v36  ;;  %3484 = vpow2.f32 %v3333_v63  ;;  %v1553_v63 = vpop.f32.mrf.mxu2  ;;  %v5196_v36 = vld [vmem:[#allocation11] sm:$0xff]  ;;  %6522 = vst [vmem:[#allocation41_spill] sm:$0xff] %v5206_v46  ;;  %v5223_v46 = vld [vmem:[#allocation11 + $0x10] sm:$0xff] }
 0x584   :  { %v5168_v45 = vadd.f32 1.0, %v3483_v38  ;;  %6518 = vst [vmem:[#allocation38_spill] sm:$0xff] %v5196_v36  ;;  %v5198_v38 = vld [vmem:[#allocation11 + $0x8] sm:$0xff]  ;;  %v1578_v23 = vadd.f32 %v1553_v63, %v321_v8  ;;  %2012 = vmatpush.msra.mxu0 %v5196_v36  ;;  %2050 = vmatpush.msra.mxu2 %v5204_v51 }
 0x585   :  { %3486 = vrcp.f32 %v5160_v34  ;;  %6519 = vst [vmem:[#allocation39_spill] sm:$0xff] %v5198_v38  ;;  %2032 = vmatpush.msra.mxu1 %v5198_v38  ;;  %2072 = vmatpush.msra.mxu3 %v5208_v24  ;;  %v1595_v38 = vand.u32 2147483648, %v5160_v34  ;;  %vm1589_vm7 = vweird.f32 %v5160_v34 }
 0x586   :  { %3488 = vrcp.f32 %v5168_v45  ;;  %6524 = vst [vmem:[#allocation43_spill] sm:$0xff] %v5216_v17  ;;  %2150 = vmatpush.msrb.mxu0 %v5004_v13  ;;  %2051 = vmatpush.msra.mxu2 %v5216_v17  ;;  %v1614_v24 = vand.u32 2147483648, %v5168_v45  ;;  %v1593_v13 = vand.u32 2147483647, %v5160_v34  ;;  %vm1608_vm8 = vweird.f32 %v5168_v45 }
 0x587   :  { %6525 = vst [vmem:[#allocation44_spill] sm:$0xff] %v5223_v46  ;;  %2170 = vmatpush.msrb.mxu1 %v5006_v11  ;;  %2210 = vmatpush.msrb.mxu3 %v5014_v50 }
 0x588   :  { %2151 = vmatpush.msrb.mxu0 %v5008_v32  ;;  %2052 = vmatpush.msra.mxu2 %v5223_v46  ;;  %vm1594_vm11 = vcmp.eq.f32.partialorder %v1593_v13, 8.507059e+37 }
 0x589   :  { %v3485_v4 = vpop.eup %3484  ;;  %2171 = vmatpush.msrb.mxu1 %v5012_v15  ;;  %2211 = vmatpush.msrb.mxu3 %v5021_v12 }
 0x58a   :  { %v5210_v52 = vadd.f32 1.0, %v3485_v4  ;;  %2190 = vmatpush.msrb.mxu2 %v5040_v26  ;;  %2152 = vmatpush.msrb.mxu0 %v5017_v30 }
 0x58b   :  { %v3487_v1 = vpop.eup %3486  ;;  %2172 = vmatpush.msrb.mxu1 %v5019_v9  ;;  %2212 = vmatpush.msrb.mxu3 %v5046_v31 }
 0x58c   :  { %v3489_v59 = vpop.eup %3488  ;;  %v1585_v29 = vmul.f32 %v3487_v1, %v5160_v34  ;;  %3490 = vrcp.f32 %v5210_v52  ;;  %vm1590_vm5 = vweird.f32 %v3487_v1  ;;  %2191 = vmatpush.msrb.mxu2 %v5043_v16  ;;  %2153 = vmatpush.msrb.mxu0 %v5050_v40  ;;  %v1615_v34 = vor.u32 1.1754944e-38, %v1614_v24 }
 0x58d   :  { %v1604_v4 = vmul.f32 %v3489_v59, %v5168_v45  ;;  %3492 = vtanh.f32 %v1578_v23  ;;  %vm1609_vm6 = vweird.f32 %v3489_v59  ;;  %vm1591_vm9 = vmor %vm1589_vm7, %vm1590_vm5  ;;  %2173 = vmatpush.msrb.mxu1 %v5052_v28  ;;  %2213 = vmatpush.msrb.mxu3 %v5062_v25  ;;  %vm1628_vm14 = vweird.f32 %v5210_v52 }
 0x58e   :  { %v1586_v8 = vsub.f32 1.0, %v1585_v29  ;;  %vm1610_vm10 = vmor %vm1608_vm8, %vm1609_vm6  ;;  %2192 = vmatpush.msrb.mxu2 %v5048_v37  ;;  %2154 = vmatpush.msrb.mxu0 %v5055_v62 }
 0x58f   :  { %v1605_v63 = vsub.f32 1.0, %v1604_v4  ;;  %v1612_v4 = vand.u32 2147483647, %v5168_v45  ;;  %2174 = vmatpush.msrb.mxu1 %v5060_v10  ;;  %2214 = vmatpush.msrb.mxu3 %v5070_v7 }
 0x590   :  { %v1587_v36 = vmul.f32 %v3487_v1, %v1586_v8  ;;  %v1596_v8 = vor.u32 1.1754944e-38, %v1595_v38  ;;  %2193 = vmatpush.msrb.mxu2 %v5064_v35  ;;  %2155 = vmatpush.msrb.mxu0 %v5080_v39 }
 0x591   :  { %v1606_v29 = vmul.f32 %v3489_v59, %v1605_v63  ;;  %vm1613_vm12 = vcmp.eq.f32.partialorder %v1612_v4, 8.507059e+37  ;;  %2175 = vmatpush.msrb.mxu1 %v5082_v41  ;;  %2215 = vmatpush.msrb.mxu3 %v5084_v42  ;;  %v6526_v4 = vld [vmem:[#allocation59_spill] sm:$0xff] }
 0x592   :  { %v5239_v23 = vpop.eup %3490  ;;  %v1588_v15 = vadd.f32 %v3487_v1, %v1587_v36  ;;  %2194 = vmatpush.msrb.mxu2 %v5072_v60  ;;  %2156 = vmatpush.msrb.mxu0 %v5090_v61 }
 0x593   :  { %v1607_v63 = vadd.f32 %v3489_v59, %v1606_v29  ;;  %v1624_v12 = vmul.f32 %v5239_v23, %v5210_v52  ;;  %v3493_v45 = vpop.eup %3492  ;;  %vm1629_vm13 = vweird.f32 %v5239_v23  ;;  %2176 = vmatpush.msrb.mxu1 %v5092_v48  ;;  %2216 = vmatpush.msrb.mxu3 %v5095_v54 }
 0x594   :  { %v1592_v36 = vsel %vm1591_vm9, %v3487_v1, %v1588_v15  ;;  %2195 = vmatpush.msrb.mxu2 %v5088_v44  ;;  %2157 = vmatpush.msrb.mxu0 %v5102_v53  ;;  %vm1630_vm15 = vmor %vm1628_vm14, %vm1629_vm13 }
 0x595   :  { %v1597_v31 = vsel %vm1594_vm11, %v1596_v8, %v1592_v36  ;;  %v1611_v38 = vsel %vm1610_vm10, %v3489_v59, %v1607_v63  ;;  %v1625_v29 = vsub.f32 1.0, %v1624_v12  ;;  %2177 = vmatpush.msrb.mxu1 %v5104_v55  ;;  %2217 = vmatpush.msrb.mxu3 %v5114_v58  ;;  %v6528_v8 = vld [vmem:[#allocation33_spill] sm:$0xff]  ;;  %v6529_v63 = vld [vmem:[#allocation28_spill] sm:$0xff]  ;;  %v6531_v36 = vld [vmem:[#allocation30_spill] sm:$0xff] }
 0x596   :  { %v1616_v9 = vsel %vm1613_vm12, %v1615_v34, %v1611_v38  ;;  %v1639_v40 = vmul.f32 %v3493_v45, %v1597_v31  ;;  %2196 = vmatpush.msrb.mxu2 %v5100_v49  ;;  %2158 = vmatpush.msrb.mxu0 %v5110_v3  ;;  %v6530_v34 = vld [vmem:[#allocation27_spill] sm:$0xff]  ;;  %v6532_v45 = vld [vmem:[#allocation32_spill] sm:$0xff] }
 0x597   :  { %v1638_v13 = vmul.f32 %v1616_v9, %v4989_v5  ;;  %v1626_v15 = vmul.f32 %v5239_v23, %v1625_v29  ;;  %v1634_v5 = vand.u32 2147483648, %v5210_v52  ;;  %v1632_v9 = vand.u32 2147483647, %v5210_v52  ;;  %2178 = vmatpush.msrb.mxu1 %v5112_v47  ;;  %2218 = vmatpush.msrb.mxu3 %v5121_v57  ;;  %v6533_v38 = vld [vmem:[#allocation31_spill] sm:$0xff] }
 0x598   :  { %2197 = vmatpush.msrb.mxu2 %v5134_v21  ;;  %2159 = vmatpush.msrb.mxu0 %v5117_v0  ;;  %v6534_v29 = vld [vmem:[#allocation35_spill] sm:$0xff] }
 0x599   :  { %v1640_v12 = vadd.f32 %v1639_v40, %v1638_v13  ;;  %v1627_v31 = vadd.f32 %v5239_v23, %v1626_v15  ;;  %v1635_v24 = vor.u32 1.1754944e-38, %v1634_v5  ;;  %vm1633_vm0 = vcmp.eq.f32.partialorder %v1632_v9, 8.507059e+37  ;;  %2179 = vmatpush.msrb.mxu1 %v5119_v6  ;;  %2219 = vmatpush.msrb.mxu3 %v5127_v56  ;;  %v6536_v15 = vld [vmem:[#allocation36_spill] sm:$0xff]  ;;  %v6539_v5 = vld [vmem:[#allocation39_spill] sm:$0xff]  ;;  %v6540_v9 = vld [vmem:[#allocation42_spill] sm:$0xff] }
 0x59a   :  { %2198 = vmatpush.msrb.mxu2 %v5140_v20  ;;  %2160 = vmatpush.msrb.mxu0 %v5130_v33  ;;  %v6535_v13 = vmov 0.0  }
 0x59b   :  { %3494 = vtanh.f32 %v1640_v12  ;;  %v1631_v40 = vsel %vm1630_vm15, %v5239_v23, %v1627_v31  ;;  %2180 = vmatpush.msrb.mxu1 %v5132_v19  ;;  %2220 = vmatpush.msrb.mxu3 %v5138_v18  ;;  %v6527_v23 = vld [vmem:[#allocation62_spill] sm:$0xff]  ;;  %v6537_v12 = vld [vmem:[#allocation41_spill] sm:$0xff] }
 0x59c   :  { %v1636_v1 = vsel %vm1633_vm0, %v1635_v24, %v1631_v40  ;;  %2199 = vmatpush.msrb.mxu2 %v5152_v14  ;;  %2161 = vmatpush.msrb.mxu0 %v5144_v27  ;;  %v6538_v31 = vld [vmem:[#allocation38_spill] sm:$0xff]  ;;  %v6541_v40 = vld [vmem:[#allocation19_spill] sm:$0xff]  ;;  %v6542_v24 = vld [vmem:[#allocation21_spill] sm:$0xff] }
 0x59d   :  { %2181 = vmatpush.msrb.mxu1 %v6526_v4  ;;  %2221 = vmatpush.msrb.mxu3 %v6527_v23 }
 0x59e   :  { %2200 = vmatpush.msrb.mxu2 %v5164_v43  ;;  %2162 = vmatpush.msrb.mxu0 %v6529_v63 }
 0x59f   :  { %2182 = vmatpush.msrb.mxu1 %v6530_v34  ;;  %2222 = vmatpush.msrb.mxu3 %v6531_v36 }
 0x5a0   :  { %2201 = vmatpush.msrb.mxu2 %v6528_v8  ;;  %2163 = vmatpush.msrb.mxu0 %v6532_v45 }
 0x5a1   :  { %v3495_v52 = vpop.eup %3494  ;;  %2183 = vmatpush.msrb.mxu1 %v6533_v38  ;;  %2223 = vmatpush.msrb.mxu3 %v6534_v29 }
 0x5a2   :  { %v1642_v59 = vmul.f32 %v3495_v52, %v1636_v1  ;;  %2202 = vmatpush.msrb.mxu2 %v5192_v22  ;;  %2164 = vmatpush.msrb.mxu0 %v5184_v2  ;;  %v6543_v52 = vld [vmem:[#allocation24_spill] sm:$0xff]  ;;  %v6544_v1 = vld [vmem:[#allocation22_spill] sm:$0xff] }
 0x5a3   :  { %2184 = vmatpush.msrb.mxu1 %v6536_v15  ;;  %2224 = vmatpush.msrb.mxu3 %v6537_v12 }
 0x5a4   :  { %1830 = vmatmul.f32.gmra.mxu0 %v1642_v59  ;;  %1871 = vmatmul.f32.gmra.mxu1 %v1642_v59 }
 0x5a5   :  { %1912 = vmatmul.f32.gmra.mxu2 %v1642_v59  ;;  %1953 = vmatmul.f32.gmra.mxu3 %v1642_v59  ;;  %v6545_v59 = vld [vmem:[#allocation23_spill] sm:$0xff] }
 0x5a6   :  { %2203 = vmatpush.msrb.mxu2 %v5204_v51  ;;  %2165 = vmatpush.msrb.mxu0 %v6538_v31 }
 0x5a7   :  { %2185 = vmatpush.msrb.mxu1 %v6539_v5  ;;  %2225 = vmatpush.msrb.mxu3 %v6540_v9 }
 0x5a8   :  { %2204 = vmatpush.msrb.mxu2 %v5216_v17 }
 0x5aa   :  { %2205 = vmatpush.msrb.mxu2 %v5223_v46 }
 0x5ac   :  { %2013 = vmatmul.f32.vlgmr.msra.gmra.mxu0 %v6535_v13  ;;  %2033 = vmatmul.f32.vlgmr.msra.gmra.mxu1 %v6535_v13 }
 0x5ad   :  { %2053 = vmatmul.f32.vlgmr.msra.gmra.mxu2 %v6535_v13  ;;  %2073 = vmatmul.f32.vlgmr.msra.gmra.mxu3 %v6535_v13  ;;  %v6546_v13 = vld [vmem:[#allocation53_spill] sm:$0xff] }
 0x5ae   :  { %2305 = vmatpush.msra.mxu0 %v6541_v40  ;;  %2325 = vmatpush.msra.mxu1 %v5006_v11 }
 0x5af   :  { %2345 = vmatpush.msra.mxu2 %v5040_v26  ;;  %2365 = vmatpush.msra.mxu3 %v5014_v50 }
 0x5b0   :  { %2306 = vmatpush.msra.mxu0 %v5008_v32  ;;  %2326 = vmatpush.msra.mxu1 %v6542_v24 }
 0x5b1   :  { %2346 = vmatpush.msra.mxu2 %v5043_v16  ;;  %2366 = vmatpush.msra.mxu3 %v6543_v52 }
 0x5b2   :  { %2307 = vmatpush.msra.mxu0 %v5017_v30  ;;  %2327 = vmatpush.msra.mxu1 %v6544_v1 }
 0x5b3   :  { %2347 = vmatpush.msra.mxu2 %v5048_v37  ;;  %2367 = vmatpush.msra.mxu3 %v6545_v59 }
 0x5b4   :  { %2308 = vmatpush.msra.mxu0 %v6546_v13  ;;  %2328 = vmatpush.msra.mxu1 %v5052_v28 }
 0x5b5   :  { %2348 = vmatpush.msra.mxu2 %v5064_v35  ;;  %2368 = vmatpush.msra.mxu3 %v5062_v25 }
 0x5b6   :  { %2309 = vmatpush.msra.mxu0 %v5055_v62  ;;  %2329 = vmatpush.msra.mxu1 %v5060_v10 }
 0x5b7   :  { %2349 = vmatpush.msra.mxu2 %v5072_v60  ;;  %2369 = vmatpush.msra.mxu3 %v5070_v7 }
 0x5b8   :  { %2310 = vmatpush.msra.mxu0 %v5080_v39  ;;  %2330 = vmatpush.msra.mxu1 %v5082_v41 }
 0x5b9   :  { %2350 = vmatpush.msra.mxu2 %v5088_v44  ;;  %2370 = vmatpush.msra.mxu3 %v5084_v42 }
 0x5ba   :  { %2311 = vmatpush.msra.mxu0 %v5090_v61  ;;  %2331 = vmatpush.msra.mxu1 %v5092_v48 }
 0x5bb   :  { %2351 = vmatpush.msra.mxu2 %v5100_v49  ;;  %2371 = vmatpush.msra.mxu3 %v5095_v54 }
 0x5bc   :  { %2312 = vmatpush.msra.mxu0 %v5102_v53  ;;  %2332 = vmatpush.msra.mxu1 %v5104_v55 }
 0x5bd   :  { %2352 = vmatpush.msra.mxu2 %v5134_v21  ;;  %2372 = vmatpush.msra.mxu3 %v5114_v58 }
 0x5be   :  { %2313 = vmatpush.msra.mxu0 %v5110_v3  ;;  %2333 = vmatpush.msra.mxu1 %v5112_v47 }
 0x5bf   :  { %2353 = vmatpush.msra.mxu2 %v5140_v20  ;;  %2373 = vmatpush.msra.mxu3 %v5121_v57 }
 0x5c0   :  { %2314 = vmatpush.msra.mxu0 %v5117_v0  ;;  %2334 = vmatpush.msra.mxu1 %v5119_v6 }
 0x5c1   :  { %2354 = vmatpush.msra.mxu2 %v5152_v14  ;;  %2374 = vmatpush.msra.mxu3 %v5127_v56 }
 0x5c2   :  { %2315 = vmatpush.msra.mxu0 %v5130_v33  ;;  %2335 = vmatpush.msra.mxu1 %v5132_v19 }
 0x5c3   :  { %2355 = vmatpush.msra.mxu2 %v5164_v43  ;;  %2375 = vmatpush.msra.mxu3 %v5138_v18 }
 0x5c4   :  { %2316 = vmatpush.msra.mxu0 %v5144_v27  ;;  %2336 = vmatpush.msra.mxu1 %v6526_v4 }
 0x5c5   :  { %2356 = vmatpush.msra.mxu2 %v6528_v8  ;;  %2376 = vmatpush.msra.mxu3 %v6527_v23 }
 0x5c6   :  { %2317 = vmatpush.msra.mxu0 %v6529_v63  ;;  %2337 = vmatpush.msra.mxu1 %v6530_v34 }
 0x5c7   :  { %2357 = vmatpush.msra.mxu2 %v5192_v22  ;;  %2377 = vmatpush.msra.mxu3 %v6531_v36 }
 0x5c8   :  { %2318 = vmatpush.msra.mxu0 %v6532_v45  ;;  %2338 = vmatpush.msra.mxu1 %v6533_v38  ;;  %v1810_v38 = vpop.f32.mrf.mxu0  ;;  %v1933_v45 = vpop.f32.mrf.mxu3 }
 0x5c9   :  { %2358 = vmatpush.msra.mxu2 %v5204_v51  ;;  %2378 = vmatpush.msra.mxu3 %v6534_v29  ;;  %v1851_v51 = vpop.f32.mrf.mxu1 }
 0x5ca   :  { %2319 = vmatpush.msra.mxu0 %v5184_v2  ;;  %2339 = vmatpush.msra.mxu1 %v6536_v15  ;;  %v1892_v15 = vpop.f32.mrf.mxu2 }
 0x5cb   :  { %2359 = vmatpush.msra.mxu2 %v5216_v17  ;;  %2379 = vmatpush.msra.mxu3 %v6537_v12 }
 0x5cc   :  { %2320 = vmatpush.msra.mxu0 %v6538_v31  ;;  %2340 = vmatpush.msra.mxu1 %v6539_v5 }
 0x5cd   :  { %2360 = vmatpush.msra.mxu2 %v5223_v46  ;;  %2380 = vmatpush.msra.mxu3 %v6540_v9 }
 0x5d0   :  { %v5379_v29 = vpop.f32.mrf.mxu0  ;;  %v5383_v36 = vpop.f32.mrf.mxu3 }
 0x5d1   :  { %6547 = vst [vmem:[#allocation45_spill] sm:$0xff] %v5379_v29  ;;  %v5381_v2 = vpop.f32.mrf.mxu1 }
 0x5d2   :  { %6548 = vst [vmem:[#allocation46_spill] sm:$0xff] %v5381_v2  ;;  %v5389_v31 = vpop.f32.mrf.mxu2 }
 0x5d3   :  { %6549 = vst [vmem:[#allocation48_spill] sm:$0xff] %v5383_v36 }
 0x5d4   :  { %6552 = vst [vmem:[#allocation50_spill] sm:$0xff] %v5389_v31 }
 0x5d8   :  { %v5385_v17 = vpop.f32.mrf.mxu0  ;;  %v5391_v5 = vpop.f32.mrf.mxu3 }
 0x5d9   :  { %6550 = vst [vmem:[#allocation47_spill] sm:$0xff] %v5385_v17  ;;  %v5387_v12 = vpop.f32.mrf.mxu1 }
 0x5da   :  { %6551 = vst [vmem:[#allocation49_spill] sm:$0xff] %v5387_v12  ;;  %v5397_v22 = vpop.f32.mrf.mxu2 }
 0x5db   :  { %6553 = vst [vmem:[#allocation52_spill] sm:$0xff] %v5391_v5 }
 0x5dc   :  { %6556 = vst [vmem:[#allocation71_spill] sm:$0xff] %v5397_v22 }
 0x5e0   :  { %v5393_v46 = vpop.f32.mrf.mxu0  ;;  %v5399_v29 = vpop.f32.mrf.mxu3 }
 0x5e1   :  { %6554 = vst [vmem:[#allocation70_spill] sm:$0xff] %v5393_v46  ;;  %v5395_v9 = vpop.f32.mrf.mxu1 }
 0x5e2   :  { %6555 = vst [vmem:[#allocation60_spill] sm:$0xff] %v5395_v9  ;;  %v5405_v36 = vpop.f32.mrf.mxu2 }
 0x5e3   :  { %6557 = vst [vmem:[#allocation61_spill] sm:$0xff] %v5399_v29 }
 0x5e4   :  { %6560 = vst [vmem:[#allocation76_spill] sm:$0xff] %v5405_v36 }
 0x5e8   :  { %v5401_v2 = vpop.f32.mrf.mxu0  ;;  %v5407_v17 = vpop.f32.mrf.mxu3 }
 0x5e9   :  { %6558 = vst [vmem:[#allocation74_spill] sm:$0xff] %v5401_v2  ;;  %v5403_v34 = vpop.f32.mrf.mxu1 }
 0x5ea   :  { %6559 = vst [vmem:[#allocation63_spill] sm:$0xff] %v5403_v34  ;;  %v5413_v5 = vpop.f32.mrf.mxu2 }
 0x5eb   :  { %6561 = vst [vmem:[#allocation66_spill] sm:$0xff] %v5407_v17  ;;  %v1775_v17 = vld [vmem:[%s6001_s6] sm:$0xf]  ;;  %s3886_s6 = smov [#allocation13]  }
 0x5ec   :  { %6564 = vst [vmem:[#allocation67_spill] sm:$0xff] %v5413_v5  ;;  %v5434_v5 = vperm.slane %v1775_v17, 1  ;;  %v5442_v8 = vperm.slane %v1775_v17, 3  ;;  %s3250_s27 = sshll.u32 %s3886_s6, 4  ;;  %s3251_s27 = int_to_ptr.vmem [resolvable:$true] %s3250_s27 }
 0x5ee   :  { %6573 = vst [vmem:[#allocation75_spill] sm:$0xff] %v5434_v5  ;;  %v1934_v4 = vadd.f32 %v1933_v45, %v5442_v8 }
 0x5ef   :  { %6576 = vst [vmem:[#allocation24_spill] sm:$0xff] %v5442_v8 }
 0x5f0   :  { %v5409_v12 = vpop.f32.mrf.mxu0  ;;  %v5415_v46 = vpop.f32.mrf.mxu3 }
 0x5f1   :  { %6562 = vst [vmem:[#allocation64_spill] sm:$0xff] %v5409_v12  ;;  %v5411_v31 = vpop.f32.mrf.mxu1 }
 0x5f2   :  { %6563 = vst [vmem:[#allocation65_spill] sm:$0xff] %v5411_v31  ;;  %v5421_v29 = vpop.f32.mrf.mxu2  ;;  %v5432_v31 = vperm.slane %v1775_v17, 0 }
 0x5f3   :  { %6565 = vst [vmem:[#allocation72_spill] sm:$0xff] %v5415_v46 }
 0x5f4   :  { %6568 = vst [vmem:[#allocation25_spill] sm:$0xff] %v5421_v29 }
 0x5f5   :  { %6572 = vst [vmem:[#allocation73_spill] sm:$0xff] %v5432_v31 }
 0x5f8   :  { %v5417_v9 = vpop.f32.mrf.mxu0  ;;  %v5423_v2 = vpop.f32.mrf.mxu3 }
 0x5f9   :  { %6566 = vst [vmem:[#allocation77_spill] sm:$0xff] %v5417_v9  ;;  %v5419_v22 = vpop.f32.mrf.mxu1  ;;  %v1811_v9 = vadd.f32 %v1810_v38, %v5432_v31 }
 0x5fa   :  { %6567 = vst [vmem:[#allocation20_spill] sm:$0xff] %v5419_v22  ;;  %v1852_v22 = vadd.f32 %v1851_v51, %v5434_v5  ;;  %v5438_v46 = vpop.f32.mrf.mxu2 }
 0x5fb   :  { %6569 = vst [vmem:[#allocation51_spill] sm:$0xff] %v5423_v2 }
 0x5fc   :  { %6574 = vst [vmem:[#allocation19_spill] sm:$0xff] %v5438_v46 }
 0x621   :  { %v5428_v34 = vpop.f32.mrf.mxu0  ;;  %v5430_v12 = vpop.f32.mrf.mxu1 }
 0x622   :  { %6570 = vst [vmem:[#allocation68_spill] sm:$0xff] %v5428_v34 }
 0x623   :  { %6571 = vst [vmem:[#allocation69_spill] sm:$0xff] %v5430_v12 }
 0x628   :  { %v5440_v29 = vpop.f32.mrf.mxu3  ;;  %v5445_v27 = vpop.f32.mrf.mxu2 }
 0x629   :  { %6575 = vst [vmem:[#allocation21_spill] sm:$0xff] %v5440_v29  ;;  %v2014_v2 = vpop.f32.mrf.mxu0  ;;  %v2034_v36 = vpop.f32.mrf.mxu1 }
 0x62a   :  { %v2077_v63 = vadd.f32 %v2014_v2, %v1811_v9  ;;  %v2078_v23 = vadd.f32 %v2034_v36, %v1852_v22  ;;  %6577 = vst [vmem:[#allocation22_spill] sm:$0xff] %v5445_v27  ;;  %v5447_v2 = vperm.slane %v1775_v17, 2 }
 0x62c   :  { %v3334_v34 = vmul.f32 -1.442695, %v2077_v63  ;;  %v3335_v12 = vmul.f32 -1.442695, %v2078_v23  ;;  %6578 = vst [vmem:[#allocation23_spill] sm:$0xff] %v5447_v2  ;;  %v1893_v63 = vadd.f32 %v1892_v15, %v5447_v2 }
 0x62e   :  { %3496 = vpow2.f32 %v3334_v34 }
 0x62f   :  { %3498 = vpow2.f32 %v3335_v12 }
 0x630   :  { %v2074_v38 = vpop.f32.mrf.mxu3  ;;  %v2054_v22 = vpop.f32.mrf.mxu2 }
 0x631   :  { %v2080_v51 = vadd.f32 %v2074_v38, %v1934_v4  ;;  %v2079_v45 = vadd.f32 %v2054_v22, %v1893_v63 }
 0x633   :  { %v3336_v5 = vmul.f32 -1.442695, %v2080_v51 }
 0x634   :  { %v3497_v46 = vpop.eup %3496 }
 0x635   :  { %v3499_v31 = vpop.eup %3498  ;;  %v2084_v29 = vadd.f32 1.0, %v3497_v46  ;;  %3500 = vpow2.f32 %v3336_v5 }
 0x636   :  { %v2103_v18 = vadd.f32 1.0, %v3499_v31 }
 0x637   :  { %3502 = vrcp.f32 %v2084_v29  ;;  %v2096_v46 = vand.u32 2147483648, %v2084_v29  ;;  %v2094_v5 = vand.u32 2147483647, %v2084_v29  ;;  %vm2090_vm3 = vweird.f32 %v2084_v29 }
 0x638   :  { %3504 = vrcp.f32 %v2103_v18  ;;  %v2115_v31 = vand.u32 2147483648, %v2103_v18  ;;  %v2113_v8 = vand.u32 2147483647, %v2103_v18  ;;  %vm2109_vm4 = vweird.f32 %v2103_v18 }
 0x639   :  { %v2097_v22 = vor.u32 1.1754944e-38, %v2096_v46  ;;  %vm2095_vm6 = vcmp.eq.f32.partialorder %v2094_v5, 8.507059e+37 }
 0x63a   :  { %v2116_v2 = vor.u32 1.1754944e-38, %v2115_v31  ;;  %vm2114_vm8 = vcmp.eq.f32.partialorder %v2113_v8, 8.507059e+37 }
 0x63b   :  { %v3501_v23 = vpop.eup %3500 }
 0x63c   :  { %v2123_v34 = vadd.f32 1.0, %v3501_v23 }
 0x63d   :  { %v3503_v36 = vpop.eup %3502 }
 0x63e   :  { %v3505_v12 = vpop.eup %3504  ;;  %v2086_v9 = vmul.f32 %v3503_v36, %v2084_v29  ;;  %3506 = vrcp.f32 %v2123_v34  ;;  %vm2091_vm1 = vweird.f32 %v3503_v36  ;;  %vm2129_vm10 = vweird.f32 %v2123_v34 }
 0x63f   :  { %v2105_v4 = vmul.f32 %v3505_v12, %v2103_v18  ;;  %3508 = vtanh.f32 %v2079_v45  ;;  %vm2110_vm2 = vweird.f32 %v3505_v12  ;;  %vm2092_vm5 = vmor %vm2090_vm3, %vm2091_vm1  ;;  %v2133_v29 = vand.u32 2147483647, %v2123_v34 }
 0x640   :  { %v2087_v38 = vsub.f32 1.0, %v2086_v9  ;;  %vm2111_vm7 = vmor %vm2109_vm4, %vm2110_vm2 }
 0x641   :  { %v2106_v51 = vsub.f32 1.0, %v2105_v4  ;;  %vm2134_vm12 = vcmp.eq.f32.partialorder %v2133_v29, 8.507059e+37 }
 0x642   :  { %v2088_v17 = vmul.f32 %v3503_v36, %v2087_v38 }
 0x643   :  { %v2107_v27 = vmul.f32 %v3505_v12, %v2106_v51 }
 0x644   :  { %v3507_v43 = vpop.eup %3506  ;;  %v2089_v15 = vadd.f32 %v3503_v36, %v2088_v17 }
 0x645   :  { %v2108_v23 = vadd.f32 %v3505_v12, %v2107_v27  ;;  %v2125_v63 = vmul.f32 %v3507_v43, %v2123_v34  ;;  %v3509_v45 = vpop.eup %3508  ;;  %vm2130_vm9 = vweird.f32 %v3507_v43  ;;  %v2135_v27 = vand.u32 2147483648, %v2123_v34 }
 0x646   :  { %v2093_v9 = vsel %vm2092_vm5, %v3503_v36, %v2089_v15  ;;  %vm2131_vm11 = vmor %vm2129_vm10, %vm2130_vm9 }
 0x647   :  { %v2098_v4 = vsel %vm2095_vm6, %v2097_v22, %v2093_v9  ;;  %v2112_v38 = vsel %vm2111_vm7, %v3505_v12, %v2108_v23  ;;  %v2126_v19 = vsub.f32 1.0, %v2125_v63  ;;  %v2136_v12 = vor.u32 1.1754944e-38, %v2135_v27  ;;  %v6611_v9 = vld [vmem:[#allocation23_spill] sm:$0xff] }
 0x648   :  { %v2117_v51 = vsel %vm2114_vm8, %v2116_v2, %v2112_v38  ;;  %v2140_v33 = vmul.f32 %v3509_v45, %v2098_v4  ;;  %v6612_v45 = vld [vmem:[#allocation50_spill] sm:$0xff] }
 0x649   :  { %v2139_v56 = vmul.f32 0.0, %v2117_v51  ;;  %v2127_v14 = vmul.f32 %v3507_v43, %v2126_v19  ;;  %v1896_v4 = vadd.f32 %v6612_v45, %v6611_v9  ;;  %v5591_v45 = vld [vmem:[#allocation11 + $0x140] sm:$0xff] }
 0x64b   :  { %v5450_v17 = vadd.f32 %v2140_v33, %v2139_v56  ;;  %v2128_v18 = vadd.f32 %v3507_v43, %v2127_v14  ;;  %v6608_v56 = vld [vmem:[#allocation46_spill] sm:$0xff] }
 0x64d   :  { %3510 = vtanh.f32 %v5450_v17  ;;  %2145 = vst [vmem:[#allocation13] sm:$0xff] %v5450_v17  ;;  %v2132_v36 = vsel %vm2131_vm11, %v3507_v43, %v2128_v18 }
 0x64e   :  { %v2137_v2 = vsel %vm2134_vm12, %v2136_v12, %v2132_v36 }
 0x653   :  { %v3511_v8 = vpop.eup %3510 }
 0x654   :  { %v2143_v46 = vmul.f32 %v3511_v8, %v2137_v2 }
 0x656   :  { %2144 = vst [vmem:[#allocation12] sm:$0xff] %v2143_v46  ;;  %2166 = vmatmul.f32.vlgmr.msrb.gmra.mxu0 %v2143_v46  ;;  %2186 = vmatmul.f32.vlgmr.msrb.gmra.mxu1 %v2143_v46 }
 0x657   :  { %2206 = vmatmul.f32.vlgmr.msrb.gmra.mxu2 %v2143_v46  ;;  %2226 = vmatmul.f32.vlgmr.msrb.gmra.mxu3 %v2143_v46 }
 0x658   :  { %2460 = vmatpush.msrb.mxu0 %v6541_v40  ;;  %2480 = vmatpush.msrb.mxu1 %v5006_v11  ;;  %v6579_v11 = vld [vmem:[#allocation26_spill] sm:$0xff] }
 0x659   :  { %2500 = vmatpush.msrb.mxu2 %v5040_v26  ;;  %2520 = vmatpush.msrb.mxu3 %v5014_v50  ;;  %v6581_v50 = vld [vmem:[#allocation56_spill] sm:$0xff]  ;;  %v6583_v26 = vld [vmem:[#allocation29_spill] sm:$0xff] }
 0x65a   :  { %2461 = vmatpush.msrb.mxu0 %v5008_v32  ;;  %2481 = vmatpush.msrb.mxu1 %v6542_v24  ;;  %v6580_v32 = vld [vmem:[#allocation54_spill] sm:$0xff]  ;;  %v6609_v24 = vld [vmem:[#allocation24_spill] sm:$0xff] }
 0x65b   :  { %2501 = vmatpush.msrb.mxu2 %v5043_v16  ;;  %2521 = vmatpush.msrb.mxu3 %v6543_v52  ;;  %v6584_v16 = vld [vmem:[#allocation57_spill] sm:$0xff]  ;;  %v6610_v52 = vld [vmem:[#allocation48_spill] sm:$0xff] }
 0x65c   :  { %2462 = vmatpush.msrb.mxu0 %v5017_v30  ;;  %2482 = vmatpush.msrb.mxu1 %v6544_v1  ;;  %v6582_v30 = vld [vmem:[#allocation55_spill] sm:$0xff]  ;;  %v1937_v1 = vadd.f32 %v6610_v52, %v6609_v24  ;;  %v5558_v52 = vld [vmem:[#allocation11 + $0x1a8] sm:$0xff] }
 0x65d   :  { %2502 = vmatpush.msrb.mxu2 %v5048_v37  ;;  %2522 = vmatpush.msrb.mxu3 %v6545_v59  ;;  %v6585_v37 = vld [vmem:[#allocation58_spill] sm:$0xff] }
 0x65e   :  { %2463 = vmatpush.msrb.mxu0 %v6546_v13  ;;  %2483 = vmatpush.msrb.mxu1 %v5052_v28  ;;  %v6586_v28 = vld [vmem:[#allocation59_spill] sm:$0xff] }
 0x65f   :  { %2503 = vmatpush.msrb.mxu2 %v5064_v35  ;;  %2523 = vmatpush.msrb.mxu3 %v5062_v25  ;;  %v6589_v25 = vld [vmem:[#allocation28_spill] sm:$0xff]  ;;  %v6590_v35 = vld [vmem:[#allocation27_spill] sm:$0xff] }
 0x660   :  { %2464 = vmatpush.msrb.mxu0 %v5055_v62  ;;  %2484 = vmatpush.msrb.mxu1 %v5060_v10  ;;  %v6587_v62 = vld [vmem:[#allocation33_spill] sm:$0xff]  ;;  %v6588_v10 = vld [vmem:[#allocation62_spill] sm:$0xff] }
 0x661   :  { %2504 = vmatpush.msrb.mxu2 %v5072_v60  ;;  %2524 = vmatpush.msrb.mxu3 %v5070_v7  ;;  %v6591_v7 = vld [vmem:[#allocation37_spill] sm:$0xff]  ;;  %v6592_v60 = vld [vmem:[#allocation30_spill] sm:$0xff] }
 0x662   :  { %2465 = vmatpush.msrb.mxu0 %v5080_v39  ;;  %2485 = vmatpush.msrb.mxu1 %v5082_v41  ;;  %v6593_v39 = vld [vmem:[#allocation32_spill] sm:$0xff]  ;;  %v6594_v41 = vld [vmem:[#allocation31_spill] sm:$0xff] }
 0x663   :  { %2505 = vmatpush.msrb.mxu2 %v5088_v44  ;;  %2525 = vmatpush.msrb.mxu3 %v5084_v42  ;;  %v6595_v42 = vld [vmem:[#allocation40_spill] sm:$0xff]  ;;  %v6596_v44 = vld [vmem:[#allocation35_spill] sm:$0xff] }
 0x664   :  { %2466 = vmatpush.msrb.mxu0 %v5090_v61  ;;  %2486 = vmatpush.msrb.mxu1 %v5092_v48  ;;  %v6597_v61 = vld [vmem:[#allocation34_spill] sm:$0xff]  ;;  %v6598_v48 = vld [vmem:[#allocation36_spill] sm:$0xff] }
 0x665   :  { %2506 = vmatpush.msrb.mxu2 %v5100_v49  ;;  %2526 = vmatpush.msrb.mxu3 %v5095_v54  ;;  %v6599_v54 = vld [vmem:[#allocation43_spill] sm:$0xff]  ;;  %v6600_v49 = vld [vmem:[#allocation41_spill] sm:$0xff] }
 0x666   :  { %2467 = vmatpush.msrb.mxu0 %v5102_v53  ;;  %2487 = vmatpush.msrb.mxu1 %v5104_v55  ;;  %v6601_v53 = vld [vmem:[#allocation38_spill] sm:$0xff]  ;;  %v6602_v55 = vld [vmem:[#allocation39_spill] sm:$0xff] }
 0x667   :  { %2507 = vmatpush.msrb.mxu2 %v5134_v21  ;;  %2527 = vmatpush.msrb.mxu3 %v5114_v58  ;;  %v6605_v58 = vld [vmem:[#allocation73_spill] sm:$0xff] }
 0x668   :  { %2468 = vmatpush.msrb.mxu0 %v5110_v3  ;;  %2488 = vmatpush.msrb.mxu1 %v5112_v47  ;;  %v6603_v3 = vld [vmem:[#allocation44_spill] sm:$0xff]  ;;  %v6604_v47 = vld [vmem:[#allocation42_spill] sm:$0xff] }
 0x669   :  { %2508 = vmatpush.msrb.mxu2 %v5140_v20  ;;  %2528 = vmatpush.msrb.mxu3 %v5121_v57  ;;  %v6607_v57 = vld [vmem:[#allocation75_spill] sm:$0xff] }
 0x66a   :  { %2469 = vmatpush.msrb.mxu0 %v5117_v0  ;;  %2489 = vmatpush.msrb.mxu1 %v5119_v6  ;;  %v6606_v0 = vld [vmem:[#allocation45_spill] sm:$0xff]  ;;  %v1855_v33 = vadd.f32 %v6608_v56, %v6607_v57  ;;  %v5534_v56 = vld [vmem:[#allocation11 + $0x1e8] sm:$0xff] }
 0x66b   :  { %2509 = vmatpush.msrb.mxu2 %v6579_v11  ;;  %2529 = vmatpush.msrb.mxu3 %v6580_v32  ;;  %v1814_v6 = vadd.f32 %v6606_v0, %v6605_v58 }
 0x66c   :  { %2470 = vmatpush.msrb.mxu0 %v6581_v50  ;;  %2490 = vmatpush.msrb.mxu1 %v6582_v30 }
 0x66d   :  { %2510 = vmatpush.msrb.mxu2 %v6583_v26  ;;  %2530 = vmatpush.msrb.mxu3 %v6584_v16 }
 0x66e   :  { %2471 = vmatpush.msrb.mxu0 %v6585_v37  ;;  %2491 = vmatpush.msrb.mxu1 %v6586_v28 }
 0x66f   :  { %2511 = vmatpush.msrb.mxu2 %v6587_v62  ;;  %2531 = vmatpush.msrb.mxu3 %v6588_v10 }
 0x670   :  { %2472 = vmatpush.msrb.mxu0 %v6589_v25  ;;  %2492 = vmatpush.msrb.mxu1 %v6590_v35 }
 0x671   :  { %2512 = vmatpush.msrb.mxu2 %v6591_v7  ;;  %2532 = vmatpush.msrb.mxu3 %v6592_v60 }
 0x672   :  { %2473 = vmatpush.msrb.mxu0 %v6593_v39  ;;  %2493 = vmatpush.msrb.mxu1 %v6594_v41 }
 0x673   :  { %2513 = vmatpush.msrb.mxu2 %v6595_v42  ;;  %2533 = vmatpush.msrb.mxu3 %v6596_v44 }
 0x674   :  { %2474 = vmatpush.msrb.mxu0 %v6597_v61  ;;  %2494 = vmatpush.msrb.mxu1 %v6598_v48 }
 0x675   :  { %2514 = vmatpush.msrb.mxu2 %v6599_v54  ;;  %2534 = vmatpush.msrb.mxu3 %v6600_v49 }
 0x676   :  { %2475 = vmatpush.msrb.mxu0 %v6601_v53  ;;  %2495 = vmatpush.msrb.mxu1 %v6602_v55 }
 0x677   :  { %2515 = vmatpush.msrb.mxu2 %v6603_v3  ;;  %2535 = vmatpush.msrb.mxu3 %v6604_v47 }
 0x6d3   :  { %v2167_v19 = vpop.f32.mrf.mxu0  ;;  %v2187_v21 = vpop.f32.mrf.mxu1 }
 0x6d4   :  { %v2230_v20 = vadd.f32 %v2167_v19, %v1814_v6  ;;  %v2231_v14 = vadd.f32 %v2187_v21, %v1855_v33  ;;  %v5537_v33 = vld [vmem:[#allocation11 + $0x1f0] sm:$0xff]  ;;  %v5540_v19 = vld [vmem:[#allocation11 + $0x1f8] sm:$0xff]  ;;  %v5543_v21 = vld [vmem:[#allocation11 + $0x1c0] sm:$0xff] }
 0x6d6   :  { %v3337_v43 = vmul.f32 -1.442695, %v2230_v20  ;;  %v3338_v40 = vmul.f32 -1.442695, %v2231_v14  ;;  %v5546_v20 = vld [vmem:[#allocation11 + $0x1c8] sm:$0xff]  ;;  %v5549_v14 = vld [vmem:[#allocation11 + $0x1d0] sm:$0xff] }
 0x6d8   :  { %3512 = vpow2.f32 %v3337_v43  ;;  %v5552_v43 = vld [vmem:[#allocation11 + $0x1d8] sm:$0xff] }
 0x6d9   :  { %3514 = vpow2.f32 %v3338_v40  ;;  %v5555_v40 = vld [vmem:[#allocation11 + $0x1a0] sm:$0xff] }
 0x6da   :  { %v2227_v59 = vpop.f32.mrf.mxu3  ;;  %v2207_v23 = vpop.f32.mrf.mxu2 }
 0x6db   :  { %v2233_v13 = vadd.f32 %v2227_v59, %v1937_v1  ;;  %v2232_v18 = vadd.f32 %v2207_v23, %v1896_v4  ;;  %v5561_v1 = vld [vmem:[#allocation11 + $0x1b0] sm:$0xff]  ;;  %v5564_v59 = vld [vmem:[#allocation11 + $0x1b8] sm:$0xff]  ;;  %v5594_v4 = vld [vmem:[#allocation11 + $0x148] sm:$0xff] }
 0x6dc   :  { %v5585_v23 = vld [vmem:[#allocation11 + $0x170] sm:$0xff] }
 0x6dd   :  { %v3339_v34 = vmul.f32 -1.442695, %v2233_v13  ;;  %v5567_v13 = vld [vmem:[#allocation11 + $0x180] sm:$0xff] }
 0x6de   :  { %v3513_v31 = vpop.eup %3512 }
 0x6df   :  { %v3515_v5 = vpop.eup %3514  ;;  %v2237_v15 = vadd.f32 1.0, %v3513_v31  ;;  %3516 = vpow2.f32 %v3339_v34  ;;  %v5570_v34 = vld [vmem:[#allocation11 + $0x188] sm:$0xff]  ;;  %v5573_v31 = vld [vmem:[#allocation11 + $0x190] sm:$0xff] }
 0x6e0   :  { %v2256_v22 = vadd.f32 1.0, %v3515_v5  ;;  %v5576_v5 = vld [vmem:[#allocation11 + $0x198] sm:$0xff] }
 0x6e1   :  { %3518 = vrcp.f32 %v2237_v15  ;;  %v2249_v2 = vand.u32 2147483648, %v2237_v15  ;;  %v2247_v32 = vand.u32 2147483647, %v2237_v15  ;;  %vm2243_vm15 = vweird.f32 %v2237_v15 }
 0x6e2   :  { %3520 = vrcp.f32 %v2256_v22  ;;  %v2268_v46 = vand.u32 2147483648, %v2256_v22  ;;  %v2266_v30 = vand.u32 2147483647, %v2256_v22  ;;  %vm2262_vm0 = vweird.f32 %v2256_v22 }
 0x6e3   :  { %v2250_v37 = vor.u32 1.1754944e-38, %v2249_v2  ;;  %vm2248_vm3 = vcmp.eq.f32.partialorder %v2247_v32, 8.507059e+37  ;;  %v5621_v2 = vld [vmem:[#allocation11 + $0x110] sm:$0xff]  ;;  %v5630_v32 = vld [vmem:[#allocation11 + $0xe8] sm:$0xff] }
 0x6e4   :  { %v2269_v10 = vor.u32 1.1754944e-38, %v2268_v46  ;;  %vm2267_vm4 = vcmp.eq.f32.partialorder %v2266_v30, 8.507059e+37  ;;  %v5624_v46 = vld [vmem:[#allocation11 + $0x118] sm:$0xff] }
 0x6e5   :  { %v3517_v63 = vpop.eup %3516  ;;  %v5636_v30 = vld [vmem:[#allocation11 + $0xf8] sm:$0xff] }
 0x6e6   :  { %v2276_v38 = vadd.f32 1.0, %v3517_v63  ;;  %v5588_v63 = vld [vmem:[#allocation11 + $0x178] sm:$0xff] }
 0x6e7   :  { %v3519_v51 = vpop.eup %3518 }
 0x6e8   :  { %v3521_v27 = vpop.eup %3520  ;;  %v2239_v29 = vmul.f32 %v3519_v51, %v2237_v15  ;;  %3522 = vrcp.f32 %v2276_v38  ;;  %vm2244_vm13 = vweird.f32 %v3519_v51  ;;  %v2288_v49 = vand.u32 2147483648, %v2276_v38  ;;  %v5579_v15 = vld [vmem:[#allocation11 + $0x160] sm:$0xff] }
 0x6e9   :  { %v2258_v36 = vmul.f32 %v3521_v27, %v2256_v22  ;;  %3524 = vtanh.f32 %v2232_v18  ;;  %vm2263_vm14 = vweird.f32 %v3521_v27  ;;  %vm2245_vm1 = vmor %vm2243_vm15, %vm2244_vm13  ;;  %vm2282_vm6 = vweird.f32 %v2276_v38  ;;  %v5582_v22 = vld [vmem:[#allocation11 + $0x168] sm:$0xff]  ;;  %v5603_v18 = vld [vmem:[#allocation11 + $0x120] sm:$0xff] }
 0x6ea   :  { %v2240_v12 = vsub.f32 1.0, %v2239_v29  ;;  %vm2264_vm2 = vmor %vm2262_vm0, %vm2263_vm14  ;;  %v2286_v53 = vand.u32 2147483647, %v2276_v38  ;;  %v2289_v3 = vor.u32 1.1754944e-38, %v2288_v49  ;;  %v5609_v29 = vld [vmem:[#allocation11 + $0x130] sm:$0xff]  ;;  %v5687_v49 = vld [vmem:[#allocation11 + $0x40] sm:$0xff] }
 0x6eb   :  { %v2259_v8 = vsub.f32 1.0, %v2258_v36  ;;  %v5612_v36 = vld [vmem:[#allocation11 + $0x138] sm:$0xff]  ;;  %6627 = vst [vmem:[#allocation30_spill] sm:$0xff] %v5687_v49 }
 0x6ec   :  { %v2241_v11 = vmul.f32 %v3519_v51, %v2240_v12  ;;  %vm2287_vm8 = vcmp.eq.f32.partialorder %v2286_v53, 8.507059e+37  ;;  %v5615_v12 = vld [vmem:[#allocation11 + $0x100] sm:$0xff]  ;;  %v5690_v53 = vld [vmem:[#allocation11 + $0x48] sm:$0xff] }
 0x6ed   :  { %v2260_v50 = vmul.f32 %v3521_v27, %v2259_v8  ;;  %v5618_v8 = vld [vmem:[#allocation11 + $0x108] sm:$0xff]  ;;  %6628 = vst [vmem:[#allocation32_spill] sm:$0xff] %v5690_v53 }
 0x6ee   :  { %v3523_v26 = vpop.eup %3522  ;;  %v2242_v16 = vadd.f32 %v3519_v51, %v2241_v11  ;;  %v5627_v11 = vld [vmem:[#allocation11 + $0xe0] sm:$0xff] }
 0x6ef   :  { %v2261_v28 = vadd.f32 %v3521_v27, %v2260_v50  ;;  %v2278_v62 = vmul.f32 %v3523_v26, %v2276_v38  ;;  %v3525_v35 = vpop.eup %3524  ;;  %vm2283_vm5 = vweird.f32 %v3523_v26  ;;  %v5597_v38 = vld [vmem:[#allocation11 + $0x150] sm:$0xff] }
 0x6f0   :  { %v2246_v25 = vsel %vm2245_vm1, %v3519_v51, %v2242_v16  ;;  %vm2284_vm7 = vmor %vm2282_vm6, %vm2283_vm5  ;;  %v5600_v51 = vld [vmem:[#allocation11 + $0x158] sm:$0xff]  ;;  %v5633_v50 = vld [vmem:[#allocation11 + $0xf0] sm:$0xff] }
 0x6f1   :  { %v2251_v7 = vsel %vm2248_vm3, %v2250_v37, %v2246_v25  ;;  %v2265_v60 = vsel %vm2264_vm2, %v3521_v27, %v2261_v28  ;;  %v2279_v39 = vsub.f32 1.0, %v2278_v62  ;;  %v5606_v27 = vld [vmem:[#allocation11 + $0x128] sm:$0xff]  ;;  %v5645_v37 = vld [vmem:[#allocation11 + $0xd0] sm:$0xff]  ;;  %v5648_v28 = vld [vmem:[#allocation11 + $0xd8] sm:$0xff] }
 0x6f2   :  { %v2270_v41 = vsel %vm2267_vm4, %v2269_v10, %v2265_v60  ;;  %v2293_v42 = vmul.f32 %v3525_v35, %v2251_v7  ;;  %v5642_v16 = vld [vmem:[#allocation11 + $0xc8] sm:$0xff]  ;;  %6613 = vst [vmem:[#allocation53_spill] sm:$0xff] %v5645_v37  ;;  %v5651_v62 = vld [vmem:[#allocation11 + $0xa0] sm:$0xff]  ;;  %v5657_v25 = vld [vmem:[#allocation11 + $0xb0] sm:$0xff] }
 0x6f3   :  { %v2292_v44 = vmul.f32 %v2270_v41, %v5450_v17  ;;  %v2280_v61 = vmul.f32 %v3523_v26, %v2279_v39  ;;  %v5531_v17 = vld [vmem:[#allocation11 + $0x1e0] sm:$0xff]  ;;  %6614 = vst [vmem:[#allocation26_spill] sm:$0xff] %v5648_v28  ;;  %v5654_v10 = vld [vmem:[#allocation11 + $0xa8] sm:$0xff]  ;;  %v5660_v35 = vld [vmem:[#allocation11 + $0xb8] sm:$0xff] }
 0x6f4   :  { %6615 = vst [vmem:[#allocation54_spill] sm:$0xff] %v5651_v62  ;;  %v5663_v7 = vld [vmem:[#allocation11 + $0x80] sm:$0xff]  ;;  %v5666_v60 = vld [vmem:[#allocation11 + $0x88] sm:$0xff]  ;;  %v5669_v39 = vld [vmem:[#allocation11 + $0x90] sm:$0xff] }
 0x6f5   :  { %v5527_v48 = vadd.f32 %v2293_v42, %v2292_v44  ;;  %v2281_v54 = vadd.f32 %v3523_v26, %v2280_v61  ;;  %6616 = vst [vmem:[#allocation56_spill] sm:$0xff] %v5654_v10  ;;  %v5672_v41 = vld [vmem:[#allocation11 + $0x98] sm:$0xff]  ;;  %v5675_v42 = vld [vmem:[#allocation11 + $0x60] sm:$0xff]  ;;  %v5678_v44 = vld [vmem:[#allocation11 + $0x68] sm:$0xff] }
 0x6f6   :  { %6617 = vst [vmem:[#allocation55_spill] sm:$0xff] %v5657_v25  ;;  %v5681_v61 = vld [vmem:[#allocation11 + $0x70] sm:$0xff] }
 0x6f7   :  { %3526 = vtanh.f32 %v5527_v48  ;;  %2300 = vst [vmem:[#allocation13 + $0x8] sm:$0xff] %v5527_v48  ;;  %v2285_v55 = vsel %vm2284_vm7, %v3523_v26, %v2281_v54  ;;  %v5639_v26 = vld [vmem:[#allocation11 + $0xc0] sm:$0xff]  ;;  %v5684_v54 = vld [vmem:[#allocation11 + $0x78] sm:$0xff] }
 0x6f8   :  { %v2290_v0 = vsel %vm2287_vm8, %v2289_v3, %v2285_v55  ;;  %6618 = vst [vmem:[#allocation29_spill] sm:$0xff] %v5660_v35  ;;  %v5693_v55 = vld [vmem:[#allocation11 + $0x50] sm:$0xff]  ;;  %v5696_v3 = vld [vmem:[#allocation11 + $0x58] sm:$0xff] }
 0x6f9   :  { %6619 = vst [vmem:[#allocation57_spill] sm:$0xff] %v5663_v7 }
 0x6fa   :  { %6620 = vst [vmem:[#allocation58_spill] sm:$0xff] %v5666_v60 }
 0x6fb   :  { %6621 = vst [vmem:[#allocation59_spill] sm:$0xff] %v5669_v39 }
 0x6fc   :  { %6622 = vst [vmem:[#allocation33_spill] sm:$0xff] %v5672_v41 }
 0x6fd   :  { %v3527_v47 = vpop.eup %3526  ;;  %6623 = vst [vmem:[#allocation62_spill] sm:$0xff] %v5675_v42 }
 0x6fe   :  { %v2296_v6 = vmul.f32 %v3527_v47, %v2290_v0  ;;  %6624 = vst [vmem:[#allocation28_spill] sm:$0xff] %v5678_v44  ;;  %v5699_v47 = vld [vmem:[#allocation11 + $0x20] sm:$0xff]  ;;  %v5702_v0 = vld [vmem:[#allocation11 + $0x28] sm:$0xff] }
 0x6ff   :  { %6625 = vst [vmem:[#allocation27_spill] sm:$0xff] %v5681_v61 }
 0x700   :  { %2298 = vst [vmem:[#allocation12 + $0x8] sm:$0xff] %v2296_v6  ;;  %2321 = vmatmul.f32.vlgmr.msra.gmra.mxu0 %v2296_v6  ;;  %2341 = vmatmul.f32.vlgmr.msra.gmra.mxu1 %v2296_v6 }
 0x701   :  { %2361 = vmatmul.f32.vlgmr.msra.gmra.mxu2 %v2296_v6  ;;  %2381 = vmatmul.f32.vlgmr.msra.gmra.mxu3 %v2296_v6  ;;  %6626 = vst [vmem:[#allocation37_spill] sm:$0xff] %v5684_v54  ;;  %v5705_v6 = vld [vmem:[#allocation11 + $0x30] sm:$0xff] }
 0x702   :  { %2615 = vmatpush.msra.mxu0 %v5531_v17  ;;  %2635 = vmatpush.msra.mxu1 %v5534_v56  ;;  %6629 = vst [vmem:[#allocation31_spill] sm:$0xff] %v5693_v55 }
 0x703   :  { %2655 = vmatpush.msra.mxu2 %v5537_v33  ;;  %2675 = vmatpush.msra.mxu3 %v5540_v19  ;;  %6630 = vst [vmem:[#allocation40_spill] sm:$0xff] %v5696_v3 }
 0x704   :  { %2616 = vmatpush.msra.mxu0 %v5543_v21  ;;  %2636 = vmatpush.msra.mxu1 %v5546_v20  ;;  %6631 = vst [vmem:[#allocation35_spill] sm:$0xff] %v5699_v47 }
 0x705   :  { %2656 = vmatpush.msra.mxu2 %v5549_v14  ;;  %2676 = vmatpush.msra.mxu3 %v5552_v43  ;;  %6632 = vst [vmem:[#allocation34_spill] sm:$0xff] %v5702_v0 }
 0x706   :  { %2617 = vmatpush.msra.mxu0 %v5555_v40  ;;  %2637 = vmatpush.msra.mxu1 %v5558_v52  ;;  %6633 = vst [vmem:[#allocation36_spill] sm:$0xff] %v5705_v6 }
 0x707   :  { %2657 = vmatpush.msra.mxu2 %v5561_v1  ;;  %2677 = vmatpush.msra.mxu3 %v5564_v59 }
 0x708   :  { %2618 = vmatpush.msra.mxu0 %v5567_v13  ;;  %2638 = vmatpush.msra.mxu1 %v5570_v34 }
 0x709   :  { %2658 = vmatpush.msra.mxu2 %v5573_v31  ;;  %2678 = vmatpush.msra.mxu3 %v5576_v5 }
 0x70a   :  { %2619 = vmatpush.msra.mxu0 %v5579_v15  ;;  %2639 = vmatpush.msra.mxu1 %v5582_v22 }
 0x70b   :  { %2659 = vmatpush.msra.mxu2 %v5585_v23  ;;  %2679 = vmatpush.msra.mxu3 %v5588_v63 }
 0x70c   :  { %2620 = vmatpush.msra.mxu0 %v5591_v45  ;;  %2640 = vmatpush.msra.mxu1 %v5594_v4 }
 0x70d   :  { %2660 = vmatpush.msra.mxu2 %v5597_v38  ;;  %2680 = vmatpush.msra.mxu3 %v5600_v51 }
 0x70e   :  { %2621 = vmatpush.msra.mxu0 %v5603_v18  ;;  %2641 = vmatpush.msra.mxu1 %v5606_v27 }
 0x70f   :  { %2661 = vmatpush.msra.mxu2 %v5609_v29  ;;  %2681 = vmatpush.msra.mxu3 %v5612_v36 }
 0x710   :  { %2622 = vmatpush.msra.mxu0 %v5615_v12  ;;  %2642 = vmatpush.msra.mxu1 %v5618_v8 }
 0x711   :  { %2662 = vmatpush.msra.mxu2 %v5621_v2  ;;  %2682 = vmatpush.msra.mxu3 %v5624_v46 }
 0x712   :  { %2623 = vmatpush.msra.mxu0 %v5627_v11  ;;  %2643 = vmatpush.msra.mxu1 %v5630_v32 }
 0x713   :  { %2663 = vmatpush.msra.mxu2 %v5633_v50  ;;  %2683 = vmatpush.msra.mxu3 %v5636_v30 }
 0x714   :  { %2624 = vmatpush.msra.mxu0 %v5639_v26  ;;  %2644 = vmatpush.msra.mxu1 %v5642_v16 }
 0x715   :  { %2664 = vmatpush.msra.mxu2 %v5645_v37  ;;  %2684 = vmatpush.msra.mxu3 %v5648_v28 }
 0x716   :  { %2625 = vmatpush.msra.mxu0 %v5651_v62  ;;  %2645 = vmatpush.msra.mxu1 %v5654_v10 }
 0x717   :  { %2665 = vmatpush.msra.mxu2 %v5657_v25  ;;  %2685 = vmatpush.msra.mxu3 %v5660_v35 }
 0x718   :  { %2626 = vmatpush.msra.mxu0 %v5663_v7  ;;  %2646 = vmatpush.msra.mxu1 %v5666_v60 }
 0x719   :  { %2666 = vmatpush.msra.mxu2 %v5669_v39  ;;  %2686 = vmatpush.msra.mxu3 %v5672_v41  ;;  %v6641_v39 = vld [vmem:[#allocation52_spill] sm:$0xff] }
 0x71a   :  { %2627 = vmatpush.msra.mxu0 %v5675_v42  ;;  %2647 = vmatpush.msra.mxu1 %v5678_v44 }
 0x71b   :  { %2667 = vmatpush.msra.mxu2 %v5681_v61  ;;  %2687 = vmatpush.msra.mxu3 %v5684_v54 }
 0x71c   :  { %2628 = vmatpush.msra.mxu0 %v5687_v49  ;;  %2648 = vmatpush.msra.mxu1 %v5690_v53  ;;  %v5708_v53 = vld [vmem:[#allocation11 + $0x38] sm:$0xff] }
 0x71d   :  { %2668 = vmatpush.msra.mxu2 %v5693_v55  ;;  %2688 = vmatpush.msra.mxu3 %v5696_v3  ;;  %6634 = vst [vmem:[#allocation43_spill] sm:$0xff] %v5708_v53  ;;  %v5711_v55 = vld [vmem:[#allocation11] sm:$0xff]  ;;  %v5714_v3 = vld [vmem:[#allocation11 + $0x8] sm:$0xff] }
 0x71e   :  { %2629 = vmatpush.msra.mxu0 %v5699_v47  ;;  %2649 = vmatpush.msra.mxu1 %v5702_v0  ;;  %6635 = vst [vmem:[#allocation41_spill] sm:$0xff] %v5711_v55  ;;  %v5717_v47 = vld [vmem:[#allocation11 + $0x10] sm:$0xff]  ;;  %v5720_v0 = vld [vmem:[#allocation11 + $0x18] sm:$0xff] }
 0x71f   :  { %2669 = vmatpush.msra.mxu2 %v5705_v6  ;;  %2689 = vmatpush.msra.mxu3 %v5708_v53  ;;  %6636 = vst [vmem:[#allocation38_spill] sm:$0xff] %v5714_v3  ;;  %v6639_v6 = vld [vmem:[#allocation47_spill] sm:$0xff]  ;;  %v6640_v53 = vld [vmem:[#allocation49_spill] sm:$0xff] }
 0x720   :  { %2630 = vmatpush.msra.mxu0 %v5711_v55  ;;  %2650 = vmatpush.msra.mxu1 %v5714_v3  ;;  %6637 = vst [vmem:[#allocation39_spill] sm:$0xff] %v5717_v47  ;;  %v1817_v49 = vadd.f32 %v6639_v6, %v6605_v58  ;;  %v1858_v54 = vadd.f32 %v6640_v53, %v6607_v57 }
 0x721   :  { %2670 = vmatpush.msra.mxu2 %v5717_v47  ;;  %6638 = vst [vmem:[#allocation44_spill] sm:$0xff] %v5720_v0  ;;  %2690 = vmatpush.msra.mxu3 %v5720_v0  ;;  %v1940_v47 = vadd.f32 %v6641_v39, %v6609_v24 }
 0x77d   :  { %v2322_v61 = vpop.f32.mrf.mxu0  ;;  %v2342_v55 = vpop.f32.mrf.mxu1 }
 0x77e   :  { %v2385_v44 = vadd.f32 %v2322_v61, %v1817_v49  ;;  %v2386_v42 = vadd.f32 %v2342_v55, %v1858_v54 }
 0x780   :  { %v3340_v41 = vmul.f32 -1.442695, %v2385_v44  ;;  %v3341_v3 = vmul.f32 -1.442695, %v2386_v42  ;;  %v6642_v44 = vld [vmem:[#allocation71_spill] sm:$0xff] }
 0x781   :  { %v1899_v42 = vadd.f32 %v6642_v44, %v6611_v9 }
 0x782   :  { %3528 = vpow2.f32 %v3340_v41 }
 0x783   :  { %3530 = vpow2.f32 %v3341_v3 }
 0x784   :  { %v2382_v60 = vpop.f32.mrf.mxu3  ;;  %v2362_v53 = vpop.f32.mrf.mxu2 }
 0x785   :  { %v2388_v7 = vadd.f32 %v2382_v60, %v1940_v47  ;;  %v2387_v49 = vadd.f32 %v2362_v53, %v1899_v42 }
 0x787   :  { %v3342_v0 = vmul.f32 -1.442695, %v2388_v7 }
 0x788   :  { %v3529_v35 = vpop.eup %3528 }
 0x789   :  { %v3531_v25 = vpop.eup %3530  ;;  %v2392_v6 = vadd.f32 1.0, %v3529_v35  ;;  %3532 = vpow2.f32 %v3342_v0 }
 0x78a   :  { %v2411_v58 = vadd.f32 1.0, %v3531_v25 }
 0x78b   :  { %3534 = vrcp.f32 %v2392_v6  ;;  %v2404_v47 = vand.u32 2147483648, %v2392_v6  ;;  %v2402_v0 = vand.u32 2147483647, %v2392_v6  ;;  %vm2398_vm11 = vweird.f32 %v2392_v6 }
 0x78c   :  { %3536 = vrcp.f32 %v2411_v58  ;;  %v2423_v35 = vand.u32 2147483648, %v2411_v58  ;;  %v2421_v57 = vand.u32 2147483647, %v2411_v58  ;;  %vm2417_vm12 = vweird.f32 %v2411_v58 }
 0x78d   :  { %v2405_v53 = vor.u32 1.1754944e-38, %v2404_v47  ;;  %vm2403_vm15 = vcmp.eq.f32.partialorder %v2402_v0, 8.507059e+37  ;;  %v6649_v0 = vld [vmem:[#allocation57_spill] sm:$0xff] }
 0x78e   :  { %vm2422_vm0 = vcmp.eq.f32.partialorder %v2421_v57, 8.507059e+37 }
 0x78f   :  { %v3533_v61 = vpop.eup %3532 }
 0x790   :  { %v2431_v41 = vadd.f32 1.0, %v3533_v61 }
 0x791   :  { %v3535_v54 = vpop.eup %3534 }
 0x792   :  { %v3537_v39 = vpop.eup %3536  ;;  %v2394_v55 = vmul.f32 %v3535_v54, %v2392_v6  ;;  %3538 = vrcp.f32 %v2431_v41  ;;  %vm2399_vm9 = vweird.f32 %v3535_v54  ;;  %vm2437_vm2 = vweird.f32 %v2431_v41 }
 0x793   :  { %v2413_v60 = vmul.f32 %v3537_v39, %v2411_v58  ;;  %3540 = vtanh.f32 %v2387_v49  ;;  %vm2418_vm10 = vweird.f32 %v3537_v39  ;;  %vm2400_vm13 = vmor %vm2398_vm11, %vm2399_vm9 }
 0x794   :  { %v2395_v7 = vsub.f32 1.0, %v2394_v55  ;;  %vm2419_vm14 = vmor %vm2417_vm12, %vm2418_vm10  ;;  %v2424_v55 = vor.u32 1.1754944e-38, %v2423_v35 }
 0x795   :  { %v2414_v3 = vsub.f32 1.0, %v2413_v60 }
 0x796   :  { %v2396_v25 = vmul.f32 %v3535_v54, %v2395_v7 }
 0x797   :  { %v2415_v24 = vmul.f32 %v3537_v39, %v2414_v3 }
 0x798   :  { %v3539_v10 = vpop.eup %3538  ;;  %v2397_v44 = vadd.f32 %v3535_v54, %v2396_v25 }
 0x799   :  { %v2416_v61 = vadd.f32 %v3537_v39, %v2415_v24  ;;  %v2433_v42 = vmul.f32 %v3539_v10, %v2431_v41  ;;  %v3541_v49 = vpop.eup %3540  ;;  %vm2438_vm1 = vweird.f32 %v3539_v10  ;;  %v2443_v24 = vand.u32 2147483648, %v2431_v41 }
 0x79a   :  { %v2401_v60 = vsel %vm2400_vm13, %v3535_v54, %v2397_v44  ;;  %v2441_v54 = vand.u32 2147483647, %v2431_v41  ;;  %vm2439_vm3 = vmor %vm2437_vm2, %vm2438_vm1  ;;  %v6648_v41 = vld [vmem:[#allocation29_spill] sm:$0xff]  ;;  %v6650_v44 = vld [vmem:[#allocation58_spill] sm:$0xff] }
 0x79b   :  { %v2406_v9 = vsel %vm2403_vm15, %v2405_v53, %v2401_v60  ;;  %v2420_v7 = vsel %vm2419_vm14, %v3537_v39, %v2416_v61  ;;  %v2434_v62 = vsub.f32 1.0, %v2433_v42  ;;  %v2444_v57 = vor.u32 1.1754944e-38, %v2443_v24  ;;  %v6651_v53 = vld [vmem:[#allocation59_spill] sm:$0xff]  ;;  %v6652_v61 = vld [vmem:[#allocation33_spill] sm:$0xff]  ;;  %v6653_v42 = vld [vmem:[#allocation62_spill] sm:$0xff] }
 0x79c   :  { %v2425_v3 = vsel %vm2422_vm0, %v2424_v55, %v2420_v7  ;;  %v2448_v28 = vmul.f32 %v3541_v49, %v2406_v9  ;;  %vm2442_vm4 = vcmp.eq.f32.partialorder %v2441_v54, 8.507059e+37  ;;  %v6654_v55 = vld [vmem:[#allocation28_spill] sm:$0xff]  ;;  %v6655_v60 = vld [vmem:[#allocation27_spill] sm:$0xff]  ;;  %v6656_v49 = vld [vmem:[#allocation37_spill] sm:$0xff] }
 0x79d   :  { %v2447_v37 = vmul.f32 %v2425_v3, %v5527_v48  ;;  %v2435_v25 = vmul.f32 %v3539_v10, %v2434_v62  ;;  %v6643_v48 = vld [vmem:[#allocation53_spill] sm:$0xff]  ;;  %v6646_v62 = vld [vmem:[#allocation56_spill] sm:$0xff]  ;;  %v6657_v7 = vld [vmem:[#allocation30_spill] sm:$0xff] }
 0x79e   :  { %v6658_v3 = vld [vmem:[#allocation32_spill] sm:$0xff]  ;;  %v6661_v24 = vld [vmem:[#allocation35_spill] sm:$0xff]  ;;  %v6662_v54 = vld [vmem:[#allocation34_spill] sm:$0xff] }
 0x79f   :  { %v5732_v6 = vadd.f32 %v2448_v28, %v2447_v37  ;;  %v2436_v58 = vadd.f32 %v3539_v10, %v2435_v25  ;;  %v6644_v37 = vld [vmem:[#allocation26_spill] sm:$0xff]  ;;  %v6659_v25 = vld [vmem:[#allocation31_spill] sm:$0xff] }
 0x7a0   :  { %v6645_v28 = vld [vmem:[#allocation54_spill] sm:$0xff] }
 0x7a1   :  { %3542 = vtanh.f32 %v5732_v6  ;;  %2455 = vst [vmem:[#allocation13 + $0x10] sm:$0xff] %v5732_v6  ;;  %v2440_v39 = vsel %vm2439_vm3, %v3539_v10, %v2436_v58  ;;  %v6647_v10 = vld [vmem:[#allocation55_spill] sm:$0xff]  ;;  %v6660_v58 = vld [vmem:[#allocation40_spill] sm:$0xff] }
 0x7a2   :  { %v2445_v9 = vsel %vm2442_vm4, %v2444_v57, %v2440_v39  ;;  %v6663_v39 = vld [vmem:[#allocation36_spill] sm:$0xff]  ;;  %v6664_v57 = vld [vmem:[#allocation43_spill] sm:$0xff] }
 0x7a7   :  { %v3543_v47 = vpop.eup %3542 }
 0x7a8   :  { %v2451_v35 = vmul.f32 %v3543_v47, %v2445_v9  ;;  %v6665_v47 = vld [vmem:[#allocation41_spill] sm:$0xff]  ;;  %v6666_v9 = vld [vmem:[#allocation38_spill] sm:$0xff] }
 0x7aa   :  { %2453 = vst [vmem:[#allocation12 + $0x10] sm:$0xff] %v2451_v35  ;;  %2476 = vmatmul.f32.vlgmr.msrb.gmra.mxu0 %v2451_v35  ;;  %2496 = vmatmul.f32.vlgmr.msrb.gmra.mxu1 %v2451_v35 }
 0x7ab   :  { %2516 = vmatmul.f32.vlgmr.msrb.gmra.mxu2 %v2451_v35  ;;  %2536 = vmatmul.f32.vlgmr.msrb.gmra.mxu3 %v2451_v35  ;;  %v6667_v35 = vld [vmem:[#allocation39_spill] sm:$0xff] }
 0x7ac   :  { %2770 = vmatpush.msrb.mxu0 %v5531_v17  ;;  %2790 = vmatpush.msrb.mxu1 %v5534_v56 }
 0x7ad   :  { %2810 = vmatpush.msrb.mxu2 %v5537_v33  ;;  %2830 = vmatpush.msrb.mxu3 %v5540_v19 }
 0x7ae   :  { %2771 = vmatpush.msrb.mxu0 %v5543_v21  ;;  %2791 = vmatpush.msrb.mxu1 %v5546_v20 }
 0x7af   :  { %2811 = vmatpush.msrb.mxu2 %v5549_v14  ;;  %2831 = vmatpush.msrb.mxu3 %v5552_v43 }
 0x7b0   :  { %2772 = vmatpush.msrb.mxu0 %v5555_v40  ;;  %2792 = vmatpush.msrb.mxu1 %v5558_v52 }
 0x7b1   :  { %2812 = vmatpush.msrb.mxu2 %v5561_v1  ;;  %2832 = vmatpush.msrb.mxu3 %v5564_v59 }
 0x7b2   :  { %2773 = vmatpush.msrb.mxu0 %v5567_v13  ;;  %2793 = vmatpush.msrb.mxu1 %v5570_v34 }
 0x7b3   :  { %2813 = vmatpush.msrb.mxu2 %v5573_v31  ;;  %2833 = vmatpush.msrb.mxu3 %v5576_v5 }
 0x7b4   :  { %2774 = vmatpush.msrb.mxu0 %v5579_v15  ;;  %2794 = vmatpush.msrb.mxu1 %v5582_v22 }
 0x7b5   :  { %2814 = vmatpush.msrb.mxu2 %v5585_v23  ;;  %2834 = vmatpush.msrb.mxu3 %v5588_v63 }
 0x7b6   :  { %2775 = vmatpush.msrb.mxu0 %v5591_v45  ;;  %2795 = vmatpush.msrb.mxu1 %v5594_v4 }
 0x7b7   :  { %2815 = vmatpush.msrb.mxu2 %v5597_v38  ;;  %2835 = vmatpush.msrb.mxu3 %v5600_v51 }
 0x7b8   :  { %2776 = vmatpush.msrb.mxu0 %v5603_v18  ;;  %2796 = vmatpush.msrb.mxu1 %v5606_v27 }
 0x7b9   :  { %2816 = vmatpush.msrb.mxu2 %v5609_v29  ;;  %2836 = vmatpush.msrb.mxu3 %v5612_v36 }
 0x7ba   :  { %2777 = vmatpush.msrb.mxu0 %v5615_v12  ;;  %2797 = vmatpush.msrb.mxu1 %v5618_v8 }
 0x7bb   :  { %2817 = vmatpush.msrb.mxu2 %v5621_v2  ;;  %2837 = vmatpush.msrb.mxu3 %v5624_v46 }
 0x7bc   :  { %2778 = vmatpush.msrb.mxu0 %v5627_v11  ;;  %2798 = vmatpush.msrb.mxu1 %v5630_v32 }
 0x7bd   :  { %2818 = vmatpush.msrb.mxu2 %v5633_v50  ;;  %2838 = vmatpush.msrb.mxu3 %v5636_v30 }
 0x7be   :  { %2779 = vmatpush.msrb.mxu0 %v5639_v26  ;;  %2799 = vmatpush.msrb.mxu1 %v5642_v16 }
 0x7bf   :  { %2819 = vmatpush.msrb.mxu2 %v6643_v48  ;;  %2839 = vmatpush.msrb.mxu3 %v6644_v37 }
 0x7c0   :  { %2780 = vmatpush.msrb.mxu0 %v6645_v28  ;;  %2800 = vmatpush.msrb.mxu1 %v6646_v62 }
 0x7c1   :  { %2820 = vmatpush.msrb.mxu2 %v6647_v10  ;;  %2840 = vmatpush.msrb.mxu3 %v6648_v41 }
 0x7c2   :  { %2781 = vmatpush.msrb.mxu0 %v6649_v0  ;;  %2801 = vmatpush.msrb.mxu1 %v6650_v44 }
 0x7c3   :  { %2821 = vmatpush.msrb.mxu2 %v6651_v53  ;;  %2841 = vmatpush.msrb.mxu3 %v6652_v61  ;;  %v6674_v53 = vld [vmem:[#allocation61_spill] sm:$0xff] }
 0x7c4   :  { %2782 = vmatpush.msrb.mxu0 %v6653_v42  ;;  %2802 = vmatpush.msrb.mxu1 %v6654_v55 }
 0x7c5   :  { %2822 = vmatpush.msrb.mxu2 %v6655_v60  ;;  %2842 = vmatpush.msrb.mxu3 %v6656_v49  ;;  %v6672_v60 = vld [vmem:[#allocation60_spill] sm:$0xff] }
 0x7c6   :  { %2783 = vmatpush.msrb.mxu0 %v6657_v7  ;;  %2803 = vmatpush.msrb.mxu1 %v6658_v3  ;;  %v6668_v7 = vld [vmem:[#allocation44_spill] sm:$0xff]  ;;  %v6669_v3 = vld [vmem:[#allocation73_spill] sm:$0xff] }
 0x7c7   :  { %2823 = vmatpush.msrb.mxu2 %v6659_v25  ;;  %2843 = vmatpush.msrb.mxu3 %v6660_v58  ;;  %v6670_v25 = vld [vmem:[#allocation70_spill] sm:$0xff]  ;;  %v6671_v58 = vld [vmem:[#allocation75_spill] sm:$0xff] }
 0x7c8   :  { %2784 = vmatpush.msrb.mxu0 %v6661_v24  ;;  %2804 = vmatpush.msrb.mxu1 %v6662_v54  ;;  %v1820_v49 = vadd.f32 %v6670_v25, %v6669_v3  ;;  %v1861_v24 = vadd.f32 %v6672_v60, %v6671_v58 }
 0x7c9   :  { %2824 = vmatpush.msrb.mxu2 %v6663_v39  ;;  %2844 = vmatpush.msrb.mxu3 %v6664_v57 }
 0x7ca   :  { %2785 = vmatpush.msrb.mxu0 %v6665_v47  ;;  %2805 = vmatpush.msrb.mxu1 %v6666_v9  ;;  %v6673_v47 = vld [vmem:[#allocation24_spill] sm:$0xff] }
 0x7cb   :  { %2825 = vmatpush.msrb.mxu2 %v6667_v35  ;;  %2845 = vmatpush.msrb.mxu3 %v6668_v7  ;;  %v1943_v9 = vadd.f32 %v6674_v53, %v6673_v47 }
 0x827   :  { %v2477_v55 = vpop.f32.mrf.mxu0  ;;  %v2497_v54 = vpop.f32.mrf.mxu1 }
 0x828   :  { %v2540_v42 = vadd.f32 %v2477_v55, %v1820_v49  ;;  %v2541_v39 = vadd.f32 %v2497_v54, %v1861_v24  ;;  %v6675_v49 = vld [vmem:[#allocation23_spill] sm:$0xff] }
 0x82a   :  { %v3343_v61 = vmul.f32 -1.442695, %v2540_v42  ;;  %v3344_v57 = vmul.f32 -1.442695, %v2541_v39  ;;  %v6676_v42 = vld [vmem:[#allocation76_spill] sm:$0xff] }
 0x82b   :  { %v1902_v24 = vadd.f32 %v6676_v42, %v6675_v49 }
 0x82c   :  { %3544 = vpow2.f32 %v3343_v61 }
 0x82d   :  { %3546 = vpow2.f32 %v3344_v57 }
 0x82e   :  { %v2537_v35 = vpop.f32.mrf.mxu3  ;;  %v2517_v60 = vpop.f32.mrf.mxu2 }
 0x82f   :  { %v2543_v44 = vadd.f32 %v2537_v35, %v1943_v9  ;;  %v2542_v39 = vadd.f32 %v2517_v60, %v1902_v24 }
 0x831   :  { %v3345_v7 = vmul.f32 -1.442695, %v2543_v44 }
 0x832   :  { %v3545_v0 = vpop.eup %3544 }
 0x833   :  { %v3547_v41 = vpop.eup %3546  ;;  %v2547_v25 = vadd.f32 1.0, %v3545_v0  ;;  %3548 = vpow2.f32 %v3345_v7 }
 0x834   :  { %v2566_v3 = vadd.f32 1.0, %v3547_v41 }
 0x835   :  { %3550 = vrcp.f32 %v2547_v25  ;;  %v2559_v47 = vand.u32 2147483648, %v2547_v25  ;;  %v2557_v7 = vand.u32 2147483647, %v2547_v25  ;;  %vm2553_vm7 = vweird.f32 %v2547_v25 }
 0x836   :  { %3552 = vrcp.f32 %v2566_v3  ;;  %v2578_v0 = vand.u32 2147483648, %v2566_v3  ;;  %v2576_v10 = vand.u32 2147483647, %v2566_v3  ;;  %vm2572_vm8 = vweird.f32 %v2566_v3 }
 0x837   :  { %v2560_v60 = vor.u32 1.1754944e-38, %v2559_v47  ;;  %vm2558_vm11 = vcmp.eq.f32.partialorder %v2557_v7, 8.507059e+37  ;;  %v6683_v7 = vld [vmem:[#allocation57_spill] sm:$0xff] }
 0x838   :  { %vm2577_vm12 = vcmp.eq.f32.partialorder %v2576_v10, 8.507059e+37 }
 0x839   :  { %v3549_v55 = vpop.eup %3548 }
 0x83a   :  { %v2586_v61 = vadd.f32 1.0, %v3549_v55 }
 0x83b   :  { %v3551_v54 = vpop.eup %3550 }
 0x83c   :  { %v3553_v53 = vpop.eup %3552  ;;  %v2549_v57 = vmul.f32 %v3551_v54, %v2547_v25  ;;  %3554 = vrcp.f32 %v2586_v61  ;;  %vm2554_vm5 = vweird.f32 %v3551_v54  ;;  %vm2592_vm14 = vweird.f32 %v2586_v61 }
 0x83d   :  { %v2568_v9 = vmul.f32 %v3553_v53, %v2566_v3  ;;  %3556 = vtanh.f32 %v2542_v39  ;;  %vm2573_vm6 = vweird.f32 %v3553_v53  ;;  %vm2555_vm9 = vmor %vm2553_vm7, %vm2554_vm5  ;;  %v2596_v47 = vand.u32 2147483647, %v2586_v61 }
 0x83e   :  { %v2550_v44 = vsub.f32 1.0, %v2549_v57  ;;  %vm2574_vm10 = vmor %vm2572_vm8, %vm2573_vm6  ;;  %v2579_v57 = vor.u32 1.1754944e-38, %v2578_v0 }
 0x83f   :  { %v2569_v35 = vsub.f32 1.0, %v2568_v9  ;;  %vm2597_vm0 = vcmp.eq.f32.partialorder %v2596_v47, 8.507059e+37  ;;  %v6696_v47 = vld [vmem:[#allocation34_spill] sm:$0xff] }
 0x840   :  { %v2551_v41 = vmul.f32 %v3551_v54, %v2550_v44 }
 0x841   :  { %v2570_v58 = vmul.f32 %v3553_v53, %v2569_v35 }
 0x842   :  { %v3555_v62 = vpop.eup %3554  ;;  %v2552_v42 = vadd.f32 %v3551_v54, %v2551_v41 }
 0x843   :  { %v2571_v55 = vadd.f32 %v3553_v53, %v2570_v58  ;;  %v2588_v24 = vmul.f32 %v3555_v62, %v2586_v61  ;;  %v3557_v39 = vpop.eup %3556  ;;  %vm2593_vm13 = vweird.f32 %v3555_v62  ;;  %v2598_v58 = vand.u32 2147483648, %v2586_v61  ;;  %v6682_v61 = vld [vmem:[#allocation29_spill] sm:$0xff] }
 0x844   :  { %v2556_v9 = vsel %vm2555_vm9, %v3551_v54, %v2552_v42  ;;  %vm2594_vm15 = vmor %vm2592_vm14, %vm2593_vm13  ;;  %v6684_v42 = vld [vmem:[#allocation58_spill] sm:$0xff] }
 0x845   :  { %v2561_v49 = vsel %vm2558_vm11, %v2560_v60, %v2556_v9  ;;  %v2575_v44 = vsel %vm2574_vm10, %v3553_v53, %v2571_v55  ;;  %v2589_v28 = vsub.f32 1.0, %v2588_v24  ;;  %v2599_v10 = vor.u32 1.1754944e-38, %v2598_v58  ;;  %v6685_v60 = vld [vmem:[#allocation59_spill] sm:$0xff]  ;;  %v6686_v55 = vld [vmem:[#allocation33_spill] sm:$0xff]  ;;  %v6687_v24 = vld [vmem:[#allocation62_spill] sm:$0xff] }
 0x846   :  { %v2580_v35 = vsel %vm2577_vm12, %v2579_v57, %v2575_v44  ;;  %v2603_v37 = vmul.f32 %v3557_v39, %v2561_v49  ;;  %v6688_v57 = vld [vmem:[#allocation28_spill] sm:$0xff]  ;;  %v6689_v9 = vld [vmem:[#allocation27_spill] sm:$0xff]  ;;  %v6690_v39 = vld [vmem:[#allocation37_spill] sm:$0xff] }
 0x847   :  { %v2602_v48 = vmul.f32 %v2580_v35, %v5732_v6  ;;  %v2590_v41 = vmul.f32 %v3555_v62, %v2589_v28  ;;  %v6677_v6 = vld [vmem:[#allocation53_spill] sm:$0xff]  ;;  %v6680_v28 = vld [vmem:[#allocation56_spill] sm:$0xff]  ;;  %v6691_v44 = vld [vmem:[#allocation30_spill] sm:$0xff] }
 0x848   :  { %v6692_v35 = vld [vmem:[#allocation32_spill] sm:$0xff]  ;;  %v6695_v58 = vld [vmem:[#allocation35_spill] sm:$0xff] }
 0x849   :  { %v5809_v25 = vadd.f32 %v2603_v37, %v2602_v48  ;;  %v2591_v3 = vadd.f32 %v3555_v62, %v2590_v41  ;;  %v6678_v48 = vld [vmem:[#allocation26_spill] sm:$0xff]  ;;  %v6693_v41 = vld [vmem:[#allocation31_spill] sm:$0xff] }
 0x84a   :  { %v6679_v37 = vld [vmem:[#allocation54_spill] sm:$0xff] }
 0x84b   :  { %3558 = vtanh.f32 %v5809_v25  ;;  %2610 = vst [vmem:[#allocation13 + $0x18] sm:$0xff] %v5809_v25  ;;  %v2595_v54 = vsel %vm2594_vm15, %v3555_v62, %v2591_v3  ;;  %v6681_v62 = vld [vmem:[#allocation55_spill] sm:$0xff]  ;;  %v6694_v3 = vld [vmem:[#allocation40_spill] sm:$0xff] }
 0x84c   :  { %v2600_v49 = vsel %vm2597_vm0, %v2599_v10, %v2595_v54  ;;  %v6697_v54 = vld [vmem:[#allocation36_spill] sm:$0xff]  ;;  %v6698_v10 = vld [vmem:[#allocation43_spill] sm:$0xff] }
 0x851   :  { %v3559_v53 = vpop.eup %3558 }
 0x852   :  { %v2606_v0 = vmul.f32 %v3559_v53, %v2600_v49  ;;  %v6699_v53 = vld [vmem:[#allocation41_spill] sm:$0xff]  ;;  %v6700_v49 = vld [vmem:[#allocation38_spill] sm:$0xff] }
 0x854   :  { %2608 = vst [vmem:[#allocation12 + $0x18] sm:$0xff] %v2606_v0  ;;  %2631 = vmatmul.f32.vlgmr.msra.gmra.mxu0 %v2606_v0  ;;  %2651 = vmatmul.f32.vlgmr.msra.gmra.mxu1 %v2606_v0 }
 0x855   :  { %2671 = vmatmul.f32.vlgmr.msra.gmra.mxu2 %v2606_v0  ;;  %2691 = vmatmul.f32.vlgmr.msra.gmra.mxu3 %v2606_v0  ;;  %v6701_v0 = vld [vmem:[#allocation39_spill] sm:$0xff] }
 0x856   :  { %2925 = vmatpush.msra.mxu0 %v5531_v17  ;;  %2945 = vmatpush.msra.mxu1 %v5534_v56 }
 0x857   :  { %2965 = vmatpush.msra.mxu2 %v5537_v33  ;;  %2985 = vmatpush.msra.mxu3 %v5540_v19 }
 0x858   :  { %2926 = vmatpush.msra.mxu0 %v5543_v21  ;;  %2946 = vmatpush.msra.mxu1 %v5546_v20 }
 0x859   :  { %2966 = vmatpush.msra.mxu2 %v5549_v14  ;;  %2986 = vmatpush.msra.mxu3 %v5552_v43 }
 0x85a   :  { %2927 = vmatpush.msra.mxu0 %v5555_v40  ;;  %2947 = vmatpush.msra.mxu1 %v5558_v52 }
 0x85b   :  { %2967 = vmatpush.msra.mxu2 %v5561_v1  ;;  %2987 = vmatpush.msra.mxu3 %v5564_v59 }
 0x85c   :  { %2928 = vmatpush.msra.mxu0 %v5567_v13  ;;  %2948 = vmatpush.msra.mxu1 %v5570_v34 }
 0x85d   :  { %2968 = vmatpush.msra.mxu2 %v5573_v31  ;;  %2988 = vmatpush.msra.mxu3 %v5576_v5 }
 0x85e   :  { %2929 = vmatpush.msra.mxu0 %v5579_v15  ;;  %2949 = vmatpush.msra.mxu1 %v5582_v22 }
 0x85f   :  { %2969 = vmatpush.msra.mxu2 %v5585_v23  ;;  %2989 = vmatpush.msra.mxu3 %v5588_v63 }
 0x860   :  { %2930 = vmatpush.msra.mxu0 %v5591_v45  ;;  %2950 = vmatpush.msra.mxu1 %v5594_v4 }
 0x861   :  { %2970 = vmatpush.msra.mxu2 %v5597_v38  ;;  %2990 = vmatpush.msra.mxu3 %v5600_v51 }
 0x862   :  { %2931 = vmatpush.msra.mxu0 %v5603_v18  ;;  %2951 = vmatpush.msra.mxu1 %v5606_v27 }
 0x863   :  { %2971 = vmatpush.msra.mxu2 %v5609_v29  ;;  %2991 = vmatpush.msra.mxu3 %v5612_v36 }
 0x864   :  { %2932 = vmatpush.msra.mxu0 %v5615_v12  ;;  %2952 = vmatpush.msra.mxu1 %v5618_v8 }
 0x865   :  { %2972 = vmatpush.msra.mxu2 %v5621_v2  ;;  %2992 = vmatpush.msra.mxu3 %v5624_v46 }
 0x866   :  { %2933 = vmatpush.msra.mxu0 %v5627_v11  ;;  %2953 = vmatpush.msra.mxu1 %v5630_v32 }
 0x867   :  { %2973 = vmatpush.msra.mxu2 %v5633_v50  ;;  %2993 = vmatpush.msra.mxu3 %v5636_v30 }
 0x868   :  { %2934 = vmatpush.msra.mxu0 %v5639_v26  ;;  %2954 = vmatpush.msra.mxu1 %v5642_v16 }
 0x869   :  { %2974 = vmatpush.msra.mxu2 %v6677_v6  ;;  %2994 = vmatpush.msra.mxu3 %v6678_v48 }
 0x86a   :  { %2935 = vmatpush.msra.mxu0 %v6679_v37  ;;  %2955 = vmatpush.msra.mxu1 %v6680_v28 }
 0x86b   :  { %2975 = vmatpush.msra.mxu2 %v6681_v62  ;;  %2995 = vmatpush.msra.mxu3 %v6682_v61 }
 0x86c   :  { %2936 = vmatpush.msra.mxu0 %v6683_v7  ;;  %2956 = vmatpush.msra.mxu1 %v6684_v42 }
 0x86d   :  { %2976 = vmatpush.msra.mxu2 %v6685_v60  ;;  %2996 = vmatpush.msra.mxu3 %v6686_v55  ;;  %v6708_v60 = vld [vmem:[#allocation66_spill] sm:$0xff] }
 0x86e   :  { %2937 = vmatpush.msra.mxu0 %v6687_v24  ;;  %2957 = vmatpush.msra.mxu1 %v6688_v57 }
 0x86f   :  { %2977 = vmatpush.msra.mxu2 %v6689_v9  ;;  %2997 = vmatpush.msra.mxu3 %v6690_v39  ;;  %v6706_v9 = vld [vmem:[#allocation63_spill] sm:$0xff] }
 0x870   :  { %2938 = vmatpush.msra.mxu0 %v6691_v44  ;;  %2958 = vmatpush.msra.mxu1 %v6692_v35  ;;  %v6702_v44 = vld [vmem:[#allocation44_spill] sm:$0xff]  ;;  %v6703_v35 = vld [vmem:[#allocation73_spill] sm:$0xff] }
 0x871   :  { %2978 = vmatpush.msra.mxu2 %v6693_v41  ;;  %2998 = vmatpush.msra.mxu3 %v6694_v3  ;;  %v6704_v41 = vld [vmem:[#allocation74_spill] sm:$0xff]  ;;  %v6705_v3 = vld [vmem:[#allocation75_spill] sm:$0xff] }
 0x872   :  { %2939 = vmatpush.msra.mxu0 %v6695_v58  ;;  %2959 = vmatpush.msra.mxu1 %v6696_v47  ;;  %v1823_v39 = vadd.f32 %v6704_v41, %v6703_v35  ;;  %v1864_v58 = vadd.f32 %v6706_v9, %v6705_v3 }
 0x873   :  { %2979 = vmatpush.msra.mxu2 %v6697_v54  ;;  %2999 = vmatpush.msra.mxu3 %v6698_v10 }
 0x874   :  { %2940 = vmatpush.msra.mxu0 %v6699_v53  ;;  %2960 = vmatpush.msra.mxu1 %v6700_v49  ;;  %v6707_v53 = vld [vmem:[#allocation24_spill] sm:$0xff] }
 0x875   :  { %2980 = vmatpush.msra.mxu2 %v6701_v0  ;;  %3000 = vmatpush.msra.mxu3 %v6702_v44  ;;  %v1946_v49 = vadd.f32 %v6708_v60, %v6707_v53 }
 0x8d1   :  { %v2632_v57 = vpop.f32.mrf.mxu0  ;;  %v2652_v47 = vpop.f32.mrf.mxu1 }
 0x8d2   :  { %v2695_v24 = vadd.f32 %v2632_v57, %v1823_v39  ;;  %v2696_v54 = vadd.f32 %v2652_v47, %v1864_v58  ;;  %v6709_v39 = vld [vmem:[#allocation23_spill] sm:$0xff] }
 0x8d4   :  { %v3346_v55 = vmul.f32 -1.442695, %v2695_v24  ;;  %v3347_v10 = vmul.f32 -1.442695, %v2696_v54  ;;  %v6710_v24 = vld [vmem:[#allocation67_spill] sm:$0xff] }
 0x8d5   :  { %v1905_v58 = vadd.f32 %v6710_v24, %v6709_v39 }
 0x8d6   :  { %3560 = vpow2.f32 %v3346_v55 }
 0x8d7   :  { %3562 = vpow2.f32 %v3347_v10 }
 0x8d8   :  { %v2692_v0 = vpop.f32.mrf.mxu3  ;;  %v2672_v9 = vpop.f32.mrf.mxu2 }
 0x8d9   :  { %v2698_v42 = vadd.f32 %v2692_v0, %v1946_v49  ;;  %v2697_v54 = vadd.f32 %v2672_v9, %v1905_v58 }
 0x8db   :  { %v3348_v44 = vmul.f32 -1.442695, %v2698_v42 }
 0x8dc   :  { %v3561_v7 = vpop.eup %3560 }
 0x8dd   :  { %v3563_v61 = vpop.eup %3562  ;;  %v2702_v41 = vadd.f32 1.0, %v3561_v7  ;;  %3564 = vpow2.f32 %v3348_v44 }
 0x8de   :  { %v2721_v35 = vadd.f32 1.0, %v3563_v61 }
 0x8df   :  { %3566 = vrcp.f32 %v2702_v41  ;;  %v2714_v53 = vand.u32 2147483648, %v2702_v41  ;;  %v2712_v44 = vand.u32 2147483647, %v2702_v41  ;;  %vm2708_vm3 = vweird.f32 %v2702_v41 }
 0x8e0   :  { %3568 = vrcp.f32 %v2721_v35  ;;  %v2733_v7 = vand.u32 2147483648, %v2721_v35  ;;  %v2731_v62 = vand.u32 2147483647, %v2721_v35  ;;  %vm2727_vm4 = vweird.f32 %v2721_v35 }
 0x8e1   :  { %v2715_v9 = vor.u32 1.1754944e-38, %v2714_v53  ;;  %vm2713_vm7 = vcmp.eq.f32.partialorder %v2712_v44, 8.507059e+37 }
 0x8e2   :  { %vm2732_vm8 = vcmp.eq.f32.partialorder %v2731_v62, 8.507059e+37 }
 0x8e3   :  { %v3565_v57 = vpop.eup %3564 }
 0x8e4   :  { %v2741_v55 = vadd.f32 1.0, %v3565_v57 }
 0x8e5   :  { %v3567_v47 = vpop.eup %3566 }
 0x8e6   :  { %v3569_v60 = vpop.eup %3568  ;;  %v2704_v10 = vmul.f32 %v3567_v47, %v2702_v41  ;;  %3570 = vrcp.f32 %v2741_v55  ;;  %vm2709_vm1 = vweird.f32 %v3567_v47  ;;  %vm2747_vm10 = vweird.f32 %v2741_v55 }
 0x8e7   :  { %v2723_v49 = vmul.f32 %v3569_v60, %v2721_v35  ;;  %3572 = vtanh.f32 %v2697_v54  ;;  %vm2728_vm2 = vweird.f32 %v3569_v60  ;;  %vm2710_vm5 = vmor %vm2708_vm3, %vm2709_vm1  ;;  %v2751_v53 = vand.u32 2147483647, %v2741_v55 }
 0x8e8   :  { %v2705_v42 = vsub.f32 1.0, %v2704_v10  ;;  %vm2729_vm6 = vmor %vm2727_vm4, %vm2728_vm2  ;;  %v2734_v10 = vor.u32 1.1754944e-38, %v2733_v7 }
 0x8e9   :  { %v2724_v0 = vsub.f32 1.0, %v2723_v49  ;;  %vm2752_vm12 = vcmp.eq.f32.partialorder %v2751_v53, 8.507059e+37 }
 0x8ea   :  { %v2706_v61 = vmul.f32 %v3567_v47, %v2705_v42 }
 0x8eb   :  { %v2725_v3 = vmul.f32 %v3569_v60, %v2724_v0 }
 0x8ec   :  { %v3571_v28 = vpop.eup %3570  ;;  %v2707_v24 = vadd.f32 %v3567_v47, %v2706_v61 }
 0x8ed   :  { %v2726_v57 = vadd.f32 %v3569_v60, %v2725_v3  ;;  %v2743_v58 = vmul.f32 %v3571_v28, %v2741_v55  ;;  %v3573_v54 = vpop.eup %3572  ;;  %vm2748_vm9 = vweird.f32 %v3571_v28  ;;  %v2753_v3 = vand.u32 2147483648, %v2741_v55 }
 0x8ee   :  { %v2711_v49 = vsel %vm2710_vm5, %v3567_v47, %v2707_v24  ;;  %vm2749_vm11 = vmor %vm2747_vm10, %vm2748_vm9 }
 0x8ef   :  { %v2716_v39 = vsel %vm2713_vm7, %v2715_v9, %v2711_v49  ;;  %v2730_v42 = vsel %vm2729_vm6, %v3569_v60, %v2726_v57  ;;  %v2744_v37 = vsub.f32 1.0, %v2743_v58  ;;  %v2754_v62 = vor.u32 1.1754944e-38, %v2753_v3  ;;  %v6743_v49 = vld [vmem:[#allocation23_spill] sm:$0xff] }
 0x8f0   :  { %v2735_v0 = vsel %vm2732_vm8, %v2734_v10, %v2730_v42  ;;  %v2758_v48 = vmul.f32 %v3573_v54, %v2716_v39  ;;  %v6744_v54 = vld [vmem:[#allocation25_spill] sm:$0xff] }
 0x8f1   :  { %v2757_v6 = vmul.f32 %v2735_v0, %v5809_v25  ;;  %v2745_v61 = vmul.f32 %v3571_v28, %v2744_v37  ;;  %v6741_v25 = vld [vmem:[#allocation24_spill] sm:$0xff]  ;;  %v1908_v42 = vadd.f32 %v6744_v54, %v6743_v49 }
 0x8f3   :  { %v5886_v41 = vadd.f32 %v2758_v48, %v2757_v6  ;;  %v2746_v35 = vadd.f32 %v3571_v28, %v2745_v61  ;;  %v6742_v6 = vld [vmem:[#allocation72_spill] sm:$0xff] }
 0x8f4   :  { %v1949_v48 = vadd.f32 %v6742_v6, %v6741_v25 }
 0x8f5   :  { %3574 = vtanh.f32 %v5886_v41  ;;  %2765 = vst [vmem:[#allocation13 + $0x20] sm:$0xff] %v5886_v41  ;;  %v2750_v47 = vsel %vm2749_vm11, %v3571_v28, %v2746_v35 }
 0x8f6   :  { %v2755_v39 = vsel %vm2752_vm12, %v2754_v62, %v2750_v47 }
 0x8fb   :  { %v3575_v60 = vpop.eup %3574 }
 0x8fc   :  { %v2761_v7 = vmul.f32 %v3575_v60, %v2755_v39 }
 0x8fe   :  { %2763 = vst [vmem:[#allocation12 + $0x20] sm:$0xff] %v2761_v7  ;;  %2786 = vmatmul.f32.vlgmr.msrb.gmra.mxu0 %v2761_v7  ;;  %2806 = vmatmul.f32.vlgmr.msrb.gmra.mxu1 %v2761_v7 }
 0x8ff   :  { %2826 = vmatmul.f32.vlgmr.msrb.gmra.mxu2 %v2761_v7  ;;  %2846 = vmatmul.f32.vlgmr.msrb.gmra.mxu3 %v2761_v7 }
 0x900   :  { %3080 = vmatpush.msrb.mxu0 %v5531_v17  ;;  %3100 = vmatpush.msrb.mxu1 %v5534_v56  ;;  %v6711_v17 = vld [vmem:[#allocation53_spill] sm:$0xff]  ;;  %v6712_v56 = vld [vmem:[#allocation26_spill] sm:$0xff] }
 0x901   :  { %3120 = vmatpush.msrb.mxu2 %v5537_v33  ;;  %3140 = vmatpush.msrb.mxu3 %v5540_v19  ;;  %v6713_v33 = vld [vmem:[#allocation54_spill] sm:$0xff]  ;;  %v6714_v19 = vld [vmem:[#allocation56_spill] sm:$0xff] }
 0x902   :  { %3081 = vmatpush.msrb.mxu0 %v5543_v21  ;;  %3101 = vmatpush.msrb.mxu1 %v5546_v20  ;;  %v6715_v21 = vld [vmem:[#allocation55_spill] sm:$0xff]  ;;  %v6716_v20 = vld [vmem:[#allocation29_spill] sm:$0xff] }
 0x903   :  { %3121 = vmatpush.msrb.mxu2 %v5549_v14  ;;  %3141 = vmatpush.msrb.mxu3 %v5552_v43  ;;  %v6717_v14 = vld [vmem:[#allocation57_spill] sm:$0xff]  ;;  %v6718_v43 = vld [vmem:[#allocation58_spill] sm:$0xff] }
 0x904   :  { %3082 = vmatpush.msrb.mxu0 %v5555_v40  ;;  %3102 = vmatpush.msrb.mxu1 %v5558_v52  ;;  %v6719_v40 = vld [vmem:[#allocation59_spill] sm:$0xff]  ;;  %v6720_v52 = vld [vmem:[#allocation33_spill] sm:$0xff] }
 0x905   :  { %3122 = vmatpush.msrb.mxu2 %v5561_v1  ;;  %3142 = vmatpush.msrb.mxu3 %v5564_v59  ;;  %v6721_v1 = vld [vmem:[#allocation62_spill] sm:$0xff]  ;;  %v6722_v59 = vld [vmem:[#allocation28_spill] sm:$0xff] }
 0x906   :  { %3083 = vmatpush.msrb.mxu0 %v5567_v13  ;;  %3103 = vmatpush.msrb.mxu1 %v5570_v34  ;;  %v6723_v13 = vld [vmem:[#allocation27_spill] sm:$0xff]  ;;  %v6724_v34 = vld [vmem:[#allocation37_spill] sm:$0xff] }
 0x907   :  { %3123 = vmatpush.msrb.mxu2 %v5573_v31  ;;  %3143 = vmatpush.msrb.mxu3 %v5576_v5  ;;  %v6725_v31 = vld [vmem:[#allocation30_spill] sm:$0xff]  ;;  %v6726_v5 = vld [vmem:[#allocation32_spill] sm:$0xff] }
 0x908   :  { %3084 = vmatpush.msrb.mxu0 %v5579_v15  ;;  %3104 = vmatpush.msrb.mxu1 %v5582_v22  ;;  %v6727_v15 = vld [vmem:[#allocation31_spill] sm:$0xff]  ;;  %v6728_v22 = vld [vmem:[#allocation40_spill] sm:$0xff] }
 0x909   :  { %3124 = vmatpush.msrb.mxu2 %v5585_v23  ;;  %3144 = vmatpush.msrb.mxu3 %v5588_v63  ;;  %v6729_v23 = vld [vmem:[#allocation35_spill] sm:$0xff]  ;;  %v6730_v63 = vld [vmem:[#allocation34_spill] sm:$0xff] }
 0x90a   :  { %3085 = vmatpush.msrb.mxu0 %v5591_v45  ;;  %3105 = vmatpush.msrb.mxu1 %v5594_v4  ;;  %v6731_v45 = vld [vmem:[#allocation36_spill] sm:$0xff]  ;;  %v6732_v4 = vld [vmem:[#allocation43_spill] sm:$0xff] }
 0x90b   :  { %3125 = vmatpush.msrb.mxu2 %v5597_v38  ;;  %3145 = vmatpush.msrb.mxu3 %v5600_v51  ;;  %v6733_v38 = vld [vmem:[#allocation41_spill] sm:$0xff]  ;;  %v6734_v51 = vld [vmem:[#allocation38_spill] sm:$0xff] }
 0x90c   :  { %3086 = vmatpush.msrb.mxu0 %v5603_v18  ;;  %3106 = vmatpush.msrb.mxu1 %v5606_v27  ;;  %v6735_v18 = vld [vmem:[#allocation39_spill] sm:$0xff]  ;;  %v6736_v27 = vld [vmem:[#allocation44_spill] sm:$0xff] }
 0x90d   :  { %3126 = vmatpush.msrb.mxu2 %v5609_v29  ;;  %3146 = vmatpush.msrb.mxu3 %v5612_v36  ;;  %v6737_v29 = vld [vmem:[#allocation73_spill] sm:$0xff]  ;;  %v6738_v36 = vld [vmem:[#allocation64_spill] sm:$0xff] }
 0x90e   :  { %3087 = vmatpush.msrb.mxu0 %v5615_v12  ;;  %3107 = vmatpush.msrb.mxu1 %v5618_v8  ;;  %v1826_v12 = vadd.f32 %v6738_v36, %v6737_v29  ;;  %v6739_v8 = vld [vmem:[#allocation75_spill] sm:$0xff] }
 0x90f   :  { %3127 = vmatpush.msrb.mxu2 %v5621_v2  ;;  %3147 = vmatpush.msrb.mxu3 %v5624_v46  ;;  %v6740_v2 = vld [vmem:[#allocation65_spill] sm:$0xff] }
 0x910   :  { %3088 = vmatpush.msrb.mxu0 %v5627_v11  ;;  %3108 = vmatpush.msrb.mxu1 %v5630_v32  ;;  %v1867_v46 = vadd.f32 %v6740_v2, %v6739_v8 }
 0x911   :  { %3128 = vmatpush.msrb.mxu2 %v5633_v50  ;;  %3148 = vmatpush.msrb.mxu3 %v5636_v30 }
 0x912   :  { %3089 = vmatpush.msrb.mxu0 %v5639_v26  ;;  %3109 = vmatpush.msrb.mxu1 %v5642_v16 }
 0x913   :  { %3129 = vmatpush.msrb.mxu2 %v6711_v17  ;;  %3149 = vmatpush.msrb.mxu3 %v6712_v56 }
 0x914   :  { %3090 = vmatpush.msrb.mxu0 %v6713_v33  ;;  %3110 = vmatpush.msrb.mxu1 %v6714_v19 }
 0x915   :  { %3130 = vmatpush.msrb.mxu2 %v6715_v21  ;;  %3150 = vmatpush.msrb.mxu3 %v6716_v20 }
 0x916   :  { %3091 = vmatpush.msrb.mxu0 %v6717_v14  ;;  %3111 = vmatpush.msrb.mxu1 %v6718_v43 }
 0x917   :  { %3131 = vmatpush.msrb.mxu2 %v6719_v40  ;;  %3151 = vmatpush.msrb.mxu3 %v6720_v52 }
 0x918   :  { %3092 = vmatpush.msrb.mxu0 %v6721_v1  ;;  %3112 = vmatpush.msrb.mxu1 %v6722_v59 }
 0x919   :  { %3132 = vmatpush.msrb.mxu2 %v6723_v13  ;;  %3152 = vmatpush.msrb.mxu3 %v6724_v34 }
 0x91a   :  { %3093 = vmatpush.msrb.mxu0 %v6725_v31  ;;  %3113 = vmatpush.msrb.mxu1 %v6726_v5 }
 0x91b   :  { %3133 = vmatpush.msrb.mxu2 %v6727_v15  ;;  %3153 = vmatpush.msrb.mxu3 %v6728_v22 }
 0x91c   :  { %3094 = vmatpush.msrb.mxu0 %v6729_v23  ;;  %3114 = vmatpush.msrb.mxu1 %v6730_v63 }
 0x91d   :  { %3134 = vmatpush.msrb.mxu2 %v6731_v45  ;;  %3154 = vmatpush.msrb.mxu3 %v6732_v4 }
 0x91e   :  { %3095 = vmatpush.msrb.mxu0 %v6733_v38  ;;  %3115 = vmatpush.msrb.mxu1 %v6734_v51 }
 0x91f   :  { %3135 = vmatpush.msrb.mxu2 %v6735_v18  ;;  %3155 = vmatpush.msrb.mxu3 %v6736_v27 }
 0x97b   :  { %v2787_v11 = vpop.f32.mrf.mxu0  ;;  %v2807_v32 = vpop.f32.mrf.mxu1 }
 0x97c   :  { %v2850_v50 = vadd.f32 %v2787_v11, %v1826_v12  ;;  %v2851_v30 = vadd.f32 %v2807_v32, %v1867_v46  ;;  %v6746_v46 = vld [vmem:[#allocation20_spill] sm:$0xff] }
 0x97d   :  { %v1870_v11 = vadd.f32 %v6746_v46, %v6739_v8 }
 0x97e   :  { %v3349_v26 = vmul.f32 -1.442695, %v2850_v50  ;;  %v3350_v16 = vmul.f32 -1.442695, %v2851_v30 }
 0x980   :  { %3576 = vpow2.f32 %v3349_v26 }
 0x981   :  { %3578 = vpow2.f32 %v3350_v16 }
 0x982   :  { %v2847_v37 = vpop.f32.mrf.mxu3  ;;  %v2827_v58 = vpop.f32.mrf.mxu2 }
 0x983   :  { %v2853_v28 = vadd.f32 %v2847_v37, %v1949_v48  ;;  %v2852_v35 = vadd.f32 %v2827_v58, %v1908_v42  ;;  %v6747_v48 = vld [vmem:[#allocation51_spill] sm:$0xff] }
 0x984   :  { %v1952_v37 = vadd.f32 %v6747_v48, %v6741_v25  ;;  %v6748_v42 = vld [vmem:[#allocation19_spill] sm:$0xff] }
 0x985   :  { %v3351_v55 = vmul.f32 -1.442695, %v2853_v28 }
 0x986   :  { %v3577_v44 = vpop.eup %3576 }
 0x987   :  { %v3579_v24 = vpop.eup %3578  ;;  %v2857_v9 = vadd.f32 1.0, %v3577_v44  ;;  %3580 = vpow2.f32 %v3351_v55 }
 0x988   :  { %v2876_v57 = vadd.f32 1.0, %v3579_v24 }
 0x989   :  { %3582 = vrcp.f32 %v2857_v9  ;;  %v2869_v39 = vand.u32 2147483648, %v2857_v9  ;;  %v2867_v56 = vand.u32 2147483647, %v2857_v9  ;;  %vm2863_vm15 = vweird.f32 %v2857_v9 }
 0x98a   :  { %3584 = vrcp.f32 %v2876_v57  ;;  %v2888_v7 = vand.u32 2147483648, %v2876_v57  ;;  %v2886_v19 = vand.u32 2147483647, %v2876_v57  ;;  %vm2882_vm0 = vweird.f32 %v2876_v57 }
 0x98b   :  { %v2870_v14 = vor.u32 1.1754944e-38, %v2869_v39  ;;  %vm2868_vm3 = vcmp.eq.f32.partialorder %v2867_v56, 8.507059e+37 }
 0x98c   :  { %v2889_v52 = vor.u32 1.1754944e-38, %v2888_v7  ;;  %vm2887_vm4 = vcmp.eq.f32.partialorder %v2886_v19, 8.507059e+37 }
 0x98d   :  { %v3581_v10 = vpop.eup %3580 }
 0x98e   :  { %v2896_v0 = vadd.f32 1.0, %v3581_v10 }
 0x98f   :  { %v3583_v61 = vpop.eup %3582 }
 0x990   :  { %v3585_v3 = vpop.eup %3584  ;;  %v2859_v53 = vmul.f32 %v3583_v61, %v2857_v9  ;;  %3586 = vrcp.f32 %v2896_v0  ;;  %vm2864_vm13 = vweird.f32 %v3583_v61  ;;  %v2908_v4 = vand.u32 2147483648, %v2896_v0 }
 0x991   :  { %v2878_v47 = vmul.f32 %v3585_v3, %v2876_v57  ;;  %3588 = vtanh.f32 %v2852_v35  ;;  %vm2883_vm14 = vweird.f32 %v3585_v3  ;;  %vm2865_vm1 = vmor %vm2863_vm15, %vm2864_vm13  ;;  %vm2902_vm6 = vweird.f32 %v2896_v0 }
 0x992   :  { %v2860_v62 = vsub.f32 1.0, %v2859_v53  ;;  %vm2884_vm2 = vmor %vm2882_vm0, %vm2883_vm14  ;;  %v2906_v38 = vand.u32 2147483647, %v2896_v0  ;;  %v2909_v18 = vor.u32 1.1754944e-38, %v2908_v4 }
 0x993   :  { %v2879_v60 = vsub.f32 1.0, %v2878_v47 }
 0x994   :  { %v2861_v17 = vmul.f32 %v3583_v61, %v2860_v62  ;;  %vm2907_vm8 = vcmp.eq.f32.partialorder %v2906_v38, 8.507059e+37 }
 0x995   :  { %v2880_v33 = vmul.f32 %v3585_v3, %v2879_v60 }
 0x996   :  { %v3587_v21 = vpop.eup %3586  ;;  %v2862_v20 = vadd.f32 %v3583_v61, %v2861_v17 }
 0x997   :  { %v2881_v43 = vadd.f32 %v3585_v3, %v2880_v33  ;;  %v2898_v40 = vmul.f32 %v3587_v21, %v2896_v0  ;;  %v3589_v59 = vpop.eup %3588  ;;  %vm2903_vm5 = vweird.f32 %v3587_v21  ;;  %v1911_v0 = vadd.f32 %v6748_v42, %v6743_v49 }
 0x998   :  { %v2866_v1 = vsel %vm2865_vm1, %v3583_v61, %v2862_v20  ;;  %vm2904_vm7 = vmor %vm2902_vm6, %vm2903_vm5 }
 0x999   :  { %v2871_v13 = vsel %vm2868_vm3, %v2870_v14, %v2866_v1  ;;  %v2885_v34 = vsel %vm2884_vm2, %v3585_v3, %v2881_v43  ;;  %v2899_v31 = vsub.f32 1.0, %v2898_v40 }
 0x99a   :  { %v2890_v5 = vsel %vm2887_vm4, %v2889_v52, %v2885_v34  ;;  %v2913_v15 = vmul.f32 %v3589_v59, %v2871_v13 }
 0x99b   :  { %v2912_v22 = vmul.f32 %v2890_v5, %v5886_v41  ;;  %v2900_v23 = vmul.f32 %v3587_v21, %v2899_v31  ;;  %v6745_v41 = vld [vmem:[#allocation77_spill] sm:$0xff] }
 0x99c   :  { %v1829_v2 = vadd.f32 %v6745_v41, %v6737_v29 }
 0x99d   :  { %v5963_v63 = vadd.f32 %v2913_v15, %v2912_v22  ;;  %v2901_v45 = vadd.f32 %v3587_v21, %v2900_v23 }
 0x99f   :  { %3590 = vtanh.f32 %v5963_v63  ;;  %2920 = vst [vmem:[#allocation13 + $0x28] sm:$0xff] %v5963_v63  ;;  %v2905_v51 = vsel %vm2904_vm7, %v3587_v21, %v2901_v45 }
 0x9a0   :  { %v2910_v36 = vsel %vm2907_vm8, %v2909_v18, %v2905_v51 }
 0x9a5   :  { %v3591_v27 = vpop.eup %3590 }
 0x9a6   :  { %v2916_v12 = vmul.f32 %v3591_v27, %v2910_v36 }
 0x9a8   :  { %2918 = vst [vmem:[#allocation12 + $0x28] sm:$0xff] %v2916_v12  ;;  %2941 = vmatmul.f32.vlgmr.msra.gmra.mxu0 %v2916_v12  ;;  %2961 = vmatmul.f32.vlgmr.msra.gmra.mxu1 %v2916_v12 }
 0x9a9   :  { %2981 = vmatmul.f32.vlgmr.msra.gmra.mxu2 %v2916_v12  ;;  %3001 = vmatmul.f32.vlgmr.msra.gmra.mxu3 %v2916_v12 }
 0xa25   :  { %v2942_v32 = vpop.f32.mrf.mxu0  ;;  %v2962_v50 = vpop.f32.mrf.mxu1 }
 0xa26   :  { %v3005_v30 = vadd.f32 %v2942_v32, %v1829_v2  ;;  %v3006_v26 = vadd.f32 %v2962_v50, %v1870_v11  ;;  %v6750_v11 = vld [vmem:[#allocation69_spill] sm:$0xff] }
 0xa27   :  { %v1873_v32 = vadd.f32 %v6750_v11, %v6739_v8 }
 0xa28   :  { %v3352_v16 = vmul.f32 -1.442695, %v3005_v30  ;;  %v3353_v6 = vmul.f32 -1.442695, %v3006_v26 }
 0xa2a   :  { %3592 = vpow2.f32 %v3352_v16 }
 0xa2b   :  { %3594 = vpow2.f32 %v3353_v6 }
 0xa2c   :  { %v3002_v28 = vpop.f32.mrf.mxu3  ;;  %v2982_v10 = vpop.f32.mrf.mxu2 }
 0xa2d   :  { %v3008_v55 = vadd.f32 %v3002_v28, %v1952_v37  ;;  %v3007_v3 = vadd.f32 %v2982_v10, %v1911_v0  ;;  %v6751_v37 = vld [vmem:[#allocation21_spill] sm:$0xff] }
 0xa2e   :  { %v1955_v28 = vadd.f32 %v6751_v37, %v6741_v25 }
 0xa2f   :  { %v3354_v44 = vmul.f32 -1.442695, %v3008_v55 }
 0xa30   :  { %v3593_v24 = vpop.eup %3592 }
 0xa31   :  { %v3595_v9 = vpop.eup %3594  ;;  %v3012_v57 = vadd.f32 1.0, %v3593_v24  ;;  %3596 = vpow2.f32 %v3354_v44 }
 0xa32   :  { %v3031_v58 = vadd.f32 1.0, %v3595_v9 }
 0xa33   :  { %3598 = vrcp.f32 %v3012_v57  ;;  %v3024_v7 = vand.u32 2147483648, %v3012_v57  ;;  %v3022_v33 = vand.u32 2147483647, %v3012_v57  ;;  %vm3018_vm11 = vweird.f32 %v3012_v57 }
 0xa34   :  { %3600 = vrcp.f32 %v3031_v58  ;;  %v3043_v17 = vand.u32 2147483648, %v3031_v58  ;;  %v3041_v21 = vand.u32 2147483647, %v3031_v58  ;;  %vm3037_vm12 = vweird.f32 %v3031_v58 }
 0xa35   :  { %v3025_v43 = vor.u32 1.1754944e-38, %v3024_v7  ;;  %vm3023_vm15 = vcmp.eq.f32.partialorder %v3022_v33, 8.507059e+37 }
 0xa36   :  { %v3044_v1 = vor.u32 1.1754944e-38, %v3043_v17  ;;  %vm3042_vm0 = vcmp.eq.f32.partialorder %v3041_v21, 8.507059e+37 }
 0xa37   :  { %v3597_v54 = vpop.eup %3596 }
 0xa38   :  { %v3051_v61 = vadd.f32 1.0, %v3597_v54  ;;  %v6752_v54 = vld [vmem:[#allocation22_spill] sm:$0xff] }
 0xa39   :  { %v3599_v35 = vpop.eup %3598  ;;  %v1914_v42 = vadd.f32 %v6752_v54, %v6743_v49 }
 0xa3a   :  { %v3601_v53 = vpop.eup %3600  ;;  %v3014_v47 = vmul.f32 %v3599_v35, %v3012_v57  ;;  %3602 = vrcp.f32 %v3051_v61  ;;  %vm3019_vm9 = vweird.f32 %v3599_v35  ;;  %v3063_v51 = vand.u32 2147483648, %v3051_v61 }
 0xa3b   :  { %v3033_v62 = vmul.f32 %v3601_v53, %v3031_v58  ;;  %3604 = vtanh.f32 %v3007_v3  ;;  %vm3038_vm10 = vweird.f32 %v3601_v53  ;;  %vm3020_vm13 = vmor %vm3018_vm11, %vm3019_vm9  ;;  %vm3057_vm2 = vweird.f32 %v3051_v61 }
 0xa3c   :  { %v3015_v60 = vsub.f32 1.0, %v3014_v47  ;;  %vm3039_vm14 = vmor %vm3037_vm12, %vm3038_vm10  ;;  %v3061_v18 = vand.u32 2147483647, %v3051_v61  ;;  %v3064_v36 = vor.u32 1.1754944e-38, %v3063_v51 }
 0xa3d   :  { %v3034_v39 = vsub.f32 1.0, %v3033_v62 }
 0xa3e   :  { %v3016_v56 = vmul.f32 %v3599_v35, %v3015_v60  ;;  %vm3062_vm4 = vcmp.eq.f32.partialorder %v3061_v18, 8.507059e+37 }
 0xa3f   :  { %v3035_v19 = vmul.f32 %v3601_v53, %v3034_v39 }
 0xa40   :  { %v3603_v20 = vpop.eup %3602  ;;  %v3017_v14 = vadd.f32 %v3599_v35, %v3016_v56 }
 0xa41   :  { %v3036_v40 = vadd.f32 %v3601_v53, %v3035_v19  ;;  %v3053_v52 = vmul.f32 %v3603_v20, %v3051_v61  ;;  %v3605_v13 = vpop.eup %3604  ;;  %vm3058_vm1 = vweird.f32 %v3603_v20 }
 0xa42   :  { %v3021_v59 = vsel %vm3020_vm13, %v3599_v35, %v3017_v14  ;;  %vm3059_vm3 = vmor %vm3057_vm2, %vm3058_vm1 }
 0xa43   :  { %v3026_v34 = vsel %vm3023_vm15, %v3025_v43, %v3021_v59  ;;  %v3040_v31 = vsel %vm3039_vm14, %v3601_v53, %v3036_v40  ;;  %v3054_v5 = vsub.f32 1.0, %v3053_v52 }
 0xa44   :  { %v3045_v15 = vsel %vm3042_vm0, %v3044_v1, %v3040_v31  ;;  %v3068_v22 = vmul.f32 %v3605_v13, %v3026_v34 }
 0xa45   :  { %v3067_v23 = vmul.f32 %v3045_v15, %v5963_v63  ;;  %v3055_v45 = vmul.f32 %v3603_v20, %v3054_v5  ;;  %v6749_v63 = vld [vmem:[#allocation68_spill] sm:$0xff] }
 0xa46   :  { %v1832_v46 = vadd.f32 %v6749_v63, %v6737_v29 }
 0xa47   :  { %v5976_v4 = vadd.f32 %v3068_v22, %v3067_v23  ;;  %v3056_v38 = vadd.f32 %v3603_v20, %v3055_v45 }
 0xa49   :  { %3606 = vtanh.f32 %v5976_v4  ;;  %3075 = vst [vmem:[#allocation13 + $0x30] sm:$0xff] %v5976_v4  ;;  %v3060_v27 = vsel %vm3059_vm3, %v3603_v20, %v3056_v38 }
 0xa4a   :  { %v3065_v41 = vsel %vm3062_vm4, %v3064_v36, %v3060_v27 }
 0xa4f   :  { %v3607_v12 = vpop.eup %3606 }
 0xa50   :  { %v3071_v2 = vmul.f32 %v3607_v12, %v3065_v41 }
 0xa52   :  { %3073 = vst [vmem:[#allocation12 + $0x30] sm:$0xff] %v3071_v2  ;;  %3096 = vmatmul.f32.vlgmr.msrb.gmra.mxu0 %v3071_v2  ;;  %3116 = vmatmul.f32.vlgmr.msrb.gmra.mxu1 %v3071_v2 }
 0xa53   :  { %3136 = vmatmul.f32.vlgmr.msrb.gmra.mxu2 %v3071_v2  ;;  %3156 = vmatmul.f32.vlgmr.msrb.gmra.mxu3 %v3071_v2 }
 0xacf   :  { %v3097_v50 = vpop.f32.mrf.mxu0  ;;  %v3117_v30 = vpop.f32.mrf.mxu1 }
 0xad0   :  { %v3160_v26 = vadd.f32 %v3097_v50, %v1832_v46  ;;  %v3161_v16 = vadd.f32 %v3117_v30, %v1873_v32 }
 0xad2   :  { %v3355_v6 = vmul.f32 -1.442695, %v3160_v26  ;;  %v3356_v48 = vmul.f32 -1.442695, %v3161_v16 }
 0xad4   :  { %3608 = vpow2.f32 %v3355_v6 }
 0xad5   :  { %3610 = vpow2.f32 %v3356_v48 }
 0xad6   :  { %v3157_v55 = vpop.f32.mrf.mxu3  ;;  %v3137_v8 = vpop.f32.mrf.mxu2 }
 0xad7   :  { %v3163_v44 = vadd.f32 %v3157_v55, %v1955_v28  ;;  %v3162_v35 = vadd.f32 %v3137_v8, %v1914_v42 }
 0xad9   :  { %v3357_v24 = vmul.f32 -1.442695, %v3163_v44 }
 0xada   :  { %v3609_v9 = vpop.eup %3608 }
 0xadb   :  { %v3611_v57 = vpop.eup %3610  ;;  %v3167_v29 = vadd.f32 1.0, %v3609_v9  ;;  %3612 = vpow2.f32 %v3357_v24 }
 0xadc   :  { %v3186_v58 = vadd.f32 1.0, %v3611_v57 }
 0xadd   :  { %3614 = vrcp.f32 %v3167_v29  ;;  %v3179_v60 = vand.u32 2147483648, %v3167_v29  ;;  %v3177_v17 = vand.u32 2147483647, %v3167_v29  ;;  %vm3173_vm7 = vweird.f32 %v3167_v29 }
 0xade   :  { %3616 = vrcp.f32 %v3186_v58  ;;  %v3198_v39 = vand.u32 2147483648, %v3186_v58  ;;  %v3196_v33 = vand.u32 2147483647, %v3186_v58  ;;  %vm3192_vm8 = vweird.f32 %v3186_v58 }
 0xadf   :  { %v3180_v21 = vor.u32 1.1754944e-38, %v3179_v60  ;;  %vm3178_vm11 = vcmp.eq.f32.partialorder %v3177_v17, 8.507059e+37 }
 0xae0   :  { %v3199_v43 = vor.u32 1.1754944e-38, %v3198_v39  ;;  %vm3197_vm12 = vcmp.eq.f32.partialorder %v3196_v33, 8.507059e+37 }
 0xae1   :  { %v3613_v10 = vpop.eup %3612 }
 0xae2   :  { %v3206_v0 = vadd.f32 1.0, %v3613_v10 }
 0xae3   :  { %v3615_v61 = vpop.eup %3614 }
 0xae4   :  { %v3617_v25 = vpop.eup %3616  ;;  %v3169_v3 = vmul.f32 %v3615_v61, %v3167_v29  ;;  %3618 = vrcp.f32 %v3206_v0  ;;  %vm3174_vm5 = vweird.f32 %v3615_v61  ;;  %v3218_v45 = vand.u32 2147483648, %v3206_v0 }
 0xae5   :  { %v3188_v53 = vmul.f32 %v3617_v25, %v3186_v58  ;;  %3620 = vtanh.f32 %v3162_v35  ;;  %vm3193_vm6 = vweird.f32 %v3617_v25  ;;  %vm3175_vm9 = vmor %vm3173_vm7, %vm3174_vm5  ;;  %vm3212_vm14 = vweird.f32 %v3206_v0 }
 0xae6   :  { %v3170_v47 = vsub.f32 1.0, %v3169_v3  ;;  %vm3194_vm10 = vmor %vm3192_vm8, %vm3193_vm6  ;;  %v3216_v38 = vand.u32 2147483647, %v3206_v0  ;;  %v3219_v18 = vor.u32 1.1754944e-38, %v3218_v45 }
 0xae7   :  { %v3189_v62 = vsub.f32 1.0, %v3188_v53 }
 0xae8   :  { %v3171_v7 = vmul.f32 %v3615_v61, %v3170_v47  ;;  %vm3217_vm0 = vcmp.eq.f32.partialorder %v3216_v38, 8.507059e+37 }
 0xae9   :  { %v3190_v56 = vmul.f32 %v3617_v25, %v3189_v62 }
 0xaea   :  { %v3619_v19 = vpop.eup %3618  ;;  %v3172_v49 = vadd.f32 %v3615_v61, %v3171_v7 }
 0xaeb   :  { %v3191_v20 = vadd.f32 %v3617_v25, %v3190_v56  ;;  %v3208_v14 = vmul.f32 %v3619_v19, %v3206_v0  ;;  %v3621_v52 = vpop.eup %3620  ;;  %vm3213_vm13 = vweird.f32 %v3619_v19 }
 0xaec   :  { %v3176_v40 = vsel %vm3175_vm9, %v3615_v61, %v3172_v49  ;;  %vm3214_vm15 = vmor %vm3212_vm14, %vm3213_vm13 }
 0xaed   :  { %v3181_v1 = vsel %vm3178_vm11, %v3180_v21, %v3176_v40  ;;  %v3195_v59 = vsel %vm3194_vm10, %v3617_v25, %v3191_v20  ;;  %v3209_v13 = vsub.f32 1.0, %v3208_v14 }
 0xaee   :  { %v3200_v34 = vsel %vm3197_vm12, %v3199_v43, %v3195_v59  ;;  %v3223_v31 = vmul.f32 %v3621_v52, %v3181_v1 }
 0xaef   :  { %v3222_v5 = vmul.f32 %v3200_v34, %v5976_v4  ;;  %v3210_v15 = vmul.f32 %v3619_v19, %v3209_v13 }
 0xaf1   :  { %v3224_v22 = vadd.f32 %v3223_v31, %v3222_v5  ;;  %v3211_v23 = vadd.f32 %v3619_v19, %v3210_v15 }
 0xaf3   :  { %3622 = vtanh.f32 %v3224_v22  ;;  %3230 = vst [vmem:[#allocation13 + $0x38] sm:$0xff] %v3224_v22  ;;  %v3215_v51 = vsel %vm3214_vm15, %v3619_v19, %v3211_v23 }
 0xaf4   :  { %3258 = dma.vmem_to_hbm [thread:$0]  %s3251_s27, 1024, %s3253_s30, [#allocation14], %s3887_s9, %s3887_s9, %s3888_s10   ;;  %v3220_v27 = vsel %vm3217_vm0, %v3219_v18, %v3215_v51 }
 0xaf9   :  { %v3623_v4 = vpop.eup %3622 }
 0xafa   :  { %v3226_v36 = vmul.f32 %v3623_v4, %v3220_v27 }
 0xafc   :  { %3228 = vst [vmem:[#allocation12 + $0x38] sm:$0xff] %v3226_v36 }
 0xafd   :  { %3245 = dma.vmem_to_hbm [thread:$0]  %s3238_s11, 1024, %s3240_s14, [#allocation8], %s3887_s9, %s3887_s9, %s3888_s10  }
 0xafe   :  { %3876 = dma.done.wait [#allocation8], 1024  }
 0xaff   :  { %3877 = vsyncadd [#allocation8], 4294966272 }
 0xb00   :  { %3878 = dma.done.wait [#allocation14], 1024  }
 0xb01   :  { %3879 = vsyncadd [#allocation14], 4294966272 }
 0xb02   :  { %3267 = vsyncpa [#allocation7], 1 }
 0xb03   :  { %3268 = vsyncpa [#allocation10], 1 }
 0xb04   :  { %3269 = vsyncpa [#allocation8], 1 }
 0xb05   :  { %3270 = vsyncpa [#allocation14], 1 }

</bundles_post_ra>
